<compile_context>
chip_gen: v5e
topology: v5e:2x2
jax: 0.10.0
libtpu: 0.0.40
codegen_flags: <defaults>
</compile_context>

<pallas_src>
import functools

import jax
import jax.numpy as jnp
from jax.experimental import pallas as pl
from jax.experimental.pallas import tpu as pltpu

_LANE = 128      # lane (last-dim) granularity
_SUBLANE = 16    # sublane granularity (16 so bf16 tiles are always aligned)


def _round_up(n, m):
    return ((n + m - 1) // m) * m


def _device_kind():
    try:
        return jax.devices()[0].device_kind.lower()
    except Exception:
        return ""


def _num_tensorcores():
    # v7x presents 2 TensorCores per chip (grid axes marked "parallel" are
    # sharded across them); v5e / v6e are single-TC devices.
    return 2 if "v7" in _device_kind() else 1


def _use_bf16_epilogue():
    # v5e has no bf16 VALU -> keep the bias/ReLU epilogue in f32 there.
    kind = _device_kind()
    return ("v5" not in kind) if kind else True


def _default_block_m(batch, num_tc, cap=512):
    """Whole batch on single-TC chips; balanced split on dual-TC chips.
    Capped so very large batches don't blow VMEM."""
    per_core = -(-batch // max(num_tc, 1))          # ceil div
    return max(_SUBLANE, min(_round_up(per_core, _SUBLANE), cap))


def prepare_params(params):
    """One-time param prep (hoisted out of mlp_forward).

    params: list of (W, b) with W (in, out) f32, b (out,) f32.
    Returns (flat tuple [W0,b0,W1,b1,...] padded/cast, true output dim).

    Only OUTPUT feature dims are zero-padded to a lane-dense multiple of 128
    (zero cols/rows + zero bias contribute nothing, so the math is unchanged);
    the layer-0 input dim keeps its true size (Mosaic pads K internally).
    Weights are bf16 (MXU inputs), biases f32 (epilogue accuracy).
    """
    out_dim = params[-1][0].shape[1]
    flat = []
    for l, (w, b) in enumerate(params):
        di, do = w.shape
        di_p = di if l == 0 else _round_up(di, _LANE)
        do_p = _round_up(do, _LANE)
        if (di_p, do_p) == (di, do):
            w_p = w.astype(jnp.bfloat16)
        else:
            w_p = jnp.zeros((di_p, do_p), jnp.bfloat16)
            w_p = w_p.at[:di, :do].set(w.astype(jnp.bfloat16))
        if do_p == do:
            b_p = b.astype(jnp.float32).reshape(1, do)
        else:
            b_p = jnp.zeros((1, do_p), jnp.float32)
            b_p = b_p.at[0, :do].set(b.astype(jnp.float32))
        flat += [w_p, b_p]
    return tuple(flat), out_dim


def _make_mlp_kernel(num_layers, bf16_epilogue):
    """Fused MLP over one batch tile. Matmuls hit the MXU (bf16 in, f32 acc);
    bias-add stays f32; ReLU in bf16 where the VALU supports it."""

    def kernel(*refs):
        x_ref = refs[0]
        o_ref = refs[-1]
        wb = refs[1:-1]
        h = x_ref[...]                                          # bf16 (block_m, in)
        for l in range(num_layers):
            w_ref = wb[2 * l]
            b_ref = wb[2 * l + 1]
            h = jnp.dot(h, w_ref[...],
                        preferred_element_type=jnp.float32) + b_ref[...]
            if l < num_layers - 1:
                if bf16_epilogue:
                    # ReLU commutes with the downcast -> do it in bf16 (v6e/v7x).
                    h = jnp.maximum(h.astype(jnp.bfloat16), 0)
                else:
                    # v5e: no bf16 VALU -> ReLU in f32, then cast for the MXU.
                    h = jnp.maximum(h, 0.0).astype(jnp.bfloat16)
        o_ref[...] = h.astype(o_ref.dtype)                      # final layer: no activation

    return kernel


@functools.partial(jax.jit,
                   static_argnames=("block_m", "bf16_epilogue", "out_dim"))
def _mlp_forward_impl(x, flat, *, block_m, bf16_epilogue, out_dim):
    B, in_dim = x.shape
    num_layers = len(flat) // 2
    B_pad = _round_up(B, block_m)

    # Input: bf16 cast only; batch zero-pad only if the tile doesn't divide B.
    x_bf = x.astype(jnp.bfloat16)
    if B_pad != B:
        x_bf = jnp.pad(x_bf, ((0, B_pad - B), (0, 0)))

    # x block: full (unpadded) feature dim as the last block dim — legal because
    # it equals the full array dim; avoids the 32 -> 128 pad copy.
    in_specs = [pl.BlockSpec((block_m, in_dim), lambda i: (i, 0))]
    flops = 0
    bytes_accessed = x_bf.size * 2
    for l in range(num_layers):
        w = flat[2 * l]
        b = flat[2 * l + 1]
        di, do = w.shape
        # Constant index_maps -> Pallas keeps the weights resident across grid steps.
        in_specs.append(pl.BlockSpec((di, do), lambda i: (0, 0)))
        in_specs.append(pl.BlockSpec((1, do), lambda i: (0, 0)))
        flops += 2 * B_pad * di * do
        bytes_accessed += w.size * 2 + b.size * 4
    # NOTE: weight/bias blocks never change across grid steps; pl.Buffered(1)
    # could halve their VMEM footprint if block_m / hidden_dims ever grow
    # (irrelevant at these sizes, <1 MiB total).

    out_pad = flat[-2].shape[1]
    bytes_accessed += B_pad * out_pad * 4
    grid = (B_pad // block_m,)

    grid_spec = pltpu.PrefetchScalarGridSpec(
        num_scalar_prefetch=0,
        grid=grid,
        in_specs=in_specs,
        out_specs=pl.BlockSpec((block_m, out_pad), lambda i: (i, 0)),
    )

    out_p = pl.pallas_call(
        _make_mlp_kernel(num_layers, bf16_epilogue),
        out_shape=jax.ShapeDtypeStruct((B_pad, out_pad), x.dtype),
        grid_spec=grid_spec,
        compiler_params=pltpu.CompilerParams(
            dimension_semantics=("parallel",)),
        cost_estimate=pl.CostEstimate(flops=flops, transcendentals=0,
                                      bytes_accessed=bytes_accessed),
    )(x_bf, *flat)

    # Single slice only if anything was actually padded.
    if B_pad != B or out_pad != out_dim:
        out_p = out_p[:B, :out_dim]
    return out_p


def mlp_forward(x, prepped, *, block_m=None):
    """x: (B, input_size) f32.  prepped: output of prepare_params()."""
    flat, out_dim = prepped
    if block_m is None:
        block_m = _default_block_m(x.shape[0], _num_tensorcores())
    return _mlp_forward_impl(x, flat, block_m=int(block_m),
                             bf16_epilogue=bool(_use_bf16_epilogue()),
                             out_dim=int(out_dim))


def init_mlp_params(key, input_size, output_size, hidden_dims):
    """Deterministic synthetic init (uniform, like PyTorch's default fan-in bound)."""
    dims = [input_size] + list(hidden_dims) + [output_size]
    params = []
    for l in range(len(dims) - 1):
        fan_in, fan_out = dims[l], dims[l + 1]
        key, kw, kb = jax.random.split(key, 3)
        bound = 1.0 / (fan_in ** 0.5)
        w = jax.random.uniform(kw, (fan_in, fan_out), jnp.float32, -bound, bound)
        b = jax.random.uniform(kb, (fan_out,), jnp.float32, -bound, bound)
        params.append((w, b))
    return params


def mlp_reference(x, params):
    """Pure-JAX f32 reference mirroring nn.Sequential(Linear, ReLU, ..., Linear)."""
    h = x
    for i, (w, b) in enumerate(params):
        h = h @ w + b
        if i < len(params) - 1:
            h = jnp.maximum(h, 0.0)
    return h


if __name__ == "__main__":
    # TODO(synk): only activation='relu' and norm='none' (the module defaults) are
    # implemented; other activation / norm options are not translated.
    batch = 384            # 16-aligned -> B_pad == B on both 1-TC and 2-TC chips
    input_size = 32
    output_size = 12
    hidden_dims = [256, 256, 256]   # module defaults

    key = jax.random.PRNGKey(0)
    key, kx = jax.random.split(key)
    x = jax.random.normal(kx, (batch, input_size), jnp.float32)

    params = init_mlp_params(key, input_size, output_size, hidden_dims)
    prepped = prepare_params(params)        # one-time pad/cast, hoisted out of forward

    out = mlp_forward(x, prepped)
    out = jax.block_until_ready(out)

    ref = mlp_reference(x, params)
    assert out.shape == (batch, output_size)
    # bf16 MXU inputs with f32 accumulation -> loosened tolerance vs f32 reference.
    max_err = float(jnp.max(jnp.abs(out - ref)))
    assert jnp.allclose(out, ref, atol=5e-2, rtol=5e-2), \
        f"mismatch vs reference (max abs err {max_err})"

    print("KERNEL_OK")
</pallas_src>

<mosaic_0001>
module attributes {stable_mosaic.version = 11 : i64} {
  func.func @kernel(%arg0: i32, %arg1: memref<384x32xbf16, #tpu.memory_space<vmem>>, %arg2: memref<32x256xbf16, #tpu.memory_space<vmem>>, %arg3: memref<1x256xf32, #tpu.memory_space<vmem>>, %arg4: memref<256x256xbf16, #tpu.memory_space<vmem>>, %arg5: memref<1x256xf32, #tpu.memory_space<vmem>>, %arg6: memref<256x256xbf16, #tpu.memory_space<vmem>>, %arg7: memref<1x256xf32, #tpu.memory_space<vmem>>, %arg8: memref<256x128xbf16, #tpu.memory_space<vmem>>, %arg9: memref<1x128xf32, #tpu.memory_space<vmem>>, %arg10: memref<384x128xf32, #tpu.memory_space<vmem>>) attributes {dimension_semantics = [#tpu.dimension_semantics<parallel>], iteration_bounds = array<i64: 1>, scalar_prefetch = 0 : i64, scratch_operands = 0 : i64, tpu.core_type = #tpu.core_type<tc>, window_params = [{transform_indices = @transform_0, window_bounds = array<i64: 384, 32>}, {pipeline_mode = #tpu.pipeline_mode<synchronous>, transform_indices = @transform_1, window_bounds = array<i64: 32, 256>}, {pipeline_mode = #tpu.pipeline_mode<synchronous>, transform_indices = @transform_2, window_bounds = array<i64: 1, 256>}, {pipeline_mode = #tpu.pipeline_mode<synchronous>, transform_indices = @transform_3, window_bounds = array<i64: 256, 256>}, {pipeline_mode = #tpu.pipeline_mode<synchronous>, transform_indices = @transform_4, window_bounds = array<i64: 1, 256>}, {pipeline_mode = #tpu.pipeline_mode<synchronous>, transform_indices = @transform_5, window_bounds = array<i64: 256, 256>}, {pipeline_mode = #tpu.pipeline_mode<synchronous>, transform_indices = @transform_6, window_bounds = array<i64: 1, 256>}, {pipeline_mode = #tpu.pipeline_mode<synchronous>, transform_indices = @transform_7, window_bounds = array<i64: 256, 128>}, {pipeline_mode = #tpu.pipeline_mode<synchronous>, transform_indices = @transform_8, window_bounds = array<i64: 1, 128>}, {transform_indices = @transform_9, window_bounds = array<i64: 384, 128>}]} {
    %c0 = arith.constant 0 : index
    %c0_0 = arith.constant 0 : index
    %0 = vector.load %arg1[%c0, %c0_0] : memref<384x32xbf16, #tpu.memory_space<vmem>>, vector<384x32xbf16>
    %c0_1 = arith.constant 0 : index
    %c0_2 = arith.constant 0 : index
    %1 = vector.load %arg2[%c0_1, %c0_2] : memref<32x256xbf16, #tpu.memory_space<vmem>>, vector<32x256xbf16>
    %cst = arith.constant dense<0.000000e+00> : vector<384x256xf32>
    %2 = tpu.matmul %0, %1, %cst {dimension_numbers = #tpu.dot_dimension_numbers<[1], [0], [0], [1], [0, 0, 1, 1], [], []>} : vector<384x32xbf16>, vector<32x256xbf16>, vector<384x256xf32> -> vector<384x256xf32>
    %c0_3 = arith.constant 0 : index
    %c0_4 = arith.constant 0 : index
    %3 = vector.load %arg3[%c0_3, %c0_4] : memref<1x256xf32, #tpu.memory_space<vmem>>, vector<1x256xf32>
    %4 = vector.broadcast %3 : vector<1x256xf32> to vector<384x256xf32>
    %5 = arith.addf %2, %4 : vector<384x256xf32>
    %6 = arith.truncf %5 : vector<384x256xf32> to vector<384x256xbf16>
    %cst_5 = arith.constant 0.000000e+00 : bf16
    %7 = vector.broadcast %cst_5 : bf16 to vector<384x256xbf16>
    %8 = arith.maximumf %6, %7 : vector<384x256xbf16>
    %c0_6 = arith.constant 0 : index
    %c0_7 = arith.constant 0 : index
    %9 = vector.load %arg4[%c0_6, %c0_7] : memref<256x256xbf16, #tpu.memory_space<vmem>>, vector<256x256xbf16>
    %cst_8 = arith.constant dense<0.000000e+00> : vector<384x256xf32>
    %10 = tpu.matmul %8, %9, %cst_8 {dimension_numbers = #tpu.dot_dimension_numbers<[1], [0], [0], [1], [0, 0, 1, 1], [], []>} : vector<384x256xbf16>, vector<256x256xbf16>, vector<384x256xf32> -> vector<384x256xf32>
    %c0_9 = arith.constant 0 : index
    %c0_10 = arith.constant 0 : index
    %11 = vector.load %arg5[%c0_9, %c0_10] : memref<1x256xf32, #tpu.memory_space<vmem>>, vector<1x256xf32>
    %12 = vector.broadcast %11 : vector<1x256xf32> to vector<384x256xf32>
    %13 = arith.addf %10, %12 : vector<384x256xf32>
    %14 = arith.truncf %13 : vector<384x256xf32> to vector<384x256xbf16>
    %cst_11 = arith.constant 0.000000e+00 : bf16
    %15 = vector.broadcast %cst_11 : bf16 to vector<384x256xbf16>
    %16 = arith.maximumf %14, %15 : vector<384x256xbf16>
    %c0_12 = arith.constant 0 : index
    %c0_13 = arith.constant 0 : index
    %17 = vector.load %arg6[%c0_12, %c0_13] : memref<256x256xbf16, #tpu.memory_space<vmem>>, vector<256x256xbf16>
    %cst_14 = arith.constant dense<0.000000e+00> : vector<384x256xf32>
    %18 = tpu.matmul %16, %17, %cst_14 {dimension_numbers = #tpu.dot_dimension_numbers<[1], [0], [0], [1], [0, 0, 1, 1], [], []>} : vector<384x256xbf16>, vector<256x256xbf16>, vector<384x256xf32> -> vector<384x256xf32>
    %c0_15 = arith.constant 0 : index
    %c0_16 = arith.constant 0 : index
    %19 = vector.load %arg7[%c0_15, %c0_16] : memref<1x256xf32, #tpu.memory_space<vmem>>, vector<1x256xf32>
    %20 = vector.broadcast %19 : vector<1x256xf32> to vector<384x256xf32>
    %21 = arith.addf %18, %20 : vector<384x256xf32>
    %22 = arith.truncf %21 : vector<384x256xf32> to vector<384x256xbf16>
    %cst_17 = arith.constant 0.000000e+00 : bf16
    %23 = vector.broadcast %cst_17 : bf16 to vector<384x256xbf16>
    %24 = arith.maximumf %22, %23 : vector<384x256xbf16>
    %c0_18 = arith.constant 0 : index
    %c0_19 = arith.constant 0 : index
    %25 = vector.load %arg8[%c0_18, %c0_19] : memref<256x128xbf16, #tpu.memory_space<vmem>>, vector<256x128xbf16>
    %cst_20 = arith.constant dense<0.000000e+00> : vector<384x128xf32>
    %26 = tpu.matmul %24, %25, %cst_20 {dimension_numbers = #tpu.dot_dimension_numbers<[1], [0], [0], [1], [0, 0, 1, 1], [], []>} : vector<384x256xbf16>, vector<256x128xbf16>, vector<384x128xf32> -> vector<384x128xf32>
    %c0_21 = arith.constant 0 : index
    %c0_22 = arith.constant 0 : index
    %27 = vector.load %arg9[%c0_21, %c0_22] : memref<1x128xf32, #tpu.memory_space<vmem>>, vector<1x128xf32>
    %28 = vector.broadcast %27 : vector<1x128xf32> to vector<384x128xf32>
    %29 = arith.addf %26, %28 : vector<384x128xf32>
    %c0_23 = arith.constant 0 : index
    %c0_24 = arith.constant 0 : index
    %30 = vector.load %arg10[%c0_23, %c0_24] : memref<384x128xf32, #tpu.memory_space<vmem>>, vector<384x128xf32>
    tpu.vector_store %arg10[%c0_23, %c0_24], %29 {strides = array<i32>} : memref<384x128xf32, #tpu.memory_space<vmem>>, vector<384x128xf32>,
    return
  }
  func.func @transform_0(%arg0: i32) -> (i32, i32) {
    %c0_i32 = arith.constant 0 : i32
    %c0_i32_0 = arith.constant 0 : i32
    return %arg0, %c0_i32 : i32, i32
  }
  func.func @transform_1(%arg0: i32) -> (i32, i32) {
    %c0_i32 = arith.constant 0 : i32
    %c0_i32_0 = arith.constant 0 : i32
    %c0_i32_1 = arith.constant 0 : i32
    return %c0_i32, %c0_i32_0 : i32, i32
  }
  func.func @transform_2(%arg0: i32) -> (i32, i32) {
    %c0_i32 = arith.constant 0 : i32
    %c0_i32_0 = arith.constant 0 : i32
    %c0_i32_1 = arith.constant 0 : i32
    return %c0_i32, %c0_i32_0 : i32, i32
  }
  func.func @transform_3(%arg0: i32) -> (i32, i32) {
    %c0_i32 = arith.constant 0 : i32
    %c0_i32_0 = arith.constant 0 : i32
    %c0_i32_1 = arith.constant 0 : i32
    return %c0_i32, %c0_i32_0 : i32, i32
  }
  func.func @transform_4(%arg0: i32) -> (i32, i32) {
    %c0_i32 = arith.constant 0 : i32
    %c0_i32_0 = arith.constant 0 : i32
    %c0_i32_1 = arith.constant 0 : i32
    return %c0_i32, %c0_i32_0 : i32, i32
  }
  func.func @transform_5(%arg0: i32) -> (i32, i32) {
    %c0_i32 = arith.constant 0 : i32
    %c0_i32_0 = arith.constant 0 : i32
    %c0_i32_1 = arith.constant 0 : i32
    return %c0_i32, %c0_i32_0 : i32, i32
  }
  func.func @transform_6(%arg0: i32) -> (i32, i32) {
    %c0_i32 = arith.constant 0 : i32
    %c0_i32_0 = arith.constant 0 : i32
    %c0_i32_1 = arith.constant 0 : i32
    return %c0_i32, %c0_i32_0 : i32, i32
  }
  func.func @transform_7(%arg0: i32) -> (i32, i32) {
    %c0_i32 = arith.constant 0 : i32
    %c0_i32_0 = arith.constant 0 : i32
    %c0_i32_1 = arith.constant 0 : i32
    return %c0_i32, %c0_i32_0 : i32, i32
  }
  func.func @transform_8(%arg0: i32) -> (i32, i32) {
    %c0_i32 = arith.constant 0 : i32
    %c0_i32_0 = arith.constant 0 : i32
    %c0_i32_1 = arith.constant 0 : i32
    return %c0_i32, %c0_i32_0 : i32, i32
  }
  func.func @transform_9(%arg0: i32) -> (i32, i32) {
    %c0_i32 = arith.constant 0 : i32
    %c0_i32_0 = arith.constant 0 : i32
    return %arg0, %c0_i32 : i32, i32
  }
}

</mosaic_0001>

<bundles_post_ra>
// kernel: _mlp_forward_impl.1
= control target key start
LH: loop header
LB: loop body
LE: loop exit
PB: predicated region body
PF: predicated region fallthrough
CT: control target
= control target key end

     0   :  { %14 = vsyncpa [#allocation3], 0  ;;  %s5444_s0 = inlined_call_operand.vmem [shape: bf16[384,32], index: 0, kind: input, shape index: {}]   ;;  %s5445_s1 = inlined_call_operand.hbm [shape: bf16[32,256], index: 1, kind: input, shape index: {}]   ;;  %s5446_s2 = inlined_call_operand.vmem [shape: f32[1,256], index: 2, kind: input, shape index: {}]   ;;  %s5447_s3 = inlined_call_operand.vmem [shape: bf16[256,256], index: 3, kind: input, shape index: {}]   ;;  %s5448_s4 = inlined_call_operand.hbm [shape: f32[1,256], index: 4, kind: input, shape index: {}]   ;;  %s5449_s5 = inlined_call_operand.hbm [shape: bf16[256,256], index: 5, kind: input, shape index: {}]   ;;  %s5450_s6 = inlined_call_operand.vmem [shape: f32[1,256], index: 6, kind: input, shape index: {}]   ;;  %s5451_s7 = inlined_call_operand.vmem [shape: bf16[256,128], index: 7, kind: input, shape index: {}]   ;;  %s5452_s8 = inlined_call_operand.hbm [shape: f32[1,128], index: 8, kind: input, shape index: {}]   ;;  %s5453_s9 = inlined_call_operand.vmem [shape: f32[384,128], index: 9, kind: output, shape index: {}]  }
   0x1   :  { %15 = vsyncpa [#allocation5], 0  ;;  %s41_s11 = sshll.u32 %s5448_s4, 4  ;;  %s42_s11 = int_to_ptr.hbm [resolvable:$true] %s41_s11 }
   0x2   :  { %16 = vsyncpa [#allocation8], 0  ;;  %s4056_s12 = smov [#allocation4]   ;;  %s23_s16 = sshll.u32 %s5445_s1, 4  ;;  %s24_s16 = int_to_ptr.hbm [resolvable:$true] %s23_s16 }
   0x3   :  { %s43_s13 = sshll.u32 %s4056_s12, 4  ;;  %s4057_s17 = smov [#allocation2]   ;;  %s44_s13 = int_to_ptr.vmem [resolvable:$true] %s43_s13 }
   0x4   :  { %46 = dma.hbm_to_vmem [thread:$0]  %s42_s11, 32, %s44_s13, [#allocation5]  }
   0x5   :  { %s25_s18 = sshll.u32 %s4057_s17, 4  ;;  %s4058_s19 = smov 128   ;;  %s26_s18 = int_to_ptr.vmem [resolvable:$true] %s25_s18 }
   0x6   :  { %s4059_s20 = smov 8   ;;  %s51_s4 = sshll.u32 %s5449_s5, 4  ;;  %s52_s4 = int_to_ptr.hbm [resolvable:$true] %s51_s4 }
   0x7   :  { %31 = dma.hbm_to_vmem [thread:$0]  %s24_s16, 512, %s26_s18, [#allocation3], %s4058_s19, %s4058_s19, %s4059_s20  }
   0x8   :  { %s4060_s23 = smov [#allocation6]   ;;  %s69_s1 = sshll.u32 %s5452_s8, 4  ;;  %s70_s1 = int_to_ptr.hbm [resolvable:$true] %s69_s1 }
   0x9   :  { %s53_s24 = sshll.u32 %s4060_s23, 4  ;;  %s4061_s27 = smov [#allocation7]   ;;  %s54_s24 = int_to_ptr.vmem [resolvable:$true] %s53_s24 }
   0xa   :  { %59 = dma.hbm_to_vmem [thread:$0]  %s52_s4, 4096, %s54_s24, [#allocation5], %s4058_s19, %s4058_s19, %s4059_s20  }
   0xb   :  { %s71_s28 = sshll.u32 %s4061_s27, 4  ;;  %s72_s28 = int_to_ptr.vmem [resolvable:$true] %s71_s28 }
   0xc   :  { %74 = dma.hbm_to_vmem [thread:$0]  %s70_s1, 16, %s72_s28, [#allocation8]  }
   0xd   :  { %4050 = dma.done.wait [#allocation3], 512  }
   0xe   :  { %4051 = vsyncadd [#allocation3], 4294966784 }
   0xf   :  { %4052 = dma.done.wait [#allocation5], 4128  }
  0x10   :  { %4053 = vsyncadd [#allocation5], 4294963168 }
  0x11   :  { %4054 = dma.done.wait [#allocation8], 16  }
  0x12   :  { %4055 = vsyncadd [#allocation8], 4294967280  ;;  %v3464_v0 = vld [vmem:[#allocation2 + $0x10] sm:$0xf]  ;;  %v3865_v1 = vld [vmem:[#allocation2 + $0x14] sm:$0xf0] }
  0x13   :  { %v3864_v2 = vld [vmem:[#allocation2 + $0x14] sm:$0xf]  ;;  %v3465_v3 = vor.u32 %v3865_v1, %v3464_v0  ;;  %v3466_v4 = vld [vmem:[#allocation2 + $0x18] sm:$0xf0]  ;;  %v3456_v5 = vld [vmem:[#allocation2] sm:$0xf] }
  0x14   :  { %v3863_v6 = vld [vmem:[#allocation2 + $0x4] sm:$0xf0]  ;;  %v3469_v7 = vor.u32 %v3864_v2, %v3466_v4  ;;  %v3862_v8 = vld [vmem:[#allocation2 + $0x4] sm:$0xf]  ;;  %v3458_v9 = vld [vmem:[#allocation2 + $0x8] sm:$0xf0] }
  0x15   :  { %369 = vmatpush.bf16.msra.mxu0 %v3465_v3  ;;  %v3457_v10 = vor.u32 %v3863_v6, %v3456_v5  ;;  %v3880_v11 = vld [vmem:[%s5447_s3 + $0x74] sm:$0xf]  ;;  %v3578_v12 = vld [vmem:[%s5447_s3 + $0x78] sm:$0xf0]  ;;  %v3461_v14 = vor.u32 %v3862_v8, %v3458_v9  ;;  %v3838_v18 = vld [vmem:[%s5444_s0] sm:$0xff]  ;;  %vm290_vm0 = vcmask 261120  }
  0x16   :  { %v3896_v13 = vld [vmem:[%s5447_s3 + $0xf4] sm:$0xf]  ;;  %498 = vmatpush.bf16.msra.mxu1 %v3469_v7  ;;  %v3581_v15 = vor.u32 %v3880_v11, %v3578_v12  ;;  %v3642_v16 = vld [vmem:[%s5447_s3 + $0xf8] sm:$0xf0]  ;;  %v3839_v19 = vld [vmem:[%s5444_s0 + $0x8] sm:$0xff] }
  0x17   :  { %v3645_v17 = vor.u32 %v3896_v13, %v3642_v16  ;;  %v3878_v20 = vld [vmem:[%s5447_s3 + $0x64] sm:$0xf]  ;;  %v3570_v21 = vld [vmem:[%s5447_s3 + $0x68] sm:$0xf0]  ;;  %v3840_v26 = vld [vmem:[%s5444_s0 + $0x10] sm:$0xff] }
  0x18   :  { %v3894_v22 = vld [vmem:[%s5447_s3 + $0xe4] sm:$0xf]  ;;  %v3573_v23 = vor.u32 %v3878_v20, %v3570_v21  ;;  %v3634_v24 = vld [vmem:[%s5447_s3 + $0xe8] sm:$0xf0]  ;;  %v3841_v27 = vld [vmem:[%s5444_s0 + $0x18] sm:$0xff] }
  0x19   :  { %370 = vmatpush.bf16.msra.mxu0 %v3457_v10  ;;  %v3637_v25 = vor.u32 %v3894_v22, %v3634_v24  ;;  %v3842_v28 = vld [vmem:[%s5444_s0 + $0x20] sm:$0xff]  ;;  %v3876_v29 = vld [vmem:[%s5447_s3 + $0x54] sm:$0xf]  ;;  %v3562_v30 = vld [vmem:[%s5447_s3 + $0x58] sm:$0xf0] }
  0x1a   :  { %499 = vmatpush.bf16.msra.mxu1 %v3461_v14  ;;  %v3892_v31 = vld [vmem:[%s5447_s3 + $0xd4] sm:$0xf]  ;;  %v3565_v32 = vor.u32 %v3876_v29, %v3562_v30  ;;  %v3626_v33 = vld [vmem:[%s5447_s3 + $0xd8] sm:$0xf0]  ;;  %v3576_v34 = vld [vmem:[%s5447_s3 + $0x70] sm:$0xf] }
  0x1b   :  { %v3881_v35 = vld [vmem:[%s5447_s3 + $0x74] sm:$0xf0]  ;;  %v3629_v36 = vor.u32 %v3892_v31, %v3626_v33  ;;  %v3640_v38 = vld [vmem:[%s5447_s3 + $0xf0] sm:$0xf]  ;;  %v3843_v41 = vld [vmem:[%s5444_s0 + $0x28] sm:$0xff] }
  0x1c   :  { %3470 = vmatmul.msk.bf16.vlgmr.msra.gmra.mxu0 %vm290_vm0, %v3838_v18  ;;  %v3577_v37 = vor.u32 %v3881_v35, %v3576_v34  ;;  %v3897_v39 = vld [vmem:[%s5447_s3 + $0xf4] sm:$0xf0]  ;;  %v3568_v42 = vld [vmem:[%s5447_s3 + $0x60] sm:$0xf]  ;;  %v3879_v43 = vld [vmem:[%s5447_s3 + $0x64] sm:$0xf0] }
  0x1d   :  { %1365 = vmatpush.bf16.msrb.mxu0 %v3581_v15  ;;  %3494 = vmatmul.msk.bf16.vlgmr.msra.gmra.mxu1 %vm290_vm0, %v3838_v18  ;;  %v3641_v40 = vor.u32 %v3897_v39, %v3640_v38  ;;  %v3632_v44 = vld [vmem:[%s5447_s3 + $0xe0] sm:$0xf]  ;;  %v3569_v45 = vor.u32 %v3879_v43, %v3568_v42  ;;  %v3895_v46 = vld [vmem:[%s5447_s3 + $0xe4] sm:$0xf0]  ;;  %v3560_v48 = vld [vmem:[%s5447_s3 + $0x50] sm:$0xf] }
  0x1e   :  { %1494 = vmatpush.bf16.msrb.mxu1 %v3645_v17  ;;  %1107 = vmatpush.bf16.msra.mxu2 %v3577_v37  ;;  %v3633_v47 = vor.u32 %v3895_v46, %v3632_v44  ;;  %v3877_v49 = vld [vmem:[%s5447_s3 + $0x54] sm:$0xf0]  ;;  %v3624_v50 = vld [vmem:[%s5447_s3 + $0xd0] sm:$0xf]  ;;  %v3552_v54 = vld [vmem:[%s5447_s3 + $0x40] sm:$0xf] }
  0x1f   :  { %1236 = vmatpush.bf16.msra.mxu3 %v3641_v40  ;;  %v3561_v51 = vor.u32 %v3877_v49, %v3560_v48  ;;  %v3893_v52 = vld [vmem:[%s5447_s3 + $0xd4] sm:$0xf0]  ;;  %v3875_v55 = vld [vmem:[%s5447_s3 + $0x44] sm:$0xf0]  ;;  %v3616_v56 = vld [vmem:[%s5447_s3 + $0xc0] sm:$0xf] }
  0x20   :  { %v3625_v53 = vor.u32 %v3893_v52, %v3624_v50  ;;  %v3891_v57 = vld [vmem:[%s5447_s3 + $0xc4] sm:$0xf0]  ;;  %v3553_v58 = vor.u32 %v3875_v55, %v3552_v54  ;;  %v3544_v60 = vld [vmem:[%s5447_s3 + $0x30] sm:$0xf]  ;;  %v3873_v61 = vld [vmem:[%s5447_s3 + $0x34] sm:$0xf0] }
  0x21   :  { %1366 = vmatpush.bf16.msrb.mxu0 %v3573_v23  ;;  %v3617_v59 = vor.u32 %v3891_v57, %v3616_v56  ;;  %v3608_v62 = vld [vmem:[%s5447_s3 + $0xb0] sm:$0xf]  ;;  %v3545_v0 = vor.u32 %v3873_v61, %v3544_v60  ;;  %v3889_v1 = vld [vmem:[%s5447_s3 + $0xb4] sm:$0xf0]  ;;  %v3536_v3 = vld [vmem:[%s5447_s3 + $0x20] sm:$0xf] }
  0x22   :  { %1495 = vmatpush.bf16.msrb.mxu1 %v3637_v25  ;;  %1108 = vmatpush.bf16.msra.mxu2 %v3569_v45  ;;  %v3844_v63 = vld [vmem:[%s5444_s0 + $0x30] sm:$0xff]  ;;  %v3609_v2 = vor.u32 %v3889_v1, %v3608_v62  ;;  %v3871_v4 = vld [vmem:[%s5447_s3 + $0x24] sm:$0xf0]  ;;  %v3600_v6 = vld [vmem:[%s5447_s3 + $0xa0] sm:$0xf] }
  0x23   :  { %1237 = vmatpush.bf16.msra.mxu3 %v3633_v47  ;;  %v3537_v5 = vor.u32 %v3871_v4, %v3536_v3  ;;  %v3887_v7 = vld [vmem:[%s5447_s3 + $0xa4] sm:$0xf0]  ;;  %v3528_v9 = vld [vmem:[%s5447_s3 + $0x10] sm:$0xf]  ;;  %v3869_v10 = vld [vmem:[%s5447_s3 + $0x14] sm:$0xf0] }
  0x24   :  { %v3601_v8 = vor.u32 %v3887_v7, %v3600_v6  ;;  %v3592_v11 = vld [vmem:[%s5447_s3 + $0x90] sm:$0xf]  ;;  %v3529_v12 = vor.u32 %v3869_v10, %v3528_v9  ;;  %v3885_v13 = vld [vmem:[%s5447_s3 + $0x94] sm:$0xf0]  ;;  %v3520_v15 = vld [vmem:[%s5447_s3] sm:$0xf] }
  0x25   :  { %1367 = vmatpush.bf16.msrb.mxu0 %v3565_v32  ;;  %v3593_v14 = vor.u32 %v3885_v13, %v3592_v11  ;;  %v3867_v16 = vld [vmem:[%s5447_s3 + $0x4] sm:$0xf0]  ;;  %v3584_v17 = vld [vmem:[%s5447_s3 + $0x80] sm:$0xf]  ;;  %v3845_v21 = vld [vmem:[%s5444_s0 + $0x38] sm:$0xff] }
  0x26   :  { %1496 = vmatpush.bf16.msrb.mxu1 %v3629_v36  ;;  %1109 = vmatpush.bf16.msra.mxu2 %v3561_v51  ;;  %v3521_v18 = vor.u32 %v3867_v16, %v3520_v15  ;;  %v3704_v22 = vld [vmem:[#allocation6 + $0x70] sm:$0xf]  ;;  %v3913_v23 = vld [vmem:[#allocation6 + $0x74] sm:$0xf0]  ;;  %v3554_v29 = vld [vmem:[%s5447_s3 + $0x48] sm:$0xf0] }
  0x27   :  { %1238 = vmatpush.bf16.msra.mxu3 %v3625_v53  ;;  %v3705_v24 = vor.u32 %v3913_v23, %v3704_v22  ;;  %v3768_v25 = vld [vmem:[#allocation6 + $0xf0] sm:$0xf]  ;;  %v3890_v30 = vld [vmem:[%s5447_s3 + $0xc4] sm:$0xf]  ;;  %v3618_v31 = vld [vmem:[%s5447_s3 + $0xc8] sm:$0xf0] }
  0x28   :  { %v3621_v33 = vor.u32 %v3890_v30, %v3618_v31  ;;  %v3846_v34 = vld [vmem:[%s5444_s0 + $0x40] sm:$0xff]  ;;  %v3847_v52 = vld [vmem:[%s5444_s0 + $0x48] sm:$0xff]  ;;  %v3848_v3 = vld [vmem:[%s5444_s0 + $0x50] sm:$0xff] }
  0x29   :  { %v144_v35 = vld [vmem:[%s5446_s2] sm:$0x3]  ;;  %v3911_v6 = vld [vmem:[#allocation6 + $0x64] sm:$0xf0]  ;;  %v3760_v9 = vld [vmem:[#allocation6 + $0xe0] sm:$0xf] }
  0x2a   :  { %1110 = vmatpush.bf16.msra.mxu2 %v3553_v58  ;;  %1497 = vmatpush.bf16.msrb.mxu1 %v3621_v33  ;;  %v4314_v38 = vperm.slane %v144_v35, 0  ;;  %v4317_v39 = vperm.slane %v144_v35, 1  ;;  %v3927_v10 = vld [vmem:[#allocation6 + $0xe4] sm:$0xf0]  ;;  %v3546_v13 = vld [vmem:[%s5447_s3 + $0x38] sm:$0xf0] }
  0x2b   :  { %1239 = vmatpush.bf16.msra.mxu3 %v3617_v59  ;;  %v3761_v11 = vor.u32 %v3927_v10, %v3760_v9  ;;  %v3610_v16 = vld [vmem:[%s5447_s3 + $0xb8] sm:$0xf0] }
  0x2c   :  { %3471 = vmatmul.msk.bf16.gmra.mxu0 %vm290_vm0, %v3839_v19  ;;  %v3849_v30 = vld [vmem:[%s5444_s0 + $0x58] sm:$0xff] }
  0x2d   :  { %3495 = vmatmul.msk.bf16.gmra.mxu1 %vm290_vm0, %v3839_v19  ;;  %v3883_v19 = vld [vmem:[%s5447_s3 + $0x84] sm:$0xf0]  ;;  %v3925_v9 = vld [vmem:[#allocation6 + $0xd4] sm:$0xf0] }
  0x2e   :  { %1111 = vmatpush.bf16.msra.mxu2 %v3545_v0  ;;  %v3585_v20 = vor.u32 %v3883_v19, %v3584_v17 }
  0x2f   :  { %1240 = vmatpush.bf16.msra.mxu3 %v3609_v2 }
  0x32   :  { %1112 = vmatpush.bf16.msra.mxu2 %v3537_v5  ;;  %v3696_v5 = vld [vmem:[#allocation6 + $0x60] sm:$0xf] }
  0x33   :  { %1241 = vmatpush.bf16.msra.mxu3 %v3601_v8  ;;  %v3697_v8 = vor.u32 %v3911_v6, %v3696_v5  ;;  %v3909_v5 = vld [vmem:[#allocation6 + $0x54] sm:$0xf0] }
  0x36   :  { %1113 = vmatpush.bf16.msra.mxu2 %v3529_v12  ;;  %v3872_v12 = vld [vmem:[%s5447_s3 + $0x34] sm:$0xf] }
  0x37   :  { %1242 = vmatpush.bf16.msra.mxu3 %v3593_v14  ;;  %v3888_v14 = vld [vmem:[%s5447_s3 + $0xb4] sm:$0xf]  ;;  %v3549_v15 = vor.u32 %v3872_v12, %v3546_v13  ;;  %v3538_v12 = vld [vmem:[%s5447_s3 + $0x28] sm:$0xf0]  ;;  %v3886_v13 = vld [vmem:[%s5447_s3 + $0xa4] sm:$0xf] }
  0x3a   :  { %1114 = vmatpush.bf16.msra.mxu2 %v3521_v18  ;;  %v3613_v18 = vor.u32 %v3888_v14, %v3610_v16 }
  0x3b   :  { %1243 = vmatpush.bf16.msra.mxu3 %v3585_v20 }
  0x3c   :  { %3472 = vmatmul.msk.bf16.gmra.mxu0 %vm290_vm0, %v3840_v26  ;;  %1498 = vmatpush.bf16.msrb.mxu1 %v3613_v18 }
  0x3d   :  { %3496 = vmatmul.msk.bf16.gmra.mxu1 %vm290_vm0, %v3840_v26  ;;  %v3929_v26 = vld [vmem:[#allocation6 + $0xf4] sm:$0xf0] }
  0x3e   :  { %2109 = vmatpush.bf16.msrb.mxu2 %v3705_v24 }
  0x42   :  { %2110 = vmatpush.bf16.msrb.mxu2 %v3697_v8  ;;  %v3752_v8 = vld [vmem:[#allocation6 + $0xd0] sm:$0xf] }
  0x43   :  { %v3753_v10 = vor.u32 %v3925_v9, %v3752_v8 }
  0x4c   :  { %3473 = vmatmul.msk.bf16.gmra.mxu0 %vm290_vm0, %v3841_v27 }
  0x4d   :  { %3497 = vmatmul.msk.bf16.gmra.mxu1 %vm290_vm0, %v3841_v27  ;;  %v3874_v27 = vld [vmem:[%s5447_s3 + $0x44] sm:$0xf] }
  0x4e   :  { %v3557_v32 = vor.u32 %v3874_v27, %v3554_v29 }
  0x50   :  { %1368 = vmatpush.bf16.msrb.mxu0 %v3557_v32 }
  0x54   :  { %1369 = vmatpush.bf16.msrb.mxu0 %v3549_v15  ;;  %v3602_v15 = vld [vmem:[%s5447_s3 + $0xa8] sm:$0xf0] }
  0x5c   :  { %3474 = vmatmul.msk.bf16.gmra.mxu0 %vm290_vm0, %v3842_v28 }
  0x5d   :  { %3498 = vmatmul.msk.bf16.gmra.mxu1 %vm290_vm0, %v3842_v28  ;;  %v3769_v28 = vor.u32 %v3929_v26, %v3768_v25 }
  0x5f   :  { %2238 = vmatpush.bf16.msrb.mxu3 %v3769_v28 }
  0x63   :  { %2239 = vmatpush.bf16.msrb.mxu3 %v3761_v11  ;;  %v3870_v11 = vld [vmem:[%s5447_s3 + $0x24] sm:$0xf] }
  0x64   :  { %v3541_v14 = vor.u32 %v3870_v11, %v3538_v12  ;;  %v3907_v11 = vld [vmem:[#allocation6 + $0x44] sm:$0xf0] }
  0x66   :  { %1370 = vmatpush.bf16.msrb.mxu0 %v3541_v14  ;;  %v3923_v14 = vld [vmem:[#allocation6 + $0xc4] sm:$0xf0] }
  0x67   :  { %2240 = vmatpush.bf16.msrb.mxu3 %v3753_v10  ;;  %v3680_v10 = vld [vmem:[#allocation6 + $0x40] sm:$0xf] }
  0x68   :  { %v3681_v12 = vor.u32 %v3907_v11, %v3680_v10 }
  0x6c   :  { %3475 = vmatmul.msk.bf16.gmra.mxu0 %vm290_vm0, %v3843_v41 }
  0x6d   :  { %3499 = vmatmul.msk.bf16.gmra.mxu1 %vm290_vm0, %v3843_v41 }
  0x7c   :  { %3476 = vmatmul.msk.bf16.gmra.mxu0 %vm290_vm0, %v3844_v63 }
  0x7d   :  { %3500 = vmatmul.msk.bf16.gmra.mxu1 %vm290_vm0, %v3844_v63 }
  0x8c   :  { %3477 = vmatmul.msk.bf16.gmra.mxu0 %vm290_vm0, %v3845_v21 }
  0x8d   :  { %3501 = vmatmul.msk.bf16.gmra.mxu1 %vm290_vm0, %v3845_v21 }
  0x99   :  { %v372_v36 = vpop.f32.mrf.mxu0 }
  0x9a   :  { %v501_v37 = vpop.f32.mrf.mxu1  ;;  %v373_v40 = vadd.f32 %v372_v36, %v4314_v38 }
  0x9b   :  { %v502_v41 = vadd.f32 %v501_v37, %v4317_v39 }
  0x9c   :  { %3478 = vmatmul.msk.bf16.gmra.mxu0 %vm290_vm0, %v3846_v34  ;;  %v765_v46 = vmax.f32 %v373_v40, 0.0 }
  0x9d   :  { %3502 = vmatmul.msk.bf16.gmra.mxu1 %vm290_vm0, %v3846_v34  ;;  %v766_v48 = vmax.f32 %v502_v41, 0.0 }
  0xa1   :  { %v374_v42 = vpop.f32.mrf.mxu0 }
  0xa2   :  { %v375_v43 = vadd.f32 %v374_v42, %v4314_v38  ;;  %v503_v44 = vpop.f32.mrf.mxu1 }
  0xa3   :  { %v504_v45 = vadd.f32 %v503_v44, %v4317_v39 }
  0xa4   :  { %v767_v47 = vmax.f32 %v375_v43, 0.0 }
  0xa5   :  { %v768_v49 = vmax.f32 %v504_v45, 0.0 }
  0xa6   :  { %v4324_v50 = vpack.c.bf16 %v767_v47, %v765_v46  ;;  %v3850_v47 = vld [vmem:[%s5444_s0 + $0x60] sm:$0xff] }
  0xa7   :  { %v4326_v51 = vpack.c.bf16 %v768_v49, %v766_v48 }
  0xa8   :  { %1115 = vmatmul.bf16.vlgmr.msra.gmra.mxu2 %v4324_v50 }
  0xa9   :  { %1244 = vmatmul.bf16.vlgmr.msra.gmra.mxu3 %v4326_v51  ;;  %v377_v53 = vpop.f32.mrf.mxu0 }
  0xaa   :  { %v506_v54 = vpop.f32.mrf.mxu1  ;;  %v378_v55 = vadd.f32 %v377_v53, %v4314_v38 }
  0xab   :  { %v507_v56 = vadd.f32 %v506_v54, %v4317_v39 }
  0xac   :  { %3479 = vmatmul.msk.bf16.gmra.mxu0 %vm290_vm0, %v3847_v52  ;;  %v769_v61 = vmax.f32 %v378_v55, 0.0 }
  0xad   :  { %3503 = vmatmul.msk.bf16.gmra.mxu1 %vm290_vm0, %v3847_v52  ;;  %v770_v63 = vmax.f32 %v507_v56, 0.0 }
  0xb1   :  { %v379_v57 = vpop.f32.mrf.mxu0 }
  0xb2   :  { %v380_v58 = vadd.f32 %v379_v57, %v4314_v38  ;;  %v508_v59 = vpop.f32.mrf.mxu1 }
  0xb3   :  { %v509_v60 = vadd.f32 %v508_v59, %v4317_v39 }
  0xb4   :  { %v771_v62 = vmax.f32 %v380_v58, 0.0 }
  0xb5   :  { %v772_v0 = vmax.f32 %v509_v60, 0.0 }
  0xb6   :  { %v4339_v1 = vpack.c.bf16 %v771_v62, %v769_v61 }
  0xb7   :  { %v4341_v2 = vpack.c.bf16 %v772_v0, %v770_v63  ;;  %v3851_v0 = vld [vmem:[%s5444_s0 + $0x68] sm:$0xff] }
  0xb8   :  { %1120 = vmatmul.bf16.gmra.mxu2 %v4339_v1 }
  0xb9   :  { %1249 = vmatmul.bf16.gmra.mxu3 %v4341_v2  ;;  %v382_v4 = vpop.f32.mrf.mxu0 }
  0xba   :  { %v511_v7 = vpop.f32.mrf.mxu1  ;;  %v383_v17 = vadd.f32 %v382_v4, %v4314_v38  ;;  %v3688_v4 = vld [vmem:[#allocation6 + $0x50] sm:$0xf] }
  0xbb   :  { %v512_v19 = vadd.f32 %v511_v7, %v4317_v39  ;;  %v3689_v7 = vor.u32 %v3909_v5, %v3688_v4 }
  0xbc   :  { %3480 = vmatmul.msk.bf16.gmra.mxu0 %vm290_vm0, %v3848_v3  ;;  %v773_v24 = vmax.f32 %v383_v17, 0.0  ;;  %v3605_v17 = vor.u32 %v3886_v13, %v3602_v15  ;;  %v3744_v13 = vld [vmem:[#allocation6 + $0xc0] sm:$0xf] }
  0xbd   :  { %3504 = vmatmul.msk.bf16.gmra.mxu1 %vm290_vm0, %v3848_v3  ;;  %v774_v26 = vmax.f32 %v512_v19, 0.0  ;;  %2111 = vmatpush.bf16.msrb.mxu2 %v3689_v7  ;;  %v3854_v7 = vld [vmem:[%s5444_s0 + $0x80] sm:$0xff]  ;;  %v3745_v15 = vor.u32 %v3923_v14, %v3744_v13 }
  0xbe   :  { %1499 = vmatpush.bf16.msrb.mxu1 %v3605_v17  ;;  %v3868_v17 = vld [vmem:[%s5447_s3 + $0x14] sm:$0xf] }
  0xbf   :  { %2241 = vmatpush.bf16.msrb.mxu3 %v3745_v15  ;;  %v3856_v15 = vld [vmem:[%s5444_s0 + $0x90] sm:$0xff] }
  0xc1   :  { %v384_v20 = vpop.f32.mrf.mxu0  ;;  %2112 = vmatpush.bf16.msrb.mxu2 %v3681_v12 }
  0xc2   :  { %v385_v21 = vadd.f32 %v384_v20, %v4314_v38  ;;  %v513_v22 = vpop.f32.mrf.mxu1 }
  0xc3   :  { %v514_v23 = vadd.f32 %v513_v22, %v4317_v39 }
  0xc4   :  { %v775_v25 = vmax.f32 %v385_v21, 0.0 }
  0xc5   :  { %v776_v27 = vmax.f32 %v514_v23, 0.0 }
  0xc6   :  { %v4366_v28 = vpack.c.bf16 %v775_v25, %v773_v24 }
  0xc7   :  { %v4368_v29 = vpack.c.bf16 %v776_v27, %v774_v26 }
  0xc8   :  { %1125 = vmatmul.bf16.gmra.mxu2 %v4366_v28 }
  0xc9   :  { %1254 = vmatmul.bf16.gmra.mxu3 %v4368_v29  ;;  %v387_v31 = vpop.f32.mrf.mxu0 }
  0xca   :  { %v516_v32 = vpop.f32.mrf.mxu1  ;;  %v388_v33 = vadd.f32 %v387_v31, %v4314_v38  ;;  %v3852_v31 = vld [vmem:[%s5444_s0 + $0x70] sm:$0xff] }
  0xcb   :  { %v517_v34 = vadd.f32 %v516_v32, %v4317_v39 }
  0xcc   :  { %3481 = vmatmul.msk.bf16.gmra.mxu0 %vm290_vm0, %v3849_v30  ;;  %v777_v41 = vmax.f32 %v388_v33, 0.0 }
  0xcd   :  { %3505 = vmatmul.msk.bf16.gmra.mxu1 %vm290_vm0, %v3849_v30  ;;  %v778_v43 = vmax.f32 %v517_v34, 0.0 }
  0xd1   :  { %v389_v35 = vpop.f32.mrf.mxu0 }
  0xd2   :  { %v390_v36 = vadd.f32 %v389_v35, %v4314_v38  ;;  %v518_v37 = vpop.f32.mrf.mxu1 }
  0xd3   :  { %v519_v40 = vadd.f32 %v518_v37, %v4317_v39 }
  0xd4   :  { %v779_v42 = vmax.f32 %v390_v36, 0.0 }
  0xd5   :  { %v780_v44 = vmax.f32 %v519_v40, 0.0 }
  0xd6   :  { %v4381_v45 = vpack.c.bf16 %v779_v42, %v777_v41 }
  0xd7   :  { %v4383_v46 = vpack.c.bf16 %v780_v44, %v778_v43 }
  0xd8   :  { %1130 = vmatmul.bf16.gmra.mxu2 %v4381_v45 }
  0xd9   :  { %1259 = vmatmul.bf16.gmra.mxu3 %v4383_v46  ;;  %v392_v48 = vpop.f32.mrf.mxu0 }
  0xda   :  { %v521_v49 = vpop.f32.mrf.mxu1  ;;  %v393_v52 = vadd.f32 %v392_v48, %v4314_v38 }
  0xdb   :  { %v522_v53 = vadd.f32 %v521_v49, %v4317_v39 }
  0xdc   :  { %3482 = vmatmul.msk.bf16.gmra.mxu0 %vm290_vm0, %v3850_v47  ;;  %v781_v58 = vmax.f32 %v393_v52, 0.0  ;;  %v3853_v52 = vld [vmem:[%s5444_s0 + $0x78] sm:$0xff] }
  0xdd   :  { %3506 = vmatmul.msk.bf16.gmra.mxu1 %vm290_vm0, %v3850_v47  ;;  %v782_v60 = vmax.f32 %v522_v53, 0.0 }
  0xe1   :  { %v394_v54 = vpop.f32.mrf.mxu0 }
  0xe2   :  { %v395_v55 = vadd.f32 %v394_v54, %v4314_v38  ;;  %v523_v56 = vpop.f32.mrf.mxu1 }
  0xe3   :  { %v524_v57 = vadd.f32 %v523_v56, %v4317_v39 }
  0xe4   :  { %v783_v59 = vmax.f32 %v395_v55, 0.0 }
  0xe5   :  { %v784_v61 = vmax.f32 %v524_v57, 0.0 }
  0xe6   :  { %v4396_v62 = vpack.c.bf16 %v783_v59, %v781_v58 }
  0xe7   :  { %v4398_v63 = vpack.c.bf16 %v784_v61, %v782_v60 }
  0xe8   :  { %1135 = vmatmul.bf16.gmra.mxu2 %v4396_v62 }
  0xe9   :  { %1264 = vmatmul.bf16.gmra.mxu3 %v4398_v63  ;;  %v397_v3 = vpop.f32.mrf.mxu0 }
  0xea   :  { %v526_v6 = vpop.f32.mrf.mxu1  ;;  %v398_v16 = vadd.f32 %v397_v3, %v4314_v38 }
  0xeb   :  { %v527_v18 = vadd.f32 %v526_v6, %v4317_v39 }
  0xec   :  { %3483 = vmatmul.msk.bf16.gmra.mxu0 %vm290_vm0, %v3851_v0  ;;  %v785_v23 = vmax.f32 %v398_v16, 0.0 }
  0xed   :  { %3507 = vmatmul.msk.bf16.gmra.mxu1 %vm290_vm0, %v3851_v0  ;;  %v786_v25 = vmax.f32 %v527_v18, 0.0  ;;  %v3530_v18 = vld [vmem:[%s5447_s3 + $0x18] sm:$0xf0] }
  0xf1   :  { %v399_v19 = vpop.f32.mrf.mxu0 }
  0xf2   :  { %v400_v20 = vadd.f32 %v399_v19, %v4314_v38  ;;  %v528_v21 = vpop.f32.mrf.mxu1  ;;  %v3884_v19 = vld [vmem:[%s5447_s3 + $0x94] sm:$0xf] }
  0xf3   :  { %v529_v22 = vadd.f32 %v528_v21, %v4317_v39 }
  0xf4   :  { %v787_v24 = vmax.f32 %v400_v20, 0.0 }
  0xf5   :  { %v788_v26 = vmax.f32 %v529_v22, 0.0  ;;  %v3533_v22 = vor.u32 %v3868_v17, %v3530_v18 }
  0xf6   :  { %v4423_v27 = vpack.c.bf16 %v787_v24, %v785_v23  ;;  %v3594_v23 = vld [vmem:[%s5447_s3 + $0x98] sm:$0xf0] }
  0xf7   :  { %v4425_v30 = vpack.c.bf16 %v788_v26, %v786_v25  ;;  %v3597_v26 = vor.u32 %v3884_v19, %v3594_v23  ;;  %1371 = vmatpush.bf16.msrb.mxu0 %v3533_v22 }
  0xf8   :  { %1140 = vmatmul.bf16.gmra.mxu2 %v4423_v27 }
  0xf9   :  { %1269 = vmatmul.bf16.gmra.mxu3 %v4425_v30  ;;  %v402_v32 = vpop.f32.mrf.mxu0  ;;  %1500 = vmatpush.bf16.msrb.mxu1 %v3597_v26 }
  0xfa   :  { %v531_v33 = vpop.f32.mrf.mxu1  ;;  %v403_v34 = vadd.f32 %v402_v32, %v4314_v38 }
  0xfb   :  { %v532_v35 = vadd.f32 %v531_v33, %v4317_v39 }
  0xfc   :  { %3484 = vmatmul.msk.bf16.gmra.mxu0 %vm290_vm0, %v3852_v31  ;;  %v789_v42 = vmax.f32 %v403_v34, 0.0 }
  0xfd   :  { %3508 = vmatmul.msk.bf16.gmra.mxu1 %vm290_vm0, %v3852_v31  ;;  %v790_v44 = vmax.f32 %v532_v35, 0.0 }
 0x101   :  { %v404_v36 = vpop.f32.mrf.mxu0 }
 0x102   :  { %v405_v37 = vadd.f32 %v404_v36, %v4314_v38  ;;  %v533_v40 = vpop.f32.mrf.mxu1  ;;  %v941_v36 = vld [vmem:[#allocation4] sm:$0x3] }
 0x103   :  { %v534_v41 = vadd.f32 %v533_v40, %v4317_v39 }
 0x104   :  { %v791_v43 = vmax.f32 %v405_v37, 0.0 }
 0x105   :  { %v792_v47 = vmax.f32 %v534_v41, 0.0  ;;  %v4485_v41 = vperm.slane %v941_v36, 0 }
 0x106   :  { %v4438_v48 = vpack.c.bf16 %v791_v43, %v789_v42  ;;  %v3855_v42 = vld [vmem:[%s5444_s0 + $0x88] sm:$0xff] }
 0x107   :  { %v4440_v49 = vpack.c.bf16 %v792_v47, %v790_v44 }
 0x108   :  { %1145 = vmatmul.bf16.gmra.mxu2 %v4438_v48 }
 0x109   :  { %1274 = vmatmul.bf16.gmra.mxu3 %v4440_v49  ;;  %v407_v53 = vpop.f32.mrf.mxu0 }
 0x10a   :  { %v536_v54 = vpop.f32.mrf.mxu1  ;;  %v408_v55 = vadd.f32 %v407_v53, %v4314_v38 }
 0x10b   :  { %v537_v56 = vadd.f32 %v536_v54, %v4317_v39 }
 0x10c   :  { %3485 = vmatmul.msk.bf16.gmra.mxu0 %vm290_vm0, %v3853_v52  ;;  %v793_v61 = vmax.f32 %v408_v55, 0.0 }
 0x10d   :  { %3509 = vmatmul.msk.bf16.gmra.mxu1 %vm290_vm0, %v3853_v52  ;;  %v794_v3 = vmax.f32 %v537_v56, 0.0 }
 0x111   :  { %v409_v57 = vpop.f32.mrf.mxu0 }
 0x112   :  { %v410_v58 = vadd.f32 %v409_v57, %v4314_v38  ;;  %v538_v59 = vpop.f32.mrf.mxu1 }
 0x113   :  { %v539_v60 = vadd.f32 %v538_v59, %v4317_v39 }
 0x114   :  { %v795_v0 = vmax.f32 %v410_v58, 0.0 }
 0x115   :  { %v796_v4 = vmax.f32 %v539_v60, 0.0 }
 0x116   :  { %v4453_v5 = vpack.c.bf16 %v795_v0, %v793_v61 }
 0x117   :  { %v4455_v6 = vpack.c.bf16 %v796_v4, %v794_v3 }
 0x118   :  { %1150 = vmatmul.bf16.gmra.mxu2 %v4453_v5 }
 0x119   :  { %1279 = vmatmul.bf16.gmra.mxu3 %v4455_v6  ;;  %v412_v8 = vpop.f32.mrf.mxu0 }
 0x11a   :  { %v541_v9 = vpop.f32.mrf.mxu1  ;;  %v413_v16 = vadd.f32 %v412_v8, %v4314_v38 }
 0x11b   :  { %v542_v20 = vadd.f32 %v541_v9, %v4317_v39 }
 0x11c   :  { %3486 = vmatmul.msk.bf16.gmra.mxu0 %vm290_vm0, %v3854_v7  ;;  %v797_v32 = vmax.f32 %v413_v16, 0.0 }
 0x11d   :  { %3510 = vmatmul.msk.bf16.gmra.mxu1 %vm290_vm0, %v3854_v7  ;;  %v798_v34 = vmax.f32 %v542_v20, 0.0 }
 0x121   :  { %v414_v21 = vpop.f32.mrf.mxu0 }
 0x122   :  { %v415_v24 = vadd.f32 %v414_v21, %v4314_v38  ;;  %v543_v25 = vpop.f32.mrf.mxu1 }
 0x123   :  { %v544_v31 = vadd.f32 %v543_v25, %v4317_v39 }
 0x124   :  { %v799_v33 = vmax.f32 %v415_v24, 0.0 }
 0x125   :  { %v800_v35 = vmax.f32 %v544_v31, 0.0 }
 0x126   :  { %v4480_v37 = vpack.c.bf16 %v799_v33, %v797_v32 }
 0x127   :  { %v4482_v40 = vpack.c.bf16 %v800_v35, %v798_v34 }
 0x128   :  { %1155 = vmatmul.bf16.gmra.mxu2 %v4480_v37 }
 0x129   :  { %1284 = vmatmul.bf16.gmra.mxu3 %v4482_v40  ;;  %v417_v43 = vpop.f32.mrf.mxu0 }
 0x12a   :  { %v546_v44 = vpop.f32.mrf.mxu1  ;;  %v418_v55 = vadd.f32 %v417_v43, %v4314_v38 }
 0x12b   :  { %v1116_v47 = vpop.f32.mrf.mxu2  ;;  %v547_v56 = vadd.f32 %v546_v44, %v4317_v39 }
 0x12c   :  { %v1117_v52 = vadd.f32 %v1116_v47, %v4485_v41  ;;  %v1245_v53 = vpop.f32.mrf.mxu3  ;;  %3487 = vmatmul.msk.bf16.gmra.mxu0 %vm290_vm0, %v3855_v42  ;;  %v801_v0 = vmax.f32 %v418_v55, 0.0 }
 0x12d   :  { %3511 = vmatmul.msk.bf16.gmra.mxu1 %vm290_vm0, %v3855_v42  ;;  %v802_v8 = vmax.f32 %v547_v56, 0.0  ;;  %v3857_v56 = vld [vmem:[%s5444_s0 + $0x98] sm:$0xff] }
 0x12e   :  { %v1246_v54 = vadd.f32 %v1245_v53, %v1117_v52 }
 0x130   :  { %v1767_v13 = vmax.f32 %v1246_v54, 0.0 }
 0x131   :  { %v419_v57 = vpop.f32.mrf.mxu0 }
 0x132   :  { %v420_v58 = vadd.f32 %v419_v57, %v4314_v38  ;;  %v548_v59 = vpop.f32.mrf.mxu1 }
 0x133   :  { %v549_v60 = vadd.f32 %v548_v59, %v4317_v39  ;;  %v1118_v61 = vpop.f32.mrf.mxu2  ;;  %v3905_v59 = vld [vmem:[#allocation6 + $0x34] sm:$0xf0] }
 0x134   :  { %v803_v3 = vmax.f32 %v420_v58, 0.0  ;;  %v1119_v4 = vadd.f32 %v1118_v61, %v4485_v41  ;;  %v1247_v7 = vpop.f32.mrf.mxu3  ;;  %v3672_v58 = vld [vmem:[#allocation6 + $0x30] sm:$0xf] }
 0x135   :  { %v804_v9 = vmax.f32 %v549_v60, 0.0  ;;  %v3673_v61 = vor.u32 %v3905_v59, %v3672_v58 }
 0x136   :  { %v1248_v10 = vadd.f32 %v1247_v7, %v1119_v4  ;;  %v4499_v11 = vpack.c.bf16 %v803_v3, %v801_v0 }
 0x137   :  { %v4501_v12 = vpack.c.bf16 %v804_v9, %v802_v8  ;;  %2113 = vmatpush.bf16.msrb.mxu2 %v3673_v61  ;;  %v3736_v8 = vld [vmem:[#allocation6 + $0xb0] sm:$0xf]  ;;  %v3921_v9 = vld [vmem:[#allocation6 + $0xb4] sm:$0xf0] }
 0x138   :  { %v1769_v14 = vmax.f32 %v1248_v10, 0.0  ;;  %1160 = vmatmul.bf16.gmra.mxu2 %v4499_v11 }
 0x139   :  { %1289 = vmatmul.bf16.gmra.mxu3 %v4501_v12  ;;  %v422_v16 = vpop.f32.mrf.mxu0 }
 0x13a   :  { %v4508_v17 = vpack.c.bf16 %v1769_v14, %v1767_v13  ;;  %v551_v18 = vpop.f32.mrf.mxu1  ;;  %v423_v23 = vadd.f32 %v422_v16, %v4314_v38  ;;  %v3737_v13 = vor.u32 %v3921_v9, %v3736_v8  ;;  %v3522_v16 = vld [vmem:[%s5447_s3 + $0x8] sm:$0xf0] }
 0x13b   :  { %v1121_v19 = vpop.f32.mrf.mxu2  ;;  %v552_v24 = vadd.f32 %v551_v18, %v4317_v39 }
 0x13c   :  { %v1122_v20 = vadd.f32 %v1121_v19, %v4485_v41  ;;  %v1250_v21 = vpop.f32.mrf.mxu3  ;;  %3488 = vmatmul.msk.bf16.gmra.mxu0 %vm290_vm0, %v3856_v15  ;;  %v805_v34 = vmax.f32 %v423_v23, 0.0  ;;  %2242 = vmatpush.bf16.msrb.mxu3 %v3737_v13 }
 0x13d   :  { %3512 = vmatmul.msk.bf16.gmra.mxu1 %vm290_vm0, %v3856_v15  ;;  %v806_v43 = vmax.f32 %v552_v24, 0.0  ;;  %v3866_v15 = vld [vmem:[%s5447_s3 + $0x4] sm:$0xf] }
 0x13e   :  { %v1251_v22 = vadd.f32 %v1250_v21, %v1122_v20  ;;  %v3525_v20 = vor.u32 %v3866_v15, %v3522_v16  ;;  %v3882_v21 = vld [vmem:[%s5447_s3 + $0x84] sm:$0xf] }
 0x140   :  { %v1771_v54 = vmax.f32 %v1251_v22, 0.0  ;;  %v3586_v22 = vld [vmem:[%s5447_s3 + $0x88] sm:$0xf0]  ;;  %1372 = vmatpush.bf16.msrb.mxu0 %v3525_v20 }
 0x141   :  { %v424_v25 = vpop.f32.mrf.mxu0 }
 0x142   :  { %v425_v26 = vadd.f32 %v424_v25, %v4314_v38  ;;  %v553_v31 = vpop.f32.mrf.mxu1  ;;  %v3589_v25 = vor.u32 %v3882_v21, %v3586_v22 }
 0x143   :  { %v554_v32 = vadd.f32 %v553_v31, %v4317_v39  ;;  %v1123_v33 = vpop.f32.mrf.mxu2 }
 0x144   :  { %v807_v35 = vmax.f32 %v425_v26, 0.0  ;;  %v1124_v36 = vadd.f32 %v1123_v33, %v4485_v41  ;;  %v1252_v42 = vpop.f32.mrf.mxu3  ;;  %1501 = vmatpush.bf16.msrb.mxu1 %v3589_v25 }
 0x145   :  { %v808_v44 = vmax.f32 %v554_v32, 0.0 }
 0x146   :  { %v1253_v47 = vadd.f32 %v1252_v42, %v1124_v36  ;;  %v4518_v52 = vpack.c.bf16 %v807_v35, %v805_v34 }
 0x147   :  { %v4520_v53 = vpack.c.bf16 %v808_v44, %v806_v43 }
 0x148   :  { %v1773_v55 = vmax.f32 %v1253_v47, 0.0  ;;  %1165 = vmatmul.bf16.gmra.mxu2 %v4518_v52 }
 0x149   :  { %1294 = vmatmul.bf16.gmra.mxu3 %v4520_v53  ;;  %v427_v57 = vpop.f32.mrf.mxu0 }
 0x14a   :  { %v556_v60 = vpop.f32.mrf.mxu1  ;;  %v4527_v0 = vpack.c.bf16 %v1773_v55, %v1771_v54  ;;  %v428_v14 = vadd.f32 %v427_v57, %v4314_v38 }
 0x14b   :  { %v1126_v3 = vpop.f32.mrf.mxu2  ;;  %v557_v18 = vadd.f32 %v556_v60, %v4317_v39 }
 0x14c   :  { %v1127_v4 = vadd.f32 %v1126_v3, %v4485_v41  ;;  %v1255_v7 = vpop.f32.mrf.mxu3  ;;  %3489 = vmatmul.msk.bf16.gmra.mxu0 %vm290_vm0, %v3857_v56  ;;  %v809_v32 = vmax.f32 %v428_v14, 0.0 }
 0x14d   :  { %3513 = vmatmul.msk.bf16.gmra.mxu1 %vm290_vm0, %v3857_v56  ;;  %v810_v36 = vmax.f32 %v557_v18, 0.0  ;;  %v3858_v56 = vld [vmem:[%s5444_s0 + $0xa0] sm:$0xff] }
 0x14e   :  { %v1256_v10 = vadd.f32 %v1255_v7, %v1127_v4 }
 0x150   :  { %v1775_v54 = vmax.f32 %v1256_v10, 0.0 }
 0x151   :  { %v429_v19 = vpop.f32.mrf.mxu0 }
 0x152   :  { %v430_v23 = vadd.f32 %v429_v19, %v4314_v38  ;;  %v558_v24 = vpop.f32.mrf.mxu1 }
 0x153   :  { %v559_v26 = vadd.f32 %v558_v24, %v4317_v39  ;;  %v1128_v31 = vpop.f32.mrf.mxu2 }
 0x154   :  { %v811_v33 = vmax.f32 %v430_v23, 0.0  ;;  %v1129_v34 = vadd.f32 %v1128_v31, %v4485_v41  ;;  %v1257_v35 = vpop.f32.mrf.mxu3 }
 0x155   :  { %v812_v42 = vmax.f32 %v559_v26, 0.0 }
 0x156   :  { %v1258_v43 = vadd.f32 %v1257_v35, %v1129_v34  ;;  %v4549_v44 = vpack.c.bf16 %v811_v33, %v809_v32  ;;  %v3859_v32 = vld [vmem:[%s5444_s0 + $0xa8] sm:$0xff] }
 0x157   :  { %v4551_v47 = vpack.c.bf16 %v812_v42, %v810_v36 }
 0x158   :  { %v1777_v55 = vmax.f32 %v1258_v43, 0.0  ;;  %1170 = vmatmul.bf16.gmra.mxu2 %v4549_v44 }
 0x159   :  { %1299 = vmatmul.bf16.gmra.mxu3 %v4551_v47  ;;  %v432_v57 = vpop.f32.mrf.mxu0 }
 0x15a   :  { %v561_v58 = vpop.f32.mrf.mxu1  ;;  %v4558_v59 = vpack.c.bf16 %v1777_v55, %v1775_v54  ;;  %v433_v7 = vadd.f32 %v432_v57, %v4314_v38 }
 0x15b   :  { %v1131_v60 = vpop.f32.mrf.mxu2  ;;  %v562_v8 = vadd.f32 %v561_v58, %v4317_v39 }
 0x15c   :  { %v1132_v61 = vadd.f32 %v1131_v60, %v4485_v41  ;;  %v1260_v3 = vpop.f32.mrf.mxu3  ;;  %3490 = vmatmul.msk.bf16.gmra.mxu0 %vm290_vm0, %v3858_v56  ;;  %v813_v16 = vmax.f32 %v433_v7, 0.0 }
 0x15d   :  { %3514 = vmatmul.msk.bf16.gmra.mxu1 %vm290_vm0, %v3858_v56  ;;  %v814_v21 = vmax.f32 %v562_v8, 0.0 }
 0x15e   :  { %v1261_v4 = vadd.f32 %v1260_v3, %v1132_v61 }
 0x160   :  { %v1779_v26 = vmax.f32 %v1261_v4, 0.0 }
 0x161   :  { %v434_v9 = vpop.f32.mrf.mxu0 }
 0x162   :  { %v435_v10 = vadd.f32 %v434_v9, %v4314_v38  ;;  %v563_v13 = vpop.f32.mrf.mxu1 }
 0x163   :  { %v564_v14 = vadd.f32 %v563_v13, %v4317_v39  ;;  %v1133_v15 = vpop.f32.mrf.mxu2 }
 0x164   :  { %v815_v18 = vmax.f32 %v435_v10, 0.0  ;;  %v1134_v19 = vadd.f32 %v1133_v15, %v4485_v41  ;;  %v1262_v20 = vpop.f32.mrf.mxu3 }
 0x165   :  { %v816_v22 = vmax.f32 %v564_v14, 0.0 }
 0x166   :  { %v1263_v23 = vadd.f32 %v1262_v20, %v1134_v19  ;;  %v4568_v24 = vpack.c.bf16 %v815_v18, %v813_v16  ;;  %v3860_v20 = vld [vmem:[%s5444_s0 + $0xb0] sm:$0xff] }
 0x167   :  { %v4570_v25 = vpack.c.bf16 %v816_v22, %v814_v21  ;;  %v3664_v22 = vld [vmem:[#allocation6 + $0x20] sm:$0xf] }
 0x168   :  { %v1781_v31 = vmax.f32 %v1263_v23, 0.0  ;;  %1175 = vmatmul.bf16.gmra.mxu2 %v4568_v24  ;;  %v3903_v23 = vld [vmem:[#allocation6 + $0x24] sm:$0xf0] }
 0x169   :  { %1304 = vmatmul.bf16.gmra.mxu3 %v4570_v25  ;;  %v437_v33 = vpop.f32.mrf.mxu0 }
 0x16a   :  { %v566_v34 = vpop.f32.mrf.mxu1  ;;  %v4577_v35 = vpack.c.bf16 %v1781_v31, %v1779_v26  ;;  %v438_v55 = vadd.f32 %v437_v33, %v4314_v38  ;;  %v3665_v31 = vor.u32 %v3903_v23, %v3664_v22 }
 0x16b   :  { %v1136_v36 = vpop.f32.mrf.mxu2  ;;  %v567_v56 = vadd.f32 %v566_v34, %v4317_v39 }
 0x16c   :  { %v1137_v42 = vadd.f32 %v1136_v36, %v4485_v41  ;;  %v1265_v43 = vpop.f32.mrf.mxu3  ;;  %3491 = vmatmul.msk.bf16.gmra.mxu0 %vm290_vm0, %v3859_v32  ;;  %v817_v4 = vmax.f32 %v438_v55, 0.0  ;;  %2114 = vmatpush.bf16.msrb.mxu2 %v3665_v31 }
 0x16d   :  { %3515 = vmatmul.msk.bf16.gmra.mxu1 %vm290_vm0, %v3859_v32  ;;  %v818_v10 = vmax.f32 %v567_v56, 0.0 }
 0x16e   :  { %v1266_v54 = vadd.f32 %v1265_v43, %v1137_v42  ;;  %v3728_v42 = vld [vmem:[#allocation6 + $0xa0] sm:$0xf]  ;;  %v3919_v43 = vld [vmem:[#allocation6 + $0xa4] sm:$0xf0] }
 0x16f   :  { %v3729_v55 = vor.u32 %v3919_v43, %v3728_v42  ;;  %v3861_v42 = vld [vmem:[%s5444_s0 + $0xb8] sm:$0xff] }
 0x170   :  { %v1783_v18 = vmax.f32 %v1266_v54, 0.0 }
 0x171   :  { %v439_v57 = vpop.f32.mrf.mxu0  ;;  %2243 = vmatpush.bf16.msrb.mxu3 %v3729_v55 }
 0x172   :  { %v440_v58 = vadd.f32 %v439_v57, %v4314_v38  ;;  %v568_v60 = vpop.f32.mrf.mxu1  ;;  %v3912_v57 = vld [vmem:[#allocation6 + $0x74] sm:$0xf] }
 0x173   :  { %v569_v61 = vadd.f32 %v568_v60, %v4317_v39  ;;  %v1138_v3 = vpop.f32.mrf.mxu2 }
 0x174   :  { %v819_v7 = vmax.f32 %v440_v58, 0.0  ;;  %v1139_v8 = vadd.f32 %v1138_v3, %v4485_v41  ;;  %v1267_v9 = vpop.f32.mrf.mxu3  ;;  %v3706_v58 = vld [vmem:[#allocation6 + $0x78] sm:$0xf0] }
 0x175   :  { %v820_v13 = vmax.f32 %v569_v61, 0.0  ;;  %v3709_v3 = vor.u32 %v3912_v57, %v3706_v58 }
 0x176   :  { %v1268_v14 = vadd.f32 %v1267_v9, %v1139_v8  ;;  %v4587_v15 = vpack.c.bf16 %v819_v7, %v817_v4  ;;  %v3928_v4 = vld [vmem:[#allocation6 + $0xf4] sm:$0xf]  ;;  %v3770_v7 = vld [vmem:[#allocation6 + $0xf8] sm:$0xf0] }
 0x177   :  { %v4589_v16 = vpack.c.bf16 %v820_v13, %v818_v10  ;;  %v3773_v10 = vor.u32 %v3928_v4, %v3770_v7  ;;  %2367 = vmatpush.bf16.msra.mxu0 %v3709_v3 }
 0x178   :  { %v1785_v19 = vmax.f32 %v1268_v14, 0.0  ;;  %1180 = vmatmul.bf16.gmra.mxu2 %v4587_v15 }
 0x179   :  { %1309 = vmatmul.bf16.gmra.mxu3 %v4589_v16  ;;  %v442_v21 = vpop.f32.mrf.mxu0  ;;  %2496 = vmatpush.bf16.msra.mxu1 %v3773_v10 }
 0x17a   :  { %v571_v26 = vpop.f32.mrf.mxu1  ;;  %v4596_v32 = vpack.c.bf16 %v1785_v19, %v1783_v18  ;;  %v443_v56 = vadd.f32 %v442_v21, %v4314_v38 }
 0x17b   :  { %v1141_v33 = vpop.f32.mrf.mxu2  ;;  %v572_v60 = vadd.f32 %v571_v26, %v4317_v39 }
 0x17c   :  { %v1142_v34 = vadd.f32 %v1141_v33, %v4485_v41  ;;  %v1270_v36 = vpop.f32.mrf.mxu3  ;;  %3492 = vmatmul.msk.bf16.gmra.mxu0 %vm290_vm0, %v3860_v20  ;;  %v821_v18 = vmax.f32 %v443_v56, 0.0 }
 0x17d   :  { %3516 = vmatmul.msk.bf16.gmra.mxu1 %vm290_vm0, %v3860_v20  ;;  %v822_v22 = vmax.f32 %v572_v60, 0.0 }
 0x17e   :  { %v1271_v54 = vadd.f32 %v1270_v36, %v1142_v34 }
 0x180   :  { %v1787_v34 = vmax.f32 %v1271_v54, 0.0 }
 0x181   :  { %v444_v61 = vpop.f32.mrf.mxu0 }
 0x182   :  { %v445_v8 = vadd.f32 %v444_v61, %v4314_v38  ;;  %v573_v9 = vpop.f32.mrf.mxu1 }
 0x183   :  { %v574_v13 = vadd.f32 %v573_v9, %v4317_v39  ;;  %v1143_v14 = vpop.f32.mrf.mxu2 }
 0x184   :  { %v823_v19 = vmax.f32 %v445_v8, 0.0  ;;  %v1144_v20 = vadd.f32 %v1143_v14, %v4485_v41  ;;  %v1272_v21 = vpop.f32.mrf.mxu3 }
 0x185   :  { %v824_v23 = vmax.f32 %v574_v13, 0.0 }
 0x186   :  { %v1273_v26 = vadd.f32 %v1272_v21, %v1144_v20  ;;  %v4606_v31 = vpack.c.bf16 %v823_v19, %v821_v18 }
 0x187   :  { %v4608_v33 = vpack.c.bf16 %v824_v23, %v822_v22 }
 0x188   :  { %v1789_v36 = vmax.f32 %v1273_v26, 0.0  ;;  %1185 = vmatmul.bf16.gmra.mxu2 %v4606_v31 }
 0x189   :  { %1314 = vmatmul.bf16.gmra.mxu3 %v4608_v33  ;;  %v447_v43 = vpop.f32.mrf.mxu0 }
 0x18a   :  { %v576_v55 = vpop.f32.mrf.mxu1  ;;  %v4615_v56 = vpack.c.bf16 %v1789_v36, %v1787_v34  ;;  %v448_v61 = vadd.f32 %v447_v43, %v4314_v38 }
 0x18b   :  { %v1146_v57 = vpop.f32.mrf.mxu2  ;;  %v577_v3 = vadd.f32 %v576_v55, %v4317_v39 }
 0x18c   :  { %v1147_v58 = vadd.f32 %v1146_v57, %v4485_v41  ;;  %v1275_v60 = vpop.f32.mrf.mxu3  ;;  %3493 = vmatmul.msk.bf16.gmra.mxu0 %vm290_vm0, %v3861_v42  ;;  %v825_v13 = vmax.f32 %v448_v61, 0.0 }
 0x18d   :  { %3517 = vmatmul.msk.bf16.gmra.mxu1 %vm290_vm0, %v3861_v42  ;;  %v826_v20 = vmax.f32 %v577_v3, 0.0 }
 0x18e   :  { %v1276_v54 = vadd.f32 %v1275_v60, %v1147_v58 }
 0x190   :  { %v1791_v34 = vmax.f32 %v1276_v54, 0.0 }
 0x191   :  { %v449_v4 = vpop.f32.mrf.mxu0 }
 0x192   :  { %v450_v7 = vadd.f32 %v449_v4, %v4314_v38  ;;  %v578_v8 = vpop.f32.mrf.mxu1 }
 0x193   :  { %v579_v9 = vadd.f32 %v578_v8, %v4317_v39  ;;  %v1148_v10 = vpop.f32.mrf.mxu2 }
 0x194   :  { %v827_v14 = vmax.f32 %v450_v7, 0.0  ;;  %v1149_v18 = vadd.f32 %v1148_v10, %v4485_v41  ;;  %v1277_v19 = vpop.f32.mrf.mxu3 }
 0x195   :  { %v828_v21 = vmax.f32 %v579_v9, 0.0 }
 0x196   :  { %v1278_v22 = vadd.f32 %v1277_v19, %v1149_v18  ;;  %v4625_v23 = vpack.c.bf16 %v827_v14, %v825_v13 }
 0x197   :  { %v4627_v26 = vpack.c.bf16 %v828_v21, %v826_v20 }
 0x198   :  { %v1793_v36 = vmax.f32 %v1278_v22, 0.0  ;;  %1190 = vmatmul.bf16.gmra.mxu2 %v4625_v23 }
 0x199   :  { %1319 = vmatmul.bf16.gmra.mxu3 %v4627_v26  ;;  %v452_v42 = vpop.f32.mrf.mxu0 }
 0x19a   :  { %v581_v43 = vpop.f32.mrf.mxu1  ;;  %v4631_v55 = vpack.c.bf16 %v1793_v36, %v1791_v34  ;;  %v453_v54 = vadd.f32 %v452_v42, %v4314_v38 }
 0x19b   :  { %v1151_v57 = vpop.f32.mrf.mxu2  ;;  %v582_v3 = vadd.f32 %v581_v43, %v4317_v39  ;;  %v3656_v43 = vld [vmem:[#allocation6 + $0x10] sm:$0xf] }
 0x19c   :  { %v1152_v58 = vadd.f32 %v1151_v57, %v4485_v41  ;;  %v1280_v60 = vpop.f32.mrf.mxu3  ;;  %1373 = vmatmul.bf16.vlgmr.msrb.gmra.mxu0 %v4324_v50  ;;  %v829_v13 = vmax.f32 %v453_v54, 0.0  ;;  %v3901_v57 = vld [vmem:[#allocation6 + $0x14] sm:$0xf0] }
 0x19d   :  { %1502 = vmatmul.bf16.vlgmr.msrb.gmra.mxu1 %v4326_v51  ;;  %v830_v50 = vmax.f32 %v582_v3, 0.0 }
 0x19e   :  { %v1281_v61 = vadd.f32 %v1280_v60, %v1152_v58  ;;  %v3657_v60 = vor.u32 %v3901_v57, %v3656_v43 }
 0x1a0   :  { %v1795_v34 = vmax.f32 %v1281_v61, 0.0  ;;  %2115 = vmatpush.bf16.msrb.mxu2 %v3657_v60  ;;  %v3720_v61 = vld [vmem:[#allocation6 + $0x90] sm:$0xf] }
 0x1a1   :  { %v454_v4 = vpop.f32.mrf.mxu0 }
 0x1a2   :  { %v455_v7 = vadd.f32 %v454_v4, %v4314_v38  ;;  %v583_v8 = vpop.f32.mrf.mxu1 }
 0x1a3   :  { %v584_v9 = vadd.f32 %v583_v8, %v4317_v39  ;;  %v1153_v10 = vpop.f32.mrf.mxu2  ;;  %v3917_v8 = vld [vmem:[#allocation6 + $0x94] sm:$0xf0] }
 0x1a4   :  { %v831_v14 = vmax.f32 %v455_v7, 0.0  ;;  %v1154_v18 = vadd.f32 %v1153_v10, %v4485_v41  ;;  %v1282_v19 = vpop.f32.mrf.mxu3  ;;  %v3721_v10 = vor.u32 %v3917_v8, %v3720_v61 }
 0x1a5   :  { %v832_v20 = vmax.f32 %v584_v9, 0.0 }
 0x1a6   :  { %v1283_v51 = vadd.f32 %v1282_v19, %v1154_v18  ;;  %v4641_v21 = vpack.c.bf16 %v831_v14, %v829_v13  ;;  %2244 = vmatpush.bf16.msrb.mxu3 %v3721_v10  ;;  %v3910_v14 = vld [vmem:[#allocation6 + $0x64] sm:$0xf]  ;;  %v3698_v18 = vld [vmem:[#allocation6 + $0x68] sm:$0xf0] }
 0x1a7   :  { %v4643_v22 = vpack.c.bf16 %v832_v20, %v830_v50  ;;  %v3701_v20 = vor.u32 %v3910_v14, %v3698_v18 }
 0x1a8   :  { %v1797_v36 = vmax.f32 %v1283_v51, 0.0  ;;  %1195 = vmatmul.bf16.gmra.mxu2 %v4641_v21  ;;  %v3926_v51 = vld [vmem:[#allocation6 + $0xe4] sm:$0xf] }
 0x1a9   :  { %1324 = vmatmul.bf16.gmra.mxu3 %v4643_v22  ;;  %v457_v42 = vpop.f32.mrf.mxu0  ;;  %2368 = vmatpush.bf16.msra.mxu0 %v3701_v20 }
 0x1aa   :  { %v586_v58 = vpop.f32.mrf.mxu1  ;;  %v4647_v54 = vpack.c.bf16 %v1797_v36, %v1795_v34  ;;  %v458_v13 = vadd.f32 %v457_v42, %v4314_v38  ;;  %v3762_v34 = vld [vmem:[#allocation6 + $0xe8] sm:$0xf0] }
 0x1ab   :  { %v1156_v3 = vpop.f32.mrf.mxu2  ;;  %v587_v19 = vadd.f32 %v586_v58, %v4317_v39  ;;  %v3765_v43 = vor.u32 %v3926_v51, %v3762_v34 }
 0x1ac   :  { %v1157_v4 = vadd.f32 %v1156_v3, %v4485_v41  ;;  %v1285_v7 = vpop.f32.mrf.mxu3  ;;  %1378 = vmatmul.bf16.gmra.mxu0 %v4339_v1  ;;  %v833_v60 = vmax.f32 %v458_v13, 0.0 }
 0x1ad   :  { %1507 = vmatmul.bf16.gmra.mxu1 %v4341_v2 }
 0x1ae   :  { %v1286_v9 = vadd.f32 %v1285_v7, %v1157_v4  ;;  %2497 = vmatpush.bf16.msra.mxu1 %v3765_v43  ;;  %v834_v7 = vmax.f32 %v587_v19, 0.0 }
 0x1b0   :  { %v1799_v14 = vmax.f32 %v1286_v9, 0.0 }
 0x1b1   :  { %v459_v50 = vpop.f32.mrf.mxu0 }
 0x1b2   :  { %v460_v1 = vadd.f32 %v459_v50, %v4314_v38  ;;  %v588_v36 = vpop.f32.mrf.mxu1 }
 0x1b3   :  { %v589_v2 = vadd.f32 %v588_v36, %v4317_v39  ;;  %v1158_v57 = vpop.f32.mrf.mxu2 }
 0x1b4   :  { %v835_v3 = vmax.f32 %v460_v1, 0.0  ;;  %v1159_v42 = vadd.f32 %v1158_v57, %v4485_v41  ;;  %v1287_v4 = vpop.f32.mrf.mxu3 }
 0x1b5   :  { %v836_v58 = vmax.f32 %v589_v2, 0.0 }
 0x1b6   :  { %v1288_v61 = vadd.f32 %v1287_v4, %v1159_v42  ;;  %v4657_v8 = vpack.c.bf16 %v835_v3, %v833_v60 }
 0x1b7   :  { %v4659_v10 = vpack.c.bf16 %v836_v58, %v834_v7 }
 0x1b8   :  { %v1801_v18 = vmax.f32 %v1288_v61, 0.0  ;;  %1200 = vmatmul.bf16.gmra.mxu2 %v4657_v8 }
 0x1b9   :  { %1329 = vmatmul.bf16.gmra.mxu3 %v4659_v10  ;;  %v462_v50 = vpop.f32.mrf.mxu0 }
 0x1ba   :  { %v591_v13 = vpop.f32.mrf.mxu1  ;;  %v4663_v20 = vpack.c.bf16 %v1801_v18, %v1799_v14  ;;  %v463_v9 = vadd.f32 %v462_v50, %v4314_v38 }
 0x1bb   :  { %v1161_v51 = vpop.f32.mrf.mxu2  ;;  %v592_v36 = vadd.f32 %v591_v13, %v4317_v39 }
 0x1bc   :  { %v1162_v34 = vadd.f32 %v1161_v51, %v4485_v41  ;;  %v1290_v19 = vpop.f32.mrf.mxu3  ;;  %1383 = vmatmul.bf16.gmra.mxu0 %v4366_v28  ;;  %v837_v42 = vmax.f32 %v463_v9, 0.0 }
 0x1bd   :  { %1512 = vmatmul.bf16.gmra.mxu1 %v4368_v29  ;;  %v838_v28 = vmax.f32 %v592_v36, 0.0 }
 0x1be   :  { %v1291_v1 = vadd.f32 %v1290_v19, %v1162_v34 }
 0x1c0   :  { %v1803_v50 = vmax.f32 %v1291_v1, 0.0 }
 0x1c1   :  { %v464_v43 = vpop.f32.mrf.mxu0 }
 0x1c2   :  { %v465_v2 = vadd.f32 %v464_v43, %v4314_v38  ;;  %v593_v57 = vpop.f32.mrf.mxu1 }
 0x1c3   :  { %v594_v60 = vadd.f32 %v593_v57, %v4317_v39  ;;  %v1163_v3 = vpop.f32.mrf.mxu2 }
 0x1c4   :  { %v839_v4 = vmax.f32 %v465_v2, 0.0  ;;  %v1164_v7 = vadd.f32 %v1163_v3, %v4485_v41  ;;  %v1292_v58 = vpop.f32.mrf.mxu3 }
 0x1c5   :  { %v840_v61 = vmax.f32 %v594_v60, 0.0 }
 0x1c6   :  { %v1293_v29 = vadd.f32 %v1292_v58, %v1164_v7  ;;  %v4673_v14 = vpack.c.bf16 %v839_v4, %v837_v42 }
 0x1c7   :  { %v4675_v18 = vpack.c.bf16 %v840_v61, %v838_v28 }
 0x1c8   :  { %v1805_v13 = vmax.f32 %v1293_v29, 0.0  ;;  %1205 = vmatmul.bf16.gmra.mxu2 %v4673_v14 }
 0x1c9   :  { %1334 = vmatmul.bf16.gmra.mxu3 %v4675_v18  ;;  %v467_v51 = vpop.f32.mrf.mxu0 }
 0x1ca   :  { %v596_v34 = vpop.f32.mrf.mxu1  ;;  %v4679_v19 = vpack.c.bf16 %v1805_v13, %v1803_v50  ;;  %v468_v1 = vadd.f32 %v467_v51, %v4314_v38 }
 0x1cb   :  { %v1166_v9 = vpop.f32.mrf.mxu2  ;;  %v597_v57 = vadd.f32 %v596_v34, %v4317_v39 }
 0x1cc   :  { %v1167_v43 = vadd.f32 %v1166_v9, %v4485_v41  ;;  %v1295_v36 = vpop.f32.mrf.mxu3  ;;  %1388 = vmatmul.bf16.gmra.mxu0 %v4381_v45  ;;  %v841_v58 = vmax.f32 %v468_v1, 0.0  ;;  %v3899_v1 = vld [vmem:[#allocation6 + $0x4] sm:$0xf0] }
 0x1cd   :  { %1517 = vmatmul.bf16.gmra.mxu1 %v4383_v46  ;;  %v842_v45 = vmax.f32 %v597_v57, 0.0 }
 0x1ce   :  { %v1296_v2 = vadd.f32 %v1295_v36, %v1167_v43  ;;  %v3648_v36 = vld [vmem:[#allocation6] sm:$0xf] }
 0x1d0   :  { %v1807_v34 = vmax.f32 %v1296_v2, 0.0  ;;  %v3712_v2 = vld [vmem:[#allocation6 + $0x80] sm:$0xf] }
 0x1d1   :  { %v469_v60 = vpop.f32.mrf.mxu0 }
 0x1d2   :  { %v470_v3 = vadd.f32 %v469_v60, %v4314_v38  ;;  %v598_v42 = vpop.f32.mrf.mxu1 }
 0x1d3   :  { %v599_v4 = vadd.f32 %v598_v42, %v4317_v39  ;;  %v1168_v7 = vpop.f32.mrf.mxu2 }
 0x1d4   :  { %v843_v28 = vmax.f32 %v470_v3, 0.0  ;;  %v1169_v61 = vadd.f32 %v1168_v7, %v4485_v41  ;;  %v1297_v29 = vpop.f32.mrf.mxu3  ;;  %v3649_v3 = vor.u32 %v3899_v1, %v3648_v36  ;;  %v3924_v36 = vld [vmem:[#allocation6 + $0xd4] sm:$0xf]  ;;  %v3754_v1 = vld [vmem:[#allocation6 + $0xd8] sm:$0xf0] }
 0x1d5   :  { %v844_v50 = vmax.f32 %v599_v4, 0.0 }
 0x1d6   :  { %v1298_v46 = vadd.f32 %v1297_v29, %v1169_v61  ;;  %v4689_v13 = vpack.c.bf16 %v843_v28, %v841_v58  ;;  %2116 = vmatpush.bf16.msrb.mxu2 %v3649_v3  ;;  %v3915_v58 = vld [vmem:[#allocation6 + $0x84] sm:$0xf0] }
 0x1d7   :  { %v4691_v51 = vpack.c.bf16 %v844_v50, %v842_v45  ;;  %v3713_v61 = vor.u32 %v3915_v58, %v3712_v2  ;;  %v3908_v45 = vld [vmem:[#allocation6 + $0x54] sm:$0xf]  ;;  %v3690_v50 = vld [vmem:[#allocation6 + $0x58] sm:$0xf0] }
 0x1d8   :  { %5463 = vst [vmem:[#allocation12_spill] sm:$0xff] %v4689_v13  ;;  %v1809_v9 = vmax.f32 %v1298_v46, 0.0  ;;  %1210 = vmatmul.bf16.gmra.mxu2 %v4689_v13 }
 0x1d9   :  { %5464 = vst [vmem:[#allocation13_spill] sm:$0xff] %v4691_v51  ;;  %1339 = vmatmul.bf16.gmra.mxu3 %v4691_v51  ;;  %v472_v43 = vpop.f32.mrf.mxu0 }
 0x1da   :  { %v601_v60 = vpop.f32.mrf.mxu1  ;;  %v4695_v42 = vpack.c.bf16 %v1809_v9, %v1807_v34  ;;  %v473_v29 = vadd.f32 %v472_v43, %v4314_v38  ;;  %2245 = vmatpush.bf16.msrb.mxu3 %v3713_v61  ;;  %v3693_v9 = vor.u32 %v3908_v45, %v3690_v50 }
 0x1db   :  { %v1171_v57 = vpop.f32.mrf.mxu2  ;;  %v602_v46 = vadd.f32 %v601_v60, %v4317_v39 }
 0x1dc   :  { %5465 = vst [vmem:[#allocation14_spill] sm:$0xff] %v4695_v42  ;;  %v1172_v4 = vadd.f32 %v1171_v57, %v4485_v41  ;;  %v1300_v7 = vpop.f32.mrf.mxu3  ;;  %1393 = vmatmul.bf16.gmra.mxu0 %v4396_v62  ;;  %v3757_v57 = vor.u32 %v3924_v36, %v3754_v1 }
 0x1dd   :  { %1522 = vmatmul.bf16.gmra.mxu1 %v4398_v63  ;;  %2369 = vmatpush.bf16.msra.mxu0 %v3693_v9  ;;  %v846_v58 = vmax.f32 %v602_v46, 0.0 }
 0x1de   :  { %v1301_v28 = vadd.f32 %v1300_v7, %v1172_v4  ;;  %v845_v4 = vmax.f32 %v473_v29, 0.0  ;;  %2498 = vmatpush.bf16.msra.mxu1 %v3757_v57 }
 0x1e1   :  { %v474_v34 = vpop.f32.mrf.mxu0 }
 0x1e2   :  { %v475_v62 = vadd.f32 %v474_v34, %v4314_v38  ;;  %v603_v3 = vpop.f32.mrf.mxu1  ;;  %v1811_v34 = vmax.f32 %v1301_v28, 0.0 }
 0x1e3   :  { %v604_v63 = vadd.f32 %v603_v3, %v4317_v39  ;;  %v1173_v51 = vpop.f32.mrf.mxu2 }
 0x1e4   :  { %v847_v7 = vmax.f32 %v475_v62, 0.0  ;;  %v1174_v43 = vadd.f32 %v1173_v51, %v4485_v41  ;;  %v1302_v2 = vpop.f32.mrf.mxu3 }
 0x1e5   :  { %v848_v60 = vmax.f32 %v604_v63, 0.0 }
 0x1e6   :  { %v1303_v61 = vadd.f32 %v1302_v2, %v1174_v43  ;;  %v4705_v45 = vpack.c.bf16 %v847_v7, %v845_v4 }
 0x1e7   :  { %v4707_v50 = vpack.c.bf16 %v848_v60, %v846_v58 }
 0x1e8   :  { %v1813_v13 = vmax.f32 %v1303_v61, 0.0  ;;  %1215 = vmatmul.bf16.gmra.mxu2 %v4705_v45 }
 0x1e9   :  { %1344 = vmatmul.bf16.gmra.mxu3 %v4707_v50  ;;  %v477_v9 = vpop.f32.mrf.mxu0 }
 0x1ea   :  { %v606_v29 = vpop.f32.mrf.mxu1  ;;  %v4711_v36 = vpack.c.bf16 %v1813_v13, %v1811_v34  ;;  %v478_v28 = vadd.f32 %v477_v9, %v4314_v38 }
 0x1eb   :  { %v1176_v51 = vpop.f32.mrf.mxu2  ;;  %v607_v3 = vadd.f32 %v606_v29, %v4317_v39 }
 0x1ec   :  { %v1177_v1 = vadd.f32 %v1176_v51, %v4485_v41  ;;  %v1305_v46 = vpop.f32.mrf.mxu3  ;;  %1398 = vmatmul.bf16.gmra.mxu0 %v4423_v27  ;;  %v849_v43 = vmax.f32 %v478_v28, 0.0 }
 0x1ed   :  { %1527 = vmatmul.bf16.gmra.mxu1 %v4425_v30  ;;  %v850_v27 = vmax.f32 %v607_v3, 0.0 }
 0x1ee   :  { %v1306_v62 = vadd.f32 %v1305_v46, %v1177_v1 }
 0x1f0   :  { %v1815_v29 = vmax.f32 %v1306_v62, 0.0 }
 0x1f1   :  { %v479_v57 = vpop.f32.mrf.mxu0 }
 0x1f2   :  { %v480_v63 = vadd.f32 %v479_v57, %v4314_v38  ;;  %v608_v4 = vpop.f32.mrf.mxu1 }
 0x1f3   :  { %v609_v13 = vadd.f32 %v608_v4, %v4317_v39  ;;  %v1178_v7 = vpop.f32.mrf.mxu2 }
 0x1f4   :  { %v851_v2 = vmax.f32 %v480_v63, 0.0  ;;  %v1179_v58 = vadd.f32 %v1178_v7, %v4485_v41  ;;  %v1307_v60 = vpop.f32.mrf.mxu3 }
 0x1f5   :  { %v852_v61 = vmax.f32 %v609_v13, 0.0 }
 0x1f6   :  { %v1308_v30 = vadd.f32 %v1307_v60, %v1179_v58  ;;  %v4721_v34 = vpack.c.bf16 %v851_v2, %v849_v43 }
 0x1f7   :  { %v4723_v9 = vpack.c.bf16 %v852_v61, %v850_v27 }
 0x1f8   :  { %v1817_v51 = vmax.f32 %v1308_v30, 0.0  ;;  %1220 = vmatmul.bf16.gmra.mxu2 %v4721_v34 }
 0x1f9   :  { %1349 = vmatmul.bf16.gmra.mxu3 %v4723_v9  ;;  %v482_v1 = vpop.f32.mrf.mxu0 }
 0x1fa   :  { %v611_v46 = vpop.f32.mrf.mxu1  ;;  %v4727_v28 = vpack.c.bf16 %v1817_v51, %v1815_v29  ;;  %v483_v62 = vadd.f32 %v482_v1, %v4314_v38 }
 0x1fb   :  { %v1181_v57 = vpop.f32.mrf.mxu2  ;;  %v612_v13 = vadd.f32 %v611_v46, %v4317_v39 }
 0x1fc   :  { %v1182_v63 = vadd.f32 %v1181_v57, %v4485_v41  ;;  %v1310_v3 = vpop.f32.mrf.mxu3  ;;  %1403 = vmatmul.bf16.gmra.mxu0 %v4438_v48  ;;  %v853_v27 = vmax.f32 %v483_v62, 0.0 }
 0x1fd   :  { %1532 = vmatmul.bf16.gmra.mxu1 %v4440_v49  ;;  %v854_v48 = vmax.f32 %v612_v13, 0.0 }
 0x1fe   :  { %v1311_v4 = vadd.f32 %v1310_v3, %v1182_v63  ;;  %v3937_v3 = vld [vmem:[%s5451_s7 + $0x38] sm:$0xff] }
 0x1ff   :  { %3045 = vmatpush.bf16.msra.mxu2 %v3937_v3 }
 0x200   :  { %v1819_v46 = vmax.f32 %v1311_v4, 0.0 }
 0x201   :  { %v484_v7 = vpop.f32.mrf.mxu0 }
 0x202   :  { %v485_v43 = vadd.f32 %v484_v7, %v4314_v38  ;;  %v613_v2 = vpop.f32.mrf.mxu1 }
 0x203   :  { %v614_v58 = vadd.f32 %v613_v2, %v4317_v39  ;;  %v1183_v60 = vpop.f32.mrf.mxu2 }
 0x204   :  { %v855_v61 = vmax.f32 %v485_v43, 0.0  ;;  %v1184_v30 = vadd.f32 %v1183_v60, %v4485_v41  ;;  %v1312_v29 = vpop.f32.mrf.mxu3  ;;  %v3945_v60 = vld [vmem:[%s5451_s7 + $0x78] sm:$0xff] }
 0x205   :  { %v856_v51 = vmax.f32 %v614_v58, 0.0  ;;  %3174 = vmatpush.bf16.msra.mxu3 %v3945_v60 }
 0x206   :  { %v1313_v49 = vadd.f32 %v1312_v29, %v1184_v30  ;;  %v4737_v57 = vpack.c.bf16 %v855_v61, %v853_v27  ;;  %v3906_v61 = vld [vmem:[#allocation6 + $0x44] sm:$0xf]  ;;  %v3682_v30 = vld [vmem:[#allocation6 + $0x48] sm:$0xf0] }
 0x207   :  { %v4739_v1 = vpack.c.bf16 %v856_v51, %v854_v48  ;;  %v3685_v51 = vor.u32 %v3906_v61, %v3682_v30 }
 0x208   :  { %5466 = vst [vmem:[#allocation15_spill] sm:$0xff] %v4737_v57  ;;  %v1821_v63 = vmax.f32 %v1313_v49, 0.0  ;;  %1225 = vmatmul.bf16.gmra.mxu2 %v4737_v57  ;;  %v3922_v49 = vld [vmem:[#allocation6 + $0xc4] sm:$0xf] }
 0x209   :  { %5467 = vst [vmem:[#allocation16_spill] sm:$0xff] %v4739_v1  ;;  %1354 = vmatmul.bf16.gmra.mxu3 %v4739_v1  ;;  %v487_v62 = vpop.f32.mrf.mxu0  ;;  %2370 = vmatpush.bf16.msra.mxu0 %v3685_v51 }
 0x20a   :  { %v616_v7 = vpop.f32.mrf.mxu1  ;;  %v4746_v13 = vpack.c.bf16 %v1821_v63, %v1819_v46  ;;  %v488_v27 = vadd.f32 %v487_v62, %v4314_v38  ;;  %v3746_v46 = vld [vmem:[#allocation6 + $0xc8] sm:$0xf0] }
 0x20b   :  { %v1186_v43 = vpop.f32.mrf.mxu2  ;;  %v617_v29 = vadd.f32 %v616_v7, %v4317_v39 }
 0x20c   :  { %v1187_v2 = vadd.f32 %v1186_v43, %v4485_v41  ;;  %v1315_v58 = vpop.f32.mrf.mxu3  ;;  %1408 = vmatmul.bf16.gmra.mxu0 %v4453_v5 }
 0x20d   :  { %1537 = vmatmul.bf16.gmra.mxu1 %v4455_v6  ;;  %v3749_v6 = vor.u32 %v3922_v49, %v3746_v46  ;;  %v858_v1 = vmax.f32 %v617_v29, 0.0 }
 0x20e   :  { %v1316_v4 = vadd.f32 %v1315_v58, %v1187_v2  ;;  %v857_v2 = vmax.f32 %v488_v27, 0.0  ;;  %v3953_v27 = vld [vmem:[#allocation4] sm:$0x3] }
 0x20f   :  { %2499 = vmatpush.bf16.msra.mxu1 %v3749_v6  ;;  %v4765_v51 = vperm.slane %v3953_v27, 1 }
 0x211   :  { %v489_v48 = vpop.f32.mrf.mxu0 }
 0x212   :  { %v490_v5 = vadd.f32 %v489_v48, %v4314_v38  ;;  %v618_v63 = vpop.f32.mrf.mxu1  ;;  %v1823_v38 = vmax.f32 %v1316_v4, 0.0 }
 0x213   :  { %v619_v3 = vadd.f32 %v618_v63, %v4317_v39  ;;  %v1188_v43 = vpop.f32.mrf.mxu2 }
 0x214   :  { %v859_v58 = vmax.f32 %v490_v5, 0.0  ;;  %v1189_v62 = vadd.f32 %v1188_v43, %v4485_v41  ;;  %v1317_v60 = vpop.f32.mrf.mxu3 }
 0x215   :  { %v860_v7 = vmax.f32 %v619_v3, 0.0 }
 0x216   :  { %v1318_v57 = vadd.f32 %v1317_v60, %v1189_v62  ;;  %v4759_v61 = vpack.c.bf16 %v859_v58, %v857_v2 }
 0x217   :  { %v4761_v30 = vpack.c.bf16 %v860_v7, %v858_v1 }
 0x218   :  { %v1825_v48 = vmax.f32 %v1318_v57, 0.0  ;;  %1230 = vmatmul.bf16.gmra.mxu2 %v4759_v61 }
 0x219   :  { %1359 = vmatmul.bf16.gmra.mxu3 %v4761_v30  ;;  %v1374_v39 = vpop.f32.mrf.mxu0 }
 0x21a   :  { %v1503_v49 = vpop.f32.mrf.mxu1  ;;  %v4767_v46 = vpack.c.bf16 %v1825_v48, %v1823_v38  ;;  %v1375_v57 = vadd.f32 %v1374_v39, %v4765_v51 }
 0x21b   :  { %v1191_v29 = vpop.f32.mrf.mxu2 }
 0x21c   :  { %v1192_v5 = vadd.f32 %v1191_v29, %v4485_v41  ;;  %v1320_v63 = vpop.f32.mrf.mxu3  ;;  %1413 = vmatmul.bf16.gmra.mxu0 %v4480_v37  ;;  %v1504_v6 = vadd.f32 %v1503_v49, %v1375_v57 }
 0x21d   :  { %1542 = vmatmul.bf16.gmra.mxu1 %v4482_v40 }
 0x21e   :  { %v1321_v1 = vadd.f32 %v1320_v63, %v1192_v5  ;;  %v1768_v7 = vmax.f32 %v1504_v6, 0.0 }
 0x220   :  { %v1827_v27 = vmax.f32 %v1321_v1, 0.0 }
 0x221   :  { %v1376_v4 = vpop.f32.mrf.mxu0 }
 0x222   :  { %v1377_v3 = vadd.f32 %v1376_v4, %v4765_v51  ;;  %v1505_v43 = vpop.f32.mrf.mxu1 }
 0x223   :  { %v1193_v2 = vpop.f32.mrf.mxu2 }
 0x224   :  { %v1506_v58 = vadd.f32 %v1505_v43, %v1377_v3  ;;  %v1194_v62 = vadd.f32 %v1193_v2, %v4485_v41  ;;  %v1322_v60 = vpop.f32.mrf.mxu3 }
 0x226   :  { %v1770_v38 = vmax.f32 %v1506_v58, 0.0  ;;  %v1323_v48 = vadd.f32 %v1322_v60, %v1194_v62 }
 0x228   :  { %v4775_v37 = vpack.c.bf16 %v1770_v38, %v1768_v7  ;;  %v1829_v40 = vmax.f32 %v1323_v48, 0.0  ;;  %2117 = vmatmul.bf16.vlgmr.msrb.gmra.mxu2 %v4508_v17 }
 0x229   :  { %v1379_v39 = vpop.f32.mrf.mxu0 }
 0x22a   :  { %v1508_v29 = vpop.f32.mrf.mxu1  ;;  %2246 = vmatmul.bf16.vlgmr.msrb.gmra.mxu3 %v4775_v37  ;;  %v4779_v49 = vpack.c.bf16 %v1829_v40, %v1827_v27  ;;  %v1380_v1 = vadd.f32 %v1379_v39, %v4765_v51  ;;  %v3936_v39 = vld [vmem:[%s5451_s7 + $0x30] sm:$0xff] }
 0x22b   :  { %v1196_v5 = vpop.f32.mrf.mxu2  ;;  %3046 = vmatpush.bf16.msra.mxu2 %v3936_v39 }
 0x22c   :  { %v1197_v63 = vadd.f32 %v1196_v5, %v4485_v41  ;;  %v1325_v57 = vpop.f32.mrf.mxu3  ;;  %1418 = vmatmul.bf16.gmra.mxu0 %v4499_v11  ;;  %v1509_v3 = vadd.f32 %v1508_v29, %v1380_v1 }
 0x22d   :  { %1547 = vmatmul.bf16.gmra.mxu1 %v4501_v12 }
 0x22e   :  { %v1326_v4 = vadd.f32 %v1325_v57, %v1197_v63  ;;  %v1772_v38 = vmax.f32 %v1509_v3, 0.0 }
 0x230   :  { %v1831_v40 = vmax.f32 %v1326_v4, 0.0 }
 0x231   :  { %v1381_v6 = vpop.f32.mrf.mxu0 }
 0x232   :  { %v1382_v43 = vadd.f32 %v1381_v6, %v4765_v51  ;;  %v1510_v2 = vpop.f32.mrf.mxu1 }
 0x233   :  { %v1198_v58 = vpop.f32.mrf.mxu2 }
 0x234   :  { %v1511_v62 = vadd.f32 %v1510_v2, %v1382_v43  ;;  %v1199_v60 = vadd.f32 %v1198_v58, %v4485_v41  ;;  %v1327_v7 = vpop.f32.mrf.mxu3  ;;  %v3944_v43 = vld [vmem:[%s5451_s7 + $0x70] sm:$0xff]  ;;  %v3674_v58 = vld [vmem:[#allocation6 + $0x38] sm:$0xf0] }
 0x235   :  { %3175 = vmatpush.bf16.msra.mxu3 %v3944_v43  ;;  %v3904_v2 = vld [vmem:[#allocation6 + $0x34] sm:$0xf] }
 0x236   :  { %v1774_v48 = vmax.f32 %v1511_v62, 0.0  ;;  %v1328_v27 = vadd.f32 %v1327_v7, %v1199_v60  ;;  %v3677_v60 = vor.u32 %v3904_v2, %v3674_v58  ;;  %v3920_v7 = vld [vmem:[#allocation6 + $0xb4] sm:$0xf] }
 0x238   :  { %v1833_v11 = vmax.f32 %v1328_v27, 0.0  ;;  %2122 = vmatmul.bf16.gmra.mxu2 %v4527_v0  ;;  %v4788_v12 = vpack.c.bf16 %v1774_v48, %v1772_v38  ;;  %v3738_v38 = vld [vmem:[#allocation6 + $0xb8] sm:$0xf0]  ;;  %2371 = vmatpush.bf16.msra.mxu0 %v3677_v60 }
 0x239   :  { %v1384_v29 = vpop.f32.mrf.mxu0 }
 0x23a   :  { %5468 = vst [vmem:[#allocation17_spill] sm:$0xff] %v4788_v12  ;;  %v1513_v5 = vpop.f32.mrf.mxu1  ;;  %2251 = vmatmul.bf16.gmra.mxu3 %v4788_v12  ;;  %v4794_v63 = vpack.c.bf16 %v1833_v11, %v1831_v40  ;;  %v1385_v6 = vadd.f32 %v1384_v29, %v4765_v51  ;;  %v3741_v40 = vor.u32 %v3920_v7, %v3738_v38 }
 0x23b   :  { %v1201_v57 = vpop.f32.mrf.mxu2 }
 0x23c   :  { %v1202_v1 = vadd.f32 %v1201_v57, %v4485_v41  ;;  %v1330_v4 = vpop.f32.mrf.mxu3  ;;  %1423 = vmatmul.bf16.gmra.mxu0 %v4518_v52  ;;  %v1514_v48 = vadd.f32 %v1513_v5, %v1385_v6  ;;  %2500 = vmatpush.bf16.msra.mxu1 %v3741_v40 }
 0x23d   :  { %1552 = vmatmul.bf16.gmra.mxu1 %v4520_v53 }
 0x23e   :  { %v1331_v3 = vadd.f32 %v1330_v4, %v1202_v1  ;;  %v1776_v57 = vmax.f32 %v1514_v48, 0.0 }
 0x240   :  { %v1835_v43 = vmax.f32 %v1331_v3, 0.0 }
 0x241   :  { %v1386_v62 = vpop.f32.mrf.mxu0 }
 0x242   :  { %v1387_v27 = vadd.f32 %v1386_v62, %v4765_v51  ;;  %v1515_v52 = vpop.f32.mrf.mxu1 }
 0x243   :  { %v1203_v53 = vpop.f32.mrf.mxu2 }
 0x244   :  { %v1516_v11 = vadd.f32 %v1515_v52, %v1387_v27  ;;  %v1204_v39 = vadd.f32 %v1203_v53, %v4485_v41  ;;  %v1332_v29 = vpop.f32.mrf.mxu3 }
 0x246   :  { %v1778_v1 = vmax.f32 %v1516_v11, 0.0  ;;  %v1333_v4 = vadd.f32 %v1332_v29, %v1204_v39 }
 0x248   :  { %v1837_v12 = vmax.f32 %v1333_v4, 0.0  ;;  %2127 = vmatmul.bf16.gmra.mxu2 %v4558_v59  ;;  %v4806_v2 = vpack.c.bf16 %v1778_v1, %v1776_v57 }
 0x249   :  { %v1389_v5 = vpop.f32.mrf.mxu0 }
 0x24a   :  { %v1518_v6 = vpop.f32.mrf.mxu1  ;;  %2256 = vmatmul.bf16.gmra.mxu3 %v4806_v2  ;;  %v4809_v58 = vpack.c.bf16 %v1837_v12, %v1835_v43  ;;  %v1390_v3 = vadd.f32 %v1389_v5, %v4765_v51 }
 0x24b   :  { %v1206_v62 = vpop.f32.mrf.mxu2 }
 0x24c   :  { %v1207_v60 = vadd.f32 %v1206_v62, %v4485_v41  ;;  %v1335_v7 = vpop.f32.mrf.mxu3  ;;  %1428 = vmatmul.bf16.gmra.mxu0 %v4549_v44  ;;  %v1519_v27 = vadd.f32 %v1518_v6, %v1390_v3 }
 0x24d   :  { %1557 = vmatmul.bf16.gmra.mxu1 %v4551_v47 }
 0x24e   :  { %v1336_v38 = vadd.f32 %v1335_v7, %v1207_v60  ;;  %v1780_v29 = vmax.f32 %v1519_v27, 0.0 }
 0x250   :  { %v1839_v4 = vmax.f32 %v1336_v38, 0.0 }
 0x251   :  { %v1391_v48 = vpop.f32.mrf.mxu0 }
 0x252   :  { %v1392_v52 = vadd.f32 %v1391_v48, %v4765_v51  ;;  %v1520_v40 = vpop.f32.mrf.mxu1 }
 0x253   :  { %v1208_v53 = vpop.f32.mrf.mxu2 }
 0x254   :  { %v1521_v11 = vadd.f32 %v1520_v40, %v1392_v52  ;;  %v1209_v12 = vadd.f32 %v1208_v53, %v4485_v41  ;;  %v1337_v39 = vpop.f32.mrf.mxu3 }
 0x256   :  { %v1782_v57 = vmax.f32 %v1521_v11, 0.0  ;;  %v1338_v1 = vadd.f32 %v1337_v39, %v1209_v12 }
 0x258   :  { %v1841_v44 = vmax.f32 %v1338_v1, 0.0  ;;  %2132 = vmatmul.bf16.gmra.mxu2 %v4577_v35  ;;  %v4818_v47 = vpack.c.bf16 %v1782_v57, %v1780_v29 }
 0x259   :  { %v1394_v43 = vpop.f32.mrf.mxu0 }
 0x25a   :  { %v1523_v5 = vpop.f32.mrf.mxu1  ;;  %2261 = vmatmul.bf16.gmra.mxu3 %v4818_v47  ;;  %v4821_v6 = vpack.c.bf16 %v1841_v44, %v1839_v4  ;;  %v1395_v3 = vadd.f32 %v1394_v43, %v4765_v51  ;;  %v3935_v44 = vld [vmem:[%s5451_s7 + $0x28] sm:$0xff] }
 0x25b   :  { %v1211_v62 = vpop.f32.mrf.mxu2  ;;  %3047 = vmatpush.bf16.msra.mxu2 %v3935_v44 }
 0x25c   :  { %v1212_v60 = vadd.f32 %v1211_v62, %v4485_v41  ;;  %v1340_v7 = vpop.f32.mrf.mxu3  ;;  %1433 = vmatmul.bf16.gmra.mxu0 %v4568_v24  ;;  %v1524_v27 = vadd.f32 %v1523_v5, %v1395_v3 }
 0x25d   :  { %1562 = vmatmul.bf16.gmra.mxu1 %v4570_v25 }
 0x25e   :  { %v1341_v38 = vadd.f32 %v1340_v7, %v1212_v60  ;;  %v1784_v29 = vmax.f32 %v1524_v27, 0.0  ;;  %v3943_v27 = vld [vmem:[%s5451_s7 + $0x68] sm:$0xff] }
 0x25f   :  { %3176 = vmatpush.bf16.msra.mxu3 %v3943_v27 }
 0x260   :  { %v1843_v4 = vmax.f32 %v1341_v38, 0.0 }
 0x261   :  { %v1396_v48 = vpop.f32.mrf.mxu0 }
 0x262   :  { %v1397_v52 = vadd.f32 %v1396_v48, %v4765_v51  ;;  %v1525_v40 = vpop.f32.mrf.mxu1 }
 0x263   :  { %v1213_v53 = vpop.f32.mrf.mxu2 }
 0x264   :  { %v1526_v11 = vadd.f32 %v1525_v40, %v1397_v52  ;;  %v1214_v12 = vadd.f32 %v1213_v53, %v4485_v41  ;;  %v1342_v39 = vpop.f32.mrf.mxu3  ;;  %v3902_v52 = vld [vmem:[#allocation6 + $0x24] sm:$0xf]  ;;  %v3666_v40 = vld [vmem:[#allocation6 + $0x28] sm:$0xf0] }
 0x266   :  { %v1786_v57 = vmax.f32 %v1526_v11, 0.0  ;;  %v1343_v1 = vadd.f32 %v1342_v39, %v1214_v12  ;;  %v3669_v11 = vor.u32 %v3902_v52, %v3666_v40  ;;  %v3918_v12 = vld [vmem:[#allocation6 + $0xa4] sm:$0xf]  ;;  %v3730_v39 = vld [vmem:[#allocation6 + $0xa8] sm:$0xf0] }
 0x268   :  { %v1845_v24 = vmax.f32 %v1343_v1, 0.0  ;;  %2137 = vmatmul.bf16.gmra.mxu2 %v4596_v32  ;;  %v4830_v25 = vpack.c.bf16 %v1786_v57, %v1784_v29  ;;  %v3733_v1 = vor.u32 %v3918_v12, %v3730_v39  ;;  %2372 = vmatpush.bf16.msra.mxu0 %v3669_v11 }
 0x269   :  { %v1399_v43 = vpop.f32.mrf.mxu0 }
 0x26a   :  { %v1528_v5 = vpop.f32.mrf.mxu1  ;;  %2266 = vmatmul.bf16.gmra.mxu3 %v4830_v25  ;;  %v4836_v62 = vpack.c.bf16 %v1845_v24, %v1843_v4  ;;  %v1400_v38 = vadd.f32 %v1399_v43, %v4765_v51  ;;  %2501 = vmatpush.bf16.msra.mxu1 %v3733_v1 }
 0x26b   :  { %v1216_v60 = vpop.f32.mrf.mxu2 }
 0x26c   :  { %v1217_v7 = vadd.f32 %v1216_v60, %v4485_v41  ;;  %v1345_v3 = vpop.f32.mrf.mxu3  ;;  %1438 = vmatmul.bf16.gmra.mxu0 %v4587_v15  ;;  %v1529_v29 = vadd.f32 %v1528_v5, %v1400_v38 }
 0x26d   :  { %1567 = vmatmul.bf16.gmra.mxu1 %v4589_v16 }
 0x26e   :  { %v1346_v48 = vadd.f32 %v1345_v3, %v1217_v7  ;;  %v1788_v43 = vmax.f32 %v1529_v29, 0.0 }
 0x270   :  { %v1847_v3 = vmax.f32 %v1346_v48, 0.0 }
 0x271   :  { %v1401_v53 = vpop.f32.mrf.mxu0 }
 0x272   :  { %v1402_v57 = vadd.f32 %v1401_v53, %v4765_v51  ;;  %v1530_v15 = vpop.f32.mrf.mxu1 }
 0x273   :  { %v1218_v16 = vpop.f32.mrf.mxu2 }
 0x274   :  { %v1531_v4 = vadd.f32 %v1530_v15, %v1402_v57  ;;  %v1219_v24 = vadd.f32 %v1218_v16, %v4485_v41  ;;  %v1347_v44 = vpop.f32.mrf.mxu3 }
 0x276   :  { %v1790_v60 = vmax.f32 %v1531_v4, 0.0  ;;  %v1348_v7 = vadd.f32 %v1347_v44, %v1219_v24 }
 0x278   :  { %v1849_v27 = vmax.f32 %v1348_v7, 0.0  ;;  %2142 = vmatmul.bf16.gmra.mxu2 %v4615_v56  ;;  %v4848_v52 = vpack.c.bf16 %v1790_v60, %v1788_v43 }
 0x279   :  { %v1404_v5 = vpop.f32.mrf.mxu0 }
 0x27a   :  { %v1533_v38 = vpop.f32.mrf.mxu1  ;;  %2271 = vmatmul.bf16.gmra.mxu3 %v4848_v52  ;;  %v4851_v40 = vpack.c.bf16 %v1849_v27, %v1847_v3  ;;  %v1405_v48 = vadd.f32 %v1404_v5, %v4765_v51 }
 0x27b   :  { %v1221_v53 = vpop.f32.mrf.mxu2 }
 0x27c   :  { %v1222_v11 = vadd.f32 %v1221_v53, %v4485_v41  ;;  %v1350_v12 = vpop.f32.mrf.mxu3  ;;  %1443 = vmatmul.bf16.gmra.mxu0 %v4606_v31  ;;  %v1534_v57 = vadd.f32 %v1533_v38, %v1405_v48 }
 0x27d   :  { %1572 = vmatmul.bf16.gmra.mxu1 %v4608_v33 }
 0x27e   :  { %v1351_v39 = vadd.f32 %v1350_v12, %v1222_v11  ;;  %v1792_v43 = vmax.f32 %v1534_v57, 0.0 }
 0x280   :  { %v1851_v3 = vmax.f32 %v1351_v39, 0.0 }
 0x281   :  { %v1406_v29 = vpop.f32.mrf.mxu0 }
 0x282   :  { %v1407_v15 = vadd.f32 %v1406_v29, %v4765_v51  ;;  %v1535_v1 = vpop.f32.mrf.mxu1 }
 0x283   :  { %v1223_v16 = vpop.f32.mrf.mxu2 }
 0x284   :  { %v1536_v4 = vadd.f32 %v1535_v1, %v1407_v15  ;;  %v1224_v24 = vadd.f32 %v1223_v16, %v4485_v41  ;;  %v1352_v44 = vpop.f32.mrf.mxu3 }
 0x286   :  { %v1794_v60 = vmax.f32 %v1536_v4, 0.0  ;;  %v1353_v7 = vadd.f32 %v1352_v44, %v1224_v24 }
 0x288   :  { %v1853_v31 = vmax.f32 %v1353_v7, 0.0  ;;  %2147 = vmatmul.bf16.gmra.mxu2 %v4631_v55  ;;  %v4860_v33 = vpack.c.bf16 %v1794_v60, %v1792_v43 }
 0x289   :  { %v1409_v27 = vpop.f32.mrf.mxu0 }
 0x28a   :  { %v1538_v5 = vpop.f32.mrf.mxu1  ;;  %2276 = vmatmul.bf16.gmra.mxu3 %v4860_v33  ;;  %v4863_v38 = vpack.c.bf16 %v1853_v31, %v1851_v3  ;;  %v1410_v48 = vadd.f32 %v1409_v27, %v4765_v51 }
 0x28b   :  { %v1226_v53 = vpop.f32.mrf.mxu2 }
 0x28c   :  { %v1227_v11 = vadd.f32 %v1226_v53, %v4485_v41  ;;  %v1355_v12 = vpop.f32.mrf.mxu3  ;;  %1448 = vmatmul.bf16.gmra.mxu0 %v4625_v23  ;;  %v1539_v57 = vadd.f32 %v1538_v5, %v1410_v48  ;;  %v3934_v5 = vld [vmem:[%s5451_s7 + $0x20] sm:$0xff] }
 0x28d   :  { %1577 = vmatmul.bf16.gmra.mxu1 %v4627_v26  ;;  %3048 = vmatpush.bf16.msra.mxu2 %v3934_v5  ;;  %v4892_v5 = vld [vmem:[%s5450_s6] sm:$0x3] }
 0x28e   :  { %v1356_v39 = vadd.f32 %v1355_v12, %v1227_v11  ;;  %v1796_v43 = vmax.f32 %v1539_v57, 0.0  ;;  %v3942_v57 = vld [vmem:[%s5451_s7 + $0x60] sm:$0xff] }
 0x28f   :  { %3177 = vmatpush.bf16.msra.mxu3 %v3942_v57 }
 0x290   :  { %v1855_v3 = vmax.f32 %v1356_v39, 0.0 }
 0x291   :  { %v1411_v29 = vpop.f32.mrf.mxu0 }
 0x292   :  { %v1412_v15 = vadd.f32 %v1411_v29, %v4765_v51  ;;  %v1540_v1 = vpop.f32.mrf.mxu1 }
 0x293   :  { %v1228_v16 = vpop.f32.mrf.mxu2 }
 0x294   :  { %v1541_v4 = vadd.f32 %v1540_v1, %v1412_v15  ;;  %v1229_v24 = vadd.f32 %v1228_v16, %v4485_v41  ;;  %v1357_v44 = vpop.f32.mrf.mxu3  ;;  %v3900_v15 = vld [vmem:[#allocation6 + $0x14] sm:$0xf]  ;;  %v3658_v1 = vld [vmem:[#allocation6 + $0x18] sm:$0xf0] }
 0x295   :  { %v3661_v16 = vor.u32 %v3900_v15, %v3658_v1 }
 0x296   :  { %v1798_v60 = vmax.f32 %v1541_v4, 0.0  ;;  %v1358_v7 = vadd.f32 %v1357_v44, %v1229_v24  ;;  %v3916_v4 = vld [vmem:[#allocation6 + $0x94] sm:$0xf]  ;;  %v3722_v24 = vld [vmem:[#allocation6 + $0x98] sm:$0xf0] }
 0x297   :  { %2373 = vmatpush.bf16.msra.mxu0 %v3661_v16 }
 0x298   :  { %v1857_v23 = vmax.f32 %v1358_v7, 0.0  ;;  %2152 = vmatmul.bf16.gmra.mxu2 %v4647_v54  ;;  %v4872_v26 = vpack.c.bf16 %v1798_v60, %v1796_v43  ;;  %v3725_v43 = vor.u32 %v3916_v4, %v3722_v24 }
 0x299   :  { %v1414_v31 = vpop.f32.mrf.mxu0 }
 0x29a   :  { %v1543_v27 = vpop.f32.mrf.mxu1  ;;  %2281 = vmatmul.bf16.gmra.mxu3 %v4872_v26  ;;  %v4878_v53 = vpack.c.bf16 %v1857_v23, %v1855_v3  ;;  %v1415_v39 = vadd.f32 %v1414_v31, %v4765_v51  ;;  %2502 = vmatpush.bf16.msra.mxu1 %v3725_v43 }
 0x29b   :  { %v1231_v11 = vpop.f32.mrf.mxu2 }
 0x29c   :  { %v1232_v12 = vadd.f32 %v1231_v11, %v4485_v41  ;;  %v1360_v48 = vpop.f32.mrf.mxu3  ;;  %1453 = vmatmul.bf16.gmra.mxu0 %v4641_v21  ;;  %v1544_v21 = vadd.f32 %v1543_v27, %v1415_v39  ;;  %v4898_v39 = vperm.slane %v4892_v5, 0 }
 0x29d   :  { %1582 = vmatmul.bf16.gmra.mxu1 %v4643_v22 }
 0x29e   :  { %v1361_v29 = vadd.f32 %v1360_v48, %v1232_v12  ;;  %v1800_v11 = vmax.f32 %v1544_v21, 0.0 }
 0x2a0   :  { %v1859_v57 = vmax.f32 %v1361_v29, 0.0 }
 0x2a1   :  { %v1416_v44 = vpop.f32.mrf.mxu0 }
 0x2a2   :  { %v1417_v60 = vadd.f32 %v1416_v44, %v4765_v51  ;;  %v1545_v22 = vpop.f32.mrf.mxu1 }
 0x2a3   :  { %v1233_v7 = vpop.f32.mrf.mxu2 }
 0x2a4   :  { %v1546_v3 = vadd.f32 %v1545_v22, %v1417_v60  ;;  %v1234_v23 = vadd.f32 %v1233_v7, %v4485_v41  ;;  %v1362_v31 = vpop.f32.mrf.mxu3 }
 0x2a6   :  { %v1802_v12 = vmax.f32 %v1546_v3, 0.0  ;;  %v1363_v48 = vadd.f32 %v1362_v31, %v1234_v23 }
 0x2a8   :  { %v1861_v15 = vmax.f32 %v1363_v48, 0.0  ;;  %2157 = vmatmul.bf16.gmra.mxu2 %v4663_v20  ;;  %v4895_v27 = vpack.c.bf16 %v1802_v12, %v1800_v11 }
 0x2a9   :  { %v1419_v1 = vpop.f32.mrf.mxu0 }
 0x2aa   :  { %v1548_v41 = vpop.f32.mrf.mxu1  ;;  %2286 = vmatmul.bf16.gmra.mxu3 %v4895_v27  ;;  %v4901_v16 = vpack.c.bf16 %v1861_v15, %v1859_v57  ;;  %v1420_v44 = vadd.f32 %v1419_v1, %v4765_v51 }
 0x2ab   :  { %v2118_v4 = vpop.f32.mrf.mxu2 }
 0x2ac   :  { %v2119_v24 = vadd.f32 %v2118_v4, %v4898_v39  ;;  %1458 = vmatmul.bf16.gmra.mxu0 %v4657_v8  ;;  %v1549_v60 = vadd.f32 %v1548_v41, %v1420_v44 }
 0x2ad   :  { %1587 = vmatmul.bf16.gmra.mxu1 %v4659_v10  ;;  %v2247_v29 = vpop.f32.mrf.mxu3 }
 0x2ae   :  { %v2248_v43 = vadd.f32 %v2247_v29, %v2119_v24  ;;  %v1804_v12 = vmax.f32 %v1549_v60, 0.0 }
 0x2b0   :  { %v2769_v8 = vmax.f32 %v2248_v43, 0.0 }
 0x2b1   :  { %v1421_v21 = vpop.f32.mrf.mxu0 }
 0x2b2   :  { %v1422_v22 = vadd.f32 %v1421_v21, %v4765_v51  ;;  %v1550_v7 = vpop.f32.mrf.mxu1 }
 0x2b3   :  { %v2120_v3 = vpop.f32.mrf.mxu2 }
 0x2b4   :  { %v1551_v23 = vadd.f32 %v1550_v7, %v1422_v22  ;;  %v2121_v31 = vadd.f32 %v2120_v3, %v4898_v39 }
 0x2b5   :  { %v2249_v11 = vpop.f32.mrf.mxu3 }
 0x2b6   :  { %v1806_v48 = vmax.f32 %v1551_v23, 0.0  ;;  %v2250_v57 = vadd.f32 %v2249_v11, %v2121_v31 }
 0x2b8   :  { %v2771_v15 = vmax.f32 %v2250_v57, 0.0  ;;  %2162 = vmatmul.bf16.gmra.mxu2 %v4679_v19  ;;  %v4910_v10 = vpack.c.bf16 %v1806_v48, %v1804_v12 }
 0x2b9   :  { %v1424_v1 = vpop.f32.mrf.mxu0 }
 0x2ba   :  { %v4912_v4 = vpack.c.bf16 %v2771_v15, %v2769_v8  ;;  %v1553_v41 = vpop.f32.mrf.mxu1  ;;  %2291 = vmatmul.bf16.gmra.mxu3 %v4910_v10  ;;  %v1425_v43 = vadd.f32 %v1424_v1, %v4765_v51  ;;  %v3933_v1 = vld [vmem:[%s5451_s7 + $0x18] sm:$0xff] }
 0x2bb   :  { %v2123_v24 = vpop.f32.mrf.mxu2  ;;  %3049 = vmatpush.bf16.msra.mxu2 %v3933_v1 }
 0x2bc   :  { %v2124_v29 = vadd.f32 %v2123_v24, %v4898_v39  ;;  %1463 = vmatmul.bf16.gmra.mxu0 %v4673_v14  ;;  %v1554_v22 = vadd.f32 %v1553_v41, %v1425_v43 }
 0x2bd   :  { %1592 = vmatmul.bf16.gmra.mxu1 %v4675_v18  ;;  %v2252_v44 = vpop.f32.mrf.mxu3 }
 0x2be   :  { %v2253_v21 = vadd.f32 %v2252_v44, %v2124_v29  ;;  %v1808_v48 = vmax.f32 %v1554_v22, 0.0 }
 0x2c0   :  { %v2773_v14 = vmax.f32 %v2253_v21, 0.0  ;;  %v5470_v21 = vld [vmem:[#allocation12_spill] sm:$0xff] }
 0x2c1   :  { %v1426_v60 = vpop.f32.mrf.mxu0 }
 0x2c2   :  { %v1427_v7 = vadd.f32 %v1426_v60, %v4765_v51  ;;  %v1555_v3 = vpop.f32.mrf.mxu1  ;;  %v5471_v60 = vld [vmem:[#allocation13_spill] sm:$0xff] }
 0x2c3   :  { %v2125_v23 = vpop.f32.mrf.mxu2 }
 0x2c4   :  { %v1556_v31 = vadd.f32 %v1555_v3, %v1427_v7  ;;  %v2126_v11 = vadd.f32 %v2125_v23, %v4898_v39  ;;  %v3941_v23 = vld [vmem:[%s5451_s7 + $0x58] sm:$0xff] }
 0x2c5   :  { %v2254_v12 = vpop.f32.mrf.mxu3  ;;  %3178 = vmatpush.bf16.msra.mxu3 %v3941_v23 }
 0x2c6   :  { %v1810_v57 = vmax.f32 %v1556_v31, 0.0  ;;  %v2255_v8 = vadd.f32 %v2254_v12, %v2126_v11  ;;  %v3898_v31 = vld [vmem:[#allocation6 + $0x4] sm:$0xf]  ;;  %v3650_v11 = vld [vmem:[#allocation6 + $0x8] sm:$0xf0] }
 0x2c7   :  { %v3653_v12 = vor.u32 %v3898_v31, %v3650_v11 }
 0x2c8   :  { %v2775_v15 = vmax.f32 %v2255_v8, 0.0  ;;  %2167 = vmatmul.bf16.gmra.mxu2 %v4695_v42  ;;  %v4922_v18 = vpack.c.bf16 %v1810_v57, %v1808_v48  ;;  %v3914_v48 = vld [vmem:[#allocation6 + $0x84] sm:$0xf]  ;;  %v3714_v57 = vld [vmem:[#allocation6 + $0x88] sm:$0xf0] }
 0x2c9   :  { %v1429_v41 = vpop.f32.mrf.mxu0  ;;  %2374 = vmatpush.bf16.msra.mxu0 %v3653_v12 }
 0x2ca   :  { %5469 = vst [vmem:[#allocation18_spill] sm:$0xff] %v4922_v18  ;;  %v1558_v24 = vpop.f32.mrf.mxu1  ;;  %2296 = vmatmul.bf16.gmra.mxu3 %v4922_v18  ;;  %v4928_v29 = vpack.c.bf16 %v2775_v15, %v2773_v14  ;;  %v1430_v7 = vadd.f32 %v1429_v41, %v4765_v51  ;;  %v3717_v14 = vor.u32 %v3914_v48, %v3714_v57 }
 0x2cb   :  { %v2128_v44 = vpop.f32.mrf.mxu2 }
 0x2cc   :  { %v2129_v43 = vadd.f32 %v2128_v44, %v4898_v39  ;;  %1468 = vmatmul.bf16.gmra.mxu0 %v5470_v21  ;;  %v1559_v15 = vadd.f32 %v1558_v24, %v1430_v7  ;;  %2503 = vmatpush.bf16.msra.mxu1 %v3717_v14 }
 0x2cd   :  { %1597 = vmatmul.bf16.gmra.mxu1 %v5471_v60  ;;  %v2257_v22 = vpop.f32.mrf.mxu3 }
 0x2ce   :  { %v2258_v3 = vadd.f32 %v2257_v22, %v2129_v43  ;;  %v1812_v22 = vmax.f32 %v1559_v15, 0.0 }
 0x2d0   :  { %v2777_v31 = vmax.f32 %v2258_v3, 0.0 }
 0x2d1   :  { %v1431_v8 = vpop.f32.mrf.mxu0 }
 0x2d2   :  { %v1432_v1 = vadd.f32 %v1431_v8, %v4765_v51  ;;  %v1560_v44 = vpop.f32.mrf.mxu1 }
 0x2d3   :  { %v2130_v21 = vpop.f32.mrf.mxu2 }
 0x2d4   :  { %v1561_v41 = vadd.f32 %v1560_v44, %v1432_v1  ;;  %v2131_v43 = vadd.f32 %v2130_v21, %v4898_v39 }
 0x2d5   :  { %v2259_v60 = vpop.f32.mrf.mxu3 }
 0x2d6   :  { %v1814_v18 = vmax.f32 %v1561_v41, 0.0  ;;  %v2260_v42 = vadd.f32 %v2259_v60, %v2131_v43 }
 0x2d8   :  { %v2779_v23 = vmax.f32 %v2260_v42, 0.0  ;;  %2172 = vmatmul.bf16.gmra.mxu2 %v4711_v36  ;;  %v4940_v11 = vpack.c.bf16 %v1814_v18, %v1812_v22 }
 0x2d9   :  { %v1434_v12 = vpop.f32.mrf.mxu0 }
 0x2da   :  { %v1563_v24 = vpop.f32.mrf.mxu1  ;;  %2301 = vmatmul.bf16.gmra.mxu3 %v4940_v11  ;;  %v4943_v7 = vpack.c.bf16 %v2779_v23, %v2777_v31  ;;  %v1435_v42 = vadd.f32 %v1434_v12, %v4765_v51 }
 0x2db   :  { %v2133_v48 = vpop.f32.mrf.mxu2 }
 0x2dc   :  { %v2134_v57 = vadd.f32 %v2133_v48, %v4898_v39  ;;  %1473 = vmatmul.bf16.gmra.mxu0 %v4705_v45  ;;  %v1564_v18 = vadd.f32 %v1563_v24, %v1435_v42 }
 0x2dd   :  { %1602 = vmatmul.bf16.gmra.mxu1 %v4707_v50  ;;  %v2262_v8 = vpop.f32.mrf.mxu3 }
 0x2de   :  { %v2263_v3 = vadd.f32 %v2262_v8, %v2134_v57  ;;  %v1816_v60 = vmax.f32 %v1564_v18, 0.0 }
 0x2e0   :  { %v2781_v45 = vmax.f32 %v2263_v3, 0.0 }
 0x2e1   :  { %v1436_v14 = vpop.f32.mrf.mxu0 }
 0x2e2   :  { %v1437_v15 = vadd.f32 %v1436_v14, %v4765_v51  ;;  %v1565_v1 = vpop.f32.mrf.mxu1 }
 0x2e3   :  { %v2135_v44 = vpop.f32.mrf.mxu2 }
 0x2e4   :  { %v1566_v21 = vadd.f32 %v1565_v1, %v1437_v15  ;;  %v2136_v41 = vadd.f32 %v2135_v44, %v4898_v39 }
 0x2e5   :  { %v2264_v43 = vpop.f32.mrf.mxu3 }
 0x2e6   :  { %v1818_v22 = vmax.f32 %v1566_v21, 0.0  ;;  %v2265_v31 = vadd.f32 %v2264_v43, %v2136_v41 }
 0x2e8   :  { %v2783_v23 = vmax.f32 %v2265_v31, 0.0  ;;  %2177 = vmatmul.bf16.gmra.mxu2 %v4727_v28  ;;  %v4952_v50 = vpack.c.bf16 %v1818_v22, %v1816_v60 }
 0x2e9   :  { %v1439_v12 = vpop.f32.mrf.mxu0 }
 0x2ea   :  { %v1568_v48 = vpop.f32.mrf.mxu1  ;;  %2306 = vmatmul.bf16.gmra.mxu3 %v4952_v50  ;;  %v4955_v24 = vpack.c.bf16 %v2783_v23, %v2781_v45  ;;  %v1440_v3 = vadd.f32 %v1439_v12, %v4765_v51  ;;  %v3932_v12 = vld [vmem:[%s5451_s7 + $0x10] sm:$0xff] }
 0x2eb   :  { %v2138_v57 = vpop.f32.mrf.mxu2  ;;  %3050 = vmatpush.bf16.msra.mxu2 %v3932_v12 }
 0x2ec   :  { %v2139_v8 = vadd.f32 %v2138_v57, %v4898_v39  ;;  %1478 = vmatmul.bf16.gmra.mxu0 %v4721_v34  ;;  %v1569_v15 = vadd.f32 %v1568_v48, %v1440_v3 }
 0x2ed   :  { %1607 = vmatmul.bf16.gmra.mxu1 %v4723_v9  ;;  %v2267_v42 = vpop.f32.mrf.mxu3 }
 0x2ee   :  { %v2268_v14 = vadd.f32 %v2267_v42, %v2139_v8  ;;  %v1820_v22 = vmax.f32 %v1569_v15, 0.0 }
 0x2f0   :  { %v2785_v34 = vmax.f32 %v2268_v14, 0.0  ;;  %v5472_v14 = vld [vmem:[#allocation15_spill] sm:$0xff] }
 0x2f1   :  { %v1441_v18 = vpop.f32.mrf.mxu0 }
 0x2f2   :  { %v1442_v1 = vadd.f32 %v1441_v18, %v4765_v51  ;;  %v1570_v44 = vpop.f32.mrf.mxu1  ;;  %v5473_v18 = vld [vmem:[#allocation16_spill] sm:$0xff] }
 0x2f3   :  { %v2140_v21 = vpop.f32.mrf.mxu2 }
 0x2f4   :  { %v1571_v41 = vadd.f32 %v1570_v44, %v1442_v1  ;;  %v2141_v43 = vadd.f32 %v2140_v21, %v4898_v39  ;;  %v3940_v21 = vld [vmem:[%s5451_s7 + $0x50] sm:$0xff] }
 0x2f5   :  { %v2269_v60 = vpop.f32.mrf.mxu3  ;;  %3179 = vmatpush.bf16.msra.mxu3 %v3940_v21 }
 0x2f6   :  { %v1822_v31 = vmax.f32 %v1571_v41, 0.0  ;;  %v2270_v45 = vadd.f32 %v2269_v60, %v2141_v43 }
 0x2f8   :  { %v2787_v23 = vmax.f32 %v2270_v45, 0.0  ;;  %2182 = vmatmul.bf16.gmra.mxu2 %v4746_v13  ;;  %v4964_v9 = vpack.c.bf16 %v1822_v31, %v1820_v22 }
 0x2f9   :  { %v1444_v48 = vpop.f32.mrf.mxu0 }
 0x2fa   :  { %v1573_v57 = vpop.f32.mrf.mxu1  ;;  %2311 = vmatmul.bf16.gmra.mxu3 %v4964_v9  ;;  %v4970_v8 = vpack.c.bf16 %v2787_v23, %v2785_v34  ;;  %v1445_v1 = vadd.f32 %v1444_v48, %v4765_v51 }
 0x2fb   :  { %v2143_v42 = vpop.f32.mrf.mxu2 }
 0x2fc   :  { %v2144_v3 = vadd.f32 %v2143_v42, %v4898_v39  ;;  %1483 = vmatmul.bf16.gmra.mxu0 %v5472_v14  ;;  %v1574_v43 = vadd.f32 %v1573_v57, %v1445_v1 }
 0x2fd   :  { %1612 = vmatmul.bf16.gmra.mxu1 %v5473_v18  ;;  %v2272_v15 = vpop.f32.mrf.mxu3 }
 0x2fe   :  { %v2273_v44 = vadd.f32 %v2272_v15, %v2144_v3  ;;  %v1824_v12 = vmax.f32 %v1574_v43, 0.0 }
 0x300   :  { %v2789_v48 = vmax.f32 %v2273_v44, 0.0 }
 0x301   :  { %v1446_v41 = vpop.f32.mrf.mxu0 }
 0x302   :  { %v1447_v60 = vadd.f32 %v1446_v41, %v4765_v51  ;;  %v1575_v22 = vpop.f32.mrf.mxu1 }
 0x303   :  { %v2145_v31 = vpop.f32.mrf.mxu2 }
 0x304   :  { %v1576_v45 = vadd.f32 %v1575_v22, %v1447_v60  ;;  %v2146_v34 = vadd.f32 %v2145_v31, %v4898_v39 }
 0x305   :  { %v2274_v23 = vpop.f32.mrf.mxu3 }
 0x306   :  { %v1826_v42 = vmax.f32 %v1576_v45, 0.0  ;;  %v2275_v14 = vadd.f32 %v2274_v23, %v2146_v34 }
 0x308   :  { %v2791_v3 = vmax.f32 %v2275_v14, 0.0  ;;  %2187 = vmatmul.bf16.gmra.mxu2 %v4767_v46  ;;  %v4982_v18 = vpack.c.bf16 %v1826_v42, %v1824_v12 }
 0x309   :  { %v1449_v15 = vpop.f32.mrf.mxu0 }
 0x30a   :  { %5474 = vst [vmem:[#allocation12_spill] sm:$0xff] %v4982_v18  ;;  %v1578_v21 = vpop.f32.mrf.mxu1  ;;  %2316 = vmatmul.bf16.gmra.mxu3 %v4982_v18  ;;  %v4985_v57 = vpack.c.bf16 %v2791_v3, %v2789_v48  ;;  %v1450_v44 = vadd.f32 %v1449_v15, %v4765_v51 }
 0x30b   :  { %v2148_v1 = vpop.f32.mrf.mxu2 }
 0x30c   :  { %v2149_v41 = vadd.f32 %v2148_v1, %v4898_v39  ;;  %1488 = vmatmul.bf16.gmra.mxu0 %v4759_v61  ;;  %v1579_v31 = vadd.f32 %v1578_v21, %v1450_v44 }
 0x30d   :  { %1617 = vmatmul.bf16.gmra.mxu1 %v4761_v30  ;;  %v2277_v43 = vpop.f32.mrf.mxu3 }
 0x30e   :  { %v2278_v60 = vadd.f32 %v2277_v43, %v2149_v41  ;;  %v1828_v48 = vmax.f32 %v1579_v31, 0.0 }
 0x310   :  { %v2793_v61 = vmax.f32 %v2278_v60, 0.0 }
 0x311   :  { %v1451_v22 = vpop.f32.mrf.mxu0 }
 0x312   :  { %v1452_v45 = vadd.f32 %v1451_v22, %v4765_v51  ;;  %v1580_v34 = vpop.f32.mrf.mxu1 }
 0x313   :  { %v2150_v23 = vpop.f32.mrf.mxu2 }
 0x314   :  { %v1581_v12 = vadd.f32 %v1580_v34, %v1452_v45  ;;  %v2151_v42 = vadd.f32 %v2150_v23, %v4898_v39 }
 0x315   :  { %v2279_v14 = vpop.f32.mrf.mxu3 }
 0x316   :  { %v1830_v3 = vmax.f32 %v1581_v12, 0.0  ;;  %v2280_v1 = vadd.f32 %v2279_v14, %v2151_v42 }
 0x318   :  { %v2795_v18 = vmax.f32 %v2280_v1, 0.0  ;;  %2192 = vmatmul.bf16.gmra.mxu2 %v4779_v49  ;;  %v4994_v30 = vpack.c.bf16 %v1830_v3, %v1828_v48 }
 0x319   :  { %v1454_v15 = vpop.f32.mrf.mxu0 }
 0x31a   :  { %v1583_v41 = vpop.f32.mrf.mxu1  ;;  %2321 = vmatmul.bf16.gmra.mxu3 %v4994_v30  ;;  %v4997_v21 = vpack.c.bf16 %v2795_v18, %v2793_v61  ;;  %v1455_v60 = vadd.f32 %v1454_v15, %v4765_v51  ;;  %v3931_v15 = vld [vmem:[%s5451_s7 + $0x8] sm:$0xff] }
 0x31b   :  { %v2153_v43 = vpop.f32.mrf.mxu2  ;;  %3051 = vmatpush.bf16.msra.mxu2 %v3931_v15 }
 0x31c   :  { %v2154_v44 = vadd.f32 %v2153_v43, %v4898_v39  ;;  %2375 = vmatmul.bf16.vlgmr.msra.gmra.mxu0 %v4508_v17  ;;  %v1584_v34 = vadd.f32 %v1583_v41, %v1455_v60 }
 0x31d   :  { %2504 = vmatmul.bf16.vlgmr.msra.gmra.mxu1 %v4775_v37  ;;  %v2282_v22 = vpop.f32.mrf.mxu3 }
 0x31e   :  { %v2283_v31 = vadd.f32 %v2282_v22, %v2154_v44  ;;  %v1832_v3 = vmax.f32 %v1584_v34, 0.0 }
 0x320   :  { %v2797_v17 = vmax.f32 %v2283_v31, 0.0  ;;  %v5475_v31 = vld [vmem:[#allocation17_spill] sm:$0xff] }
 0x321   :  { %v1456_v45 = vpop.f32.mrf.mxu0 }
 0x322   :  { %v1457_v23 = vadd.f32 %v1456_v45, %v4765_v51  ;;  %v1585_v12 = vpop.f32.mrf.mxu1 }
 0x323   :  { %v2155_v42 = vpop.f32.mrf.mxu2 }
 0x324   :  { %v1586_v14 = vadd.f32 %v1585_v12, %v1457_v23  ;;  %v2156_v18 = vadd.f32 %v2155_v42, %v4898_v39  ;;  %v3939_v42 = vld [vmem:[%s5451_s7 + $0x48] sm:$0xff] }
 0x325   :  { %v2284_v48 = vpop.f32.mrf.mxu3  ;;  %3180 = vmatpush.bf16.msra.mxu3 %v3939_v42 }
 0x326   :  { %v1834_v1 = vmax.f32 %v1586_v14, 0.0  ;;  %v2285_v61 = vadd.f32 %v2284_v48, %v2156_v18 }
 0x328   :  { %v2799_v43 = vmax.f32 %v2285_v61, 0.0  ;;  %2197 = vmatmul.bf16.gmra.mxu2 %v4794_v63  ;;  %v5006_v37 = vpack.c.bf16 %v1834_v1, %v1832_v3 }
 0x329   :  { %v1459_v41 = vpop.f32.mrf.mxu0 }
 0x32a   :  { %v1588_v44 = vpop.f32.mrf.mxu1  ;;  %2326 = vmatmul.bf16.gmra.mxu3 %v5006_v37  ;;  %v5012_v22 = vpack.c.bf16 %v2799_v43, %v2797_v17  ;;  %v1460_v23 = vadd.f32 %v1459_v41, %v4765_v51 }
 0x32b   :  { %v2158_v60 = vpop.f32.mrf.mxu2 }
 0x32c   :  { %v2159_v45 = vadd.f32 %v2158_v60, %v4898_v39  ;;  %2380 = vmatmul.bf16.gmra.mxu0 %v4527_v0  ;;  %v1589_v18 = vadd.f32 %v1588_v44, %v1460_v23 }
 0x32d   :  { %2509 = vmatmul.bf16.gmra.mxu1 %v5475_v31  ;;  %v2287_v34 = vpop.f32.mrf.mxu3 }
 0x32e   :  { %v2288_v12 = vadd.f32 %v2287_v34, %v2159_v45  ;;  %v1836_v43 = vmax.f32 %v1589_v18, 0.0 }
 0x330   :  { %v2801_v41 = vmax.f32 %v2288_v12, 0.0 }
 0x331   :  { %v1461_v14 = vpop.f32.mrf.mxu0 }
 0x332   :  { %v1462_v48 = vadd.f32 %v1461_v14, %v4765_v51  ;;  %v1590_v3 = vpop.f32.mrf.mxu1 }
 0x333   :  { %v2160_v1 = vpop.f32.mrf.mxu2 }
 0x334   :  { %v1591_v61 = vadd.f32 %v1590_v3, %v1462_v48  ;;  %v2161_v0 = vadd.f32 %v2160_v1, %v4898_v39 }
 0x335   :  { %v2289_v17 = vpop.f32.mrf.mxu3 }
 0x336   :  { %v1838_v15 = vmax.f32 %v1591_v61, 0.0  ;;  %v2290_v60 = vadd.f32 %v2289_v17, %v2161_v0 }
 0x338   :  { %v2803_v45 = vmax.f32 %v2290_v60, 0.0  ;;  %2202 = vmatmul.bf16.gmra.mxu2 %v4809_v58  ;;  %v5024_v31 = vpack.c.bf16 %v1838_v15, %v1836_v43 }
 0x339   :  { %v1464_v34 = vpop.f32.mrf.mxu0 }
 0x33a   :  { %5476 = vst [vmem:[#allocation13_spill] sm:$0xff] %v5024_v31  ;;  %v1593_v42 = vpop.f32.mrf.mxu1  ;;  %2331 = vmatmul.bf16.gmra.mxu3 %v5024_v31  ;;  %v5027_v44 = vpack.c.bf16 %v2803_v45, %v2801_v41  ;;  %v1465_v12 = vadd.f32 %v1464_v34, %v4765_v51 }
 0x33b   :  { %v2163_v23 = vpop.f32.mrf.mxu2 }
 0x33c   :  { %v2164_v14 = vadd.f32 %v2163_v23, %v4898_v39  ;;  %2385 = vmatmul.bf16.gmra.mxu0 %v4558_v59  ;;  %v1594_v1 = vadd.f32 %v1593_v42, %v1465_v12 }
 0x33d   :  { %2514 = vmatmul.bf16.gmra.mxu1 %v4806_v2  ;;  %v2292_v18 = vpop.f32.mrf.mxu3 }
 0x33e   :  { %v2293_v48 = vadd.f32 %v2292_v18, %v2164_v14  ;;  %v1840_v41 = vmax.f32 %v1594_v1, 0.0 }
 0x340   :  { %v2805_v59 = vmax.f32 %v2293_v48, 0.0 }
 0x341   :  { %v1466_v3 = vpop.f32.mrf.mxu0 }
 0x342   :  { %v1467_v61 = vadd.f32 %v1466_v3, %v4765_v51  ;;  %v1595_v0 = vpop.f32.mrf.mxu1 }
 0x343   :  { %v2165_v17 = vpop.f32.mrf.mxu2 }
 0x344   :  { %v1596_v43 = vadd.f32 %v1595_v0, %v1467_v61  ;;  %v2166_v15 = vadd.f32 %v2165_v17, %v4898_v39 }
 0x345   :  { %v2294_v60 = vpop.f32.mrf.mxu3 }
 0x346   :  { %v1842_v45 = vmax.f32 %v1596_v43, 0.0  ;;  %v2295_v23 = vadd.f32 %v2294_v60, %v2166_v15 }
 0x348   :  { %v2807_v31 = vmax.f32 %v2295_v23, 0.0  ;;  %2207 = vmatmul.bf16.gmra.mxu2 %v4821_v6  ;;  %v5036_v2 = vpack.c.bf16 %v1842_v45, %v1840_v41 }
 0x349   :  { %v1469_v34 = vpop.f32.mrf.mxu0 }
 0x34a   :  { %v1598_v14 = vpop.f32.mrf.mxu1  ;;  %2336 = vmatmul.bf16.gmra.mxu3 %v5036_v2  ;;  %v5039_v42 = vpack.c.bf16 %v2807_v31, %v2805_v59  ;;  %v1470_v48 = vadd.f32 %v1469_v34, %v4765_v51  ;;  %v3930_v34 = vld [vmem:[%s5451_s7] sm:$0xff] }
 0x34b   :  { %v2168_v18 = vpop.f32.mrf.mxu2  ;;  %3052 = vmatpush.bf16.msra.mxu2 %v3930_v34 }
 0x34c   :  { %v2169_v12 = vadd.f32 %v2168_v18, %v4898_v39  ;;  %2390 = vmatmul.bf16.gmra.mxu0 %v4577_v35  ;;  %v1599_v0 = vadd.f32 %v1598_v14, %v1470_v48 }
 0x34d   :  { %2519 = vmatmul.bf16.gmra.mxu1 %v4818_v47  ;;  %v2297_v3 = vpop.f32.mrf.mxu3 }
 0x34e   :  { %v2298_v1 = vadd.f32 %v2297_v3, %v2169_v12  ;;  %v1844_v45 = vmax.f32 %v1599_v0, 0.0 }
 0x350   :  { %v2809_v35 = vmax.f32 %v2298_v1, 0.0 }
 0x351   :  { %v1471_v61 = vpop.f32.mrf.mxu0 }
 0x352   :  { %v1472_v17 = vadd.f32 %v1471_v61, %v4765_v51  ;;  %v1600_v43 = vpop.f32.mrf.mxu1 }
 0x353   :  { %v2170_v15 = vpop.f32.mrf.mxu2 }
 0x354   :  { %v1601_v60 = vadd.f32 %v1600_v43, %v1472_v17  ;;  %v2171_v31 = vadd.f32 %v2170_v15, %v4898_v39  ;;  %v3938_v43 = vld [vmem:[%s5451_s7 + $0x40] sm:$0xff] }
 0x355   :  { %v2299_v41 = vpop.f32.mrf.mxu3  ;;  %3181 = vmatpush.bf16.msra.mxu3 %v3938_v43 }
 0x356   :  { %v1846_v23 = vmax.f32 %v1601_v60, 0.0  ;;  %v2300_v59 = vadd.f32 %v2299_v41, %v2171_v31 }
 0x358   :  { %v2811_v18 = vmax.f32 %v2300_v59, 0.0  ;;  %2212 = vmatmul.bf16.gmra.mxu2 %v4836_v62  ;;  %v5048_v47 = vpack.c.bf16 %v1846_v23, %v1844_v45 }
 0x359   :  { %v1474_v14 = vpop.f32.mrf.mxu0 }
 0x35a   :  { %v1603_v12 = vpop.f32.mrf.mxu1  ;;  %2341 = vmatmul.bf16.gmra.mxu3 %v5048_v47  ;;  %v5054_v3 = vpack.c.bf16 %v2811_v18, %v2809_v35  ;;  %v1475_v0 = vadd.f32 %v1474_v14, %v4765_v51 }
 0x35b   :  { %v2173_v48 = vpop.f32.mrf.mxu2 }
 0x35c   :  { %v2174_v61 = vadd.f32 %v2173_v48, %v4898_v39  ;;  %2395 = vmatmul.bf16.gmra.mxu0 %v4596_v32  ;;  %v1604_v60 = vadd.f32 %v1603_v12, %v1475_v0 }
 0x35d   :  { %2524 = vmatmul.bf16.gmra.mxu1 %v4830_v25  ;;  %v2302_v1 = vpop.f32.mrf.mxu3 }
 0x35e   :  { %v2303_v17 = vadd.f32 %v2302_v1, %v2174_v61  ;;  %v1848_v25 = vmax.f32 %v1604_v60, 0.0 }
 0x360   :  { %v2813_v34 = vmax.f32 %v2303_v17, 0.0 }
 0x361   :  { %v1476_v15 = vpop.f32.mrf.mxu0 }
 0x362   :  { %v1477_v31 = vadd.f32 %v1476_v15, %v4765_v51  ;;  %v1605_v41 = vpop.f32.mrf.mxu1 }
 0x363   :  { %v2175_v45 = vpop.f32.mrf.mxu2 }
 0x364   :  { %v1606_v23 = vadd.f32 %v1605_v41, %v1477_v31  ;;  %v2176_v32 = vadd.f32 %v2175_v45, %v4898_v39 }
 0x365   :  { %v2304_v59 = vpop.f32.mrf.mxu3 }
 0x366   :  { %v1850_v35 = vmax.f32 %v1606_v23, 0.0  ;;  %v2305_v18 = vadd.f32 %v2304_v59, %v2176_v32 }
 0x368   :  { %v2815_v14 = vmax.f32 %v2305_v18, 0.0  ;;  %2217 = vmatmul.bf16.gmra.mxu2 %v4851_v40  ;;  %v5066_v48 = vpack.c.bf16 %v1850_v35, %v1848_v25 }
 0x369   :  { %v1479_v61 = vpop.f32.mrf.mxu0 }
 0x36a   :  { %v1608_v1 = vpop.f32.mrf.mxu1  ;;  %2346 = vmatmul.bf16.gmra.mxu3 %v5066_v48  ;;  %v5069_v12 = vpack.c.bf16 %v2815_v14, %v2813_v34  ;;  %v1480_v17 = vadd.f32 %v1479_v61, %v4765_v51 }
 0x36b   :  { %v2178_v0 = vpop.f32.mrf.mxu2 }
 0x36c   :  { %v2179_v43 = vadd.f32 %v2178_v0, %v4898_v39  ;;  %2400 = vmatmul.bf16.gmra.mxu0 %v4615_v56  ;;  %v1609_v41 = vadd.f32 %v1608_v1, %v1480_v17 }
 0x36d   :  { %2529 = vmatmul.bf16.gmra.mxu1 %v4848_v52  ;;  %v2307_v15 = vpop.f32.mrf.mxu3 }
 0x36e   :  { %v2308_v60 = vadd.f32 %v2307_v15, %v2179_v43  ;;  %v1852_v18 = vmax.f32 %v1609_v41, 0.0 }
 0x370   :  { %v2817_v56 = vmax.f32 %v2308_v60, 0.0 }
 0x371   :  { %v1481_v31 = vpop.f32.mrf.mxu0 }
 0x372   :  { %v1482_v45 = vadd.f32 %v1481_v31, %v4765_v51  ;;  %v1610_v23 = vpop.f32.mrf.mxu1 }
 0x373   :  { %v2180_v32 = vpop.f32.mrf.mxu2 }
 0x374   :  { %v1611_v59 = vadd.f32 %v1610_v23, %v1482_v45  ;;  %v2181_v25 = vadd.f32 %v2180_v32, %v4898_v39 }
 0x375   :  { %v2309_v35 = vpop.f32.mrf.mxu3 }
 0x376   :  { %v1854_v34 = vmax.f32 %v1611_v59, 0.0  ;;  %v2310_v14 = vadd.f32 %v2309_v35, %v2181_v25 }
 0x378   :  { %v2819_v0 = vmax.f32 %v2310_v14, 0.0  ;;  %2222 = vmatmul.bf16.gmra.mxu2 %v4863_v38  ;;  %v5078_v52 = vpack.c.bf16 %v1854_v34, %v1852_v18 }
 0x379   :  { %v1484_v61 = vpop.f32.mrf.mxu0 }
 0x37a   :  { %v1613_v43 = vpop.f32.mrf.mxu1  ;;  %2351 = vmatmul.bf16.gmra.mxu3 %v5078_v52  ;;  %v5081_v1 = vpack.c.bf16 %v2819_v0, %v2817_v56  ;;  %v1485_v60 = vadd.f32 %v1484_v61, %v4765_v51 }
 0x37b   :  { %v2183_v15 = vpop.f32.mrf.mxu2 }
 0x37c   :  { %v2184_v17 = vadd.f32 %v2183_v15, %v4898_v39  ;;  %2405 = vmatmul.bf16.gmra.mxu0 %v4631_v55  ;;  %v1614_v23 = vadd.f32 %v1613_v43, %v1485_v60 }
 0x37d   :  { %2534 = vmatmul.bf16.gmra.mxu1 %v4860_v33  ;;  %v2312_v31 = vpop.f32.mrf.mxu3 }
 0x37e   :  { %v2313_v41 = vadd.f32 %v2312_v31, %v2184_v17  ;;  %v1856_v14 = vmax.f32 %v1614_v23, 0.0 }
 0x380   :  { %v2821_v55 = vmax.f32 %v2313_v41, 0.0 }
 0x381   :  { %v1486_v45 = vpop.f32.mrf.mxu0 }
 0x382   :  { %v1487_v32 = vadd.f32 %v1486_v45, %v4765_v51  ;;  %v1615_v59 = vpop.f32.mrf.mxu1 }
 0x383   :  { %v2185_v25 = vpop.f32.mrf.mxu2 }
 0x384   :  { %v1616_v35 = vadd.f32 %v1615_v59, %v1487_v32  ;;  %v2186_v18 = vadd.f32 %v2185_v25, %v4898_v39 }
 0x385   :  { %v2314_v34 = vpop.f32.mrf.mxu3 }
 0x386   :  { %v1858_v56 = vmax.f32 %v1616_v35, 0.0  ;;  %v2315_v0 = vadd.f32 %v2314_v34, %v2186_v18 }
 0x388   :  { %v2823_v15 = vmax.f32 %v2315_v0, 0.0  ;;  %2227 = vmatmul.bf16.gmra.mxu2 %v4878_v53  ;;  %v5090_v33 = vpack.c.bf16 %v1858_v56, %v1856_v14 }
 0x389   :  { %v1489_v61 = vpop.f32.mrf.mxu0 }
 0x38a   :  { %v1618_v17 = vpop.f32.mrf.mxu1  ;;  %2356 = vmatmul.bf16.gmra.mxu3 %v5090_v33  ;;  %v5093_v43 = vpack.c.bf16 %v2823_v15, %v2821_v55  ;;  %v1490_v41 = vadd.f32 %v1489_v61, %v4765_v51 }
 0x38b   :  { %v2188_v31 = vpop.f32.mrf.mxu2 }
 0x38c   :  { %v2189_v60 = vadd.f32 %v2188_v31, %v4898_v39  ;;  %2410 = vmatmul.bf16.gmra.mxu0 %v4647_v54  ;;  %v1619_v59 = vadd.f32 %v1618_v17, %v1490_v41  ;;  %v5105_v17 = vperm.slane %v4892_v5, 1 }
 0x38d   :  { %2539 = vmatmul.bf16.gmra.mxu1 %v4872_v26  ;;  %v2317_v45 = vpop.f32.mrf.mxu3 }
 0x38e   :  { %v2318_v23 = vadd.f32 %v2317_v45, %v2189_v60  ;;  %v1860_v0 = vmax.f32 %v1619_v59, 0.0 }
 0x390   :  { %v2825_v54 = vmax.f32 %v2318_v23, 0.0 }
 0x391   :  { %v1491_v32 = vpop.f32.mrf.mxu0 }
 0x392   :  { %v1492_v25 = vadd.f32 %v1491_v32, %v4765_v51  ;;  %v1620_v35 = vpop.f32.mrf.mxu1 }
 0x393   :  { %v2190_v18 = vpop.f32.mrf.mxu2 }
 0x394   :  { %v1621_v34 = vadd.f32 %v1620_v35, %v1492_v25  ;;  %v2191_v14 = vadd.f32 %v2190_v18, %v4898_v39 }
 0x395   :  { %v2319_v56 = vpop.f32.mrf.mxu3 }
 0x396   :  { %v1862_v55 = vmax.f32 %v1621_v34, 0.0  ;;  %v2320_v15 = vadd.f32 %v2319_v56, %v2191_v14 }
 0x398   :  { %v2827_v31 = vmax.f32 %v2320_v15, 0.0  ;;  %2232 = vmatmul.bf16.gmra.mxu2 %v4901_v16  ;;  %v5102_v26 = vpack.c.bf16 %v1862_v55, %v1860_v0 }
 0x399   :  { %v2376_v61 = vpop.f32.mrf.mxu0 }
 0x39a   :  { %v2505_v51 = vpop.f32.mrf.mxu1  ;;  %2361 = vmatmul.bf16.gmra.mxu3 %v5102_v26  ;;  %v5108_v60 = vpack.c.bf16 %v2827_v31, %v2825_v54  ;;  %v2377_v32 = vadd.f32 %v2376_v61, %v5105_v17 }
 0x39b   :  { %v2193_v45 = vpop.f32.mrf.mxu2 }
 0x39c   :  { %v2194_v41 = vadd.f32 %v2193_v45, %v4898_v39  ;;  %2415 = vmatmul.bf16.gmra.mxu0 %v4663_v20  ;;  %v2506_v35 = vadd.f32 %v2505_v51, %v2377_v32 }
 0x39d   :  { %2544 = vmatmul.bf16.gmra.mxu1 %v4895_v27  ;;  %v2322_v23 = vpop.f32.mrf.mxu3 }
 0x39e   :  { %v2323_v59 = vadd.f32 %v2322_v23, %v2194_v41  ;;  %v2770_v55 = vmax.f32 %v2506_v35, 0.0 }
 0x3a0   :  { %v2829_v20 = vmax.f32 %v2323_v59, 0.0 }
 0x3a1   :  { %v2378_v25 = vpop.f32.mrf.mxu0 }
 0x3a2   :  { %v2379_v5 = vadd.f32 %v2378_v25, %v5105_v17  ;;  %v2507_v18 = vpop.f32.mrf.mxu1 }
 0x3a3   :  { %v2195_v34 = vpop.f32.mrf.mxu2 }
 0x3a4   :  { %v2508_v14 = vadd.f32 %v2507_v18, %v2379_v5  ;;  %v2196_v56 = vadd.f32 %v2195_v34, %v4898_v39 }
 0x3a5   :  { %v2324_v0 = vpop.f32.mrf.mxu3 }
 0x3a6   :  { %v2772_v15 = vmax.f32 %v2508_v14, 0.0  ;;  %v2325_v54 = vadd.f32 %v2324_v0, %v2196_v56 }
 0x3a8   :  { %v2866_v31 = vpack.c.bf16 %v2772_v15, %v2770_v55  ;;  %v2831_v27 = vmax.f32 %v2325_v54, 0.0  ;;  %3053 = vmatmul.bf16.vlgmr.msra.gmra.mxu2 %v4912_v4 }
 0x3a9   :  { %v2381_v61 = vpop.f32.mrf.mxu0 }
 0x3aa   :  { %v2510_v45 = vpop.f32.mrf.mxu1  ;;  %3182 = vmatmul.bf16.vlgmr.msra.gmra.mxu3 %v2866_v31  ;;  %v5117_v51 = vpack.c.bf16 %v2831_v27, %v2829_v20  ;;  %v2382_v25 = vadd.f32 %v2381_v61, %v5105_v17 }
 0x3ab   :  { %v2198_v41 = vpop.f32.mrf.mxu2 }
 0x3ac   :  { %v2199_v23 = vadd.f32 %v2198_v41, %v4898_v39  ;;  %2420 = vmatmul.bf16.gmra.mxu0 %v4679_v19  ;;  %v2511_v5 = vadd.f32 %v2510_v45, %v2382_v25 }
 0x3ad   :  { %2549 = vmatmul.bf16.gmra.mxu1 %v4910_v10  ;;  %v2327_v32 = vpop.f32.mrf.mxu3 }
 0x3ae   :  { %v2328_v59 = vadd.f32 %v2327_v32, %v2199_v23  ;;  %v2774_v55 = vmax.f32 %v2511_v5, 0.0  ;;  %v5477_v23 = vld [vmem:[#allocation14_spill] sm:$0xff] }
 0x3af   :  { %v5478_v32 = vld [vmem:[#allocation18_spill] sm:$0xff] }
 0x3b0   :  { %v2833_v19 = vmax.f32 %v2328_v59, 0.0 }
 0x3b1   :  { %v2383_v35 = vpop.f32.mrf.mxu0 }
 0x3b2   :  { %v2384_v4 = vadd.f32 %v2383_v35, %v5105_v17  ;;  %v2512_v18 = vpop.f32.mrf.mxu1 }
 0x3b3   :  { %v2200_v34 = vpop.f32.mrf.mxu2 }
 0x3b4   :  { %v2513_v14 = vadd.f32 %v2512_v18, %v2384_v4  ;;  %v2201_v56 = vadd.f32 %v2200_v34, %v4898_v39 }
 0x3b5   :  { %v2329_v0 = vpop.f32.mrf.mxu3 }
 0x3b6   :  { %v2776_v15 = vmax.f32 %v2513_v14, 0.0  ;;  %v2330_v54 = vadd.f32 %v2329_v0, %v2201_v56 }
 0x3b8   :  { %v2835_v20 = vmax.f32 %v2330_v54, 0.0  ;;  %3058 = vmatmul.bf16.gmra.mxu2 %v4928_v29  ;;  %v2868_v10 = vpack.c.bf16 %v2776_v15, %v2774_v55 }
 0x3b9   :  { %v2386_v31 = vpop.f32.mrf.mxu0 }
 0x3ba   :  { %v2515_v27 = vpop.f32.mrf.mxu1  ;;  %3187 = vmatmul.bf16.gmra.mxu3 %v2868_v10  ;;  %v5126_v61 = vpack.c.bf16 %v2835_v20, %v2833_v19  ;;  %v2387_v35 = vadd.f32 %v2386_v31, %v5105_v17 }
 0x3bb   :  { %v2203_v45 = vpop.f32.mrf.mxu2 }
 0x3bc   :  { %v2204_v41 = vadd.f32 %v2203_v45, %v4898_v39  ;;  %2425 = vmatmul.bf16.gmra.mxu0 %v5477_v23  ;;  %v2516_v4 = vadd.f32 %v2515_v27, %v2387_v35 }
 0x3bd   :  { %2554 = vmatmul.bf16.gmra.mxu1 %v5478_v32  ;;  %v2332_v25 = vpop.f32.mrf.mxu3 }
 0x3be   :  { %v2333_v59 = vadd.f32 %v2332_v25, %v2204_v41  ;;  %v2778_v55 = vmax.f32 %v2516_v4, 0.0 }
 0x3c0   :  { %v2837_v19 = vmax.f32 %v2333_v59, 0.0 }
 0x3c1   :  { %v2388_v5 = vpop.f32.mrf.mxu0 }
 0x3c2   :  { %v2389_v29 = vadd.f32 %v2388_v5, %v5105_v17  ;;  %v2517_v18 = vpop.f32.mrf.mxu1 }
 0x3c3   :  { %v2205_v34 = vpop.f32.mrf.mxu2 }
 0x3c4   :  { %v2518_v14 = vadd.f32 %v2517_v18, %v2389_v29  ;;  %v2206_v56 = vadd.f32 %v2205_v34, %v4898_v39 }
 0x3c5   :  { %v2334_v0 = vpop.f32.mrf.mxu3 }
 0x3c6   :  { %v2780_v15 = vmax.f32 %v2518_v14, 0.0  ;;  %v2335_v54 = vadd.f32 %v2334_v0, %v2206_v56 }
 0x3c8   :  { %v2839_v20 = vmax.f32 %v2335_v54, 0.0  ;;  %3063 = vmatmul.bf16.gmra.mxu2 %v4943_v7  ;;  %v2870_v10 = vpack.c.bf16 %v2780_v15, %v2778_v55 }
 0x3c9   :  { %v2391_v31 = vpop.f32.mrf.mxu0 }
 0x3ca   :  { %v2520_v45 = vpop.f32.mrf.mxu1  ;;  %3192 = vmatmul.bf16.gmra.mxu3 %v2870_v10  ;;  %v5135_v27 = vpack.c.bf16 %v2839_v20, %v2837_v19  ;;  %v2392_v25 = vadd.f32 %v2391_v31, %v5105_v17 }
 0x3cb   :  { %v2208_v41 = vpop.f32.mrf.mxu2 }
 0x3cc   :  { %v2209_v23 = vadd.f32 %v2208_v41, %v4898_v39  ;;  %2430 = vmatmul.bf16.gmra.mxu0 %v4711_v36  ;;  %v2521_v5 = vadd.f32 %v2520_v45, %v2392_v25 }
 0x3cd   :  { %2559 = vmatmul.bf16.gmra.mxu1 %v4940_v11  ;;  %v2337_v32 = vpop.f32.mrf.mxu3 }
 0x3ce   :  { %v2338_v35 = vadd.f32 %v2337_v32, %v2209_v23  ;;  %v2782_v56 = vmax.f32 %v2521_v5, 0.0 }
 0x3d0   :  { %v2841_v36 = vmax.f32 %v2338_v35, 0.0 }
 0x3d1   :  { %v2393_v59 = vpop.f32.mrf.mxu0 }
 0x3d2   :  { %v2394_v7 = vadd.f32 %v2393_v59, %v5105_v17  ;;  %v2522_v4 = vpop.f32.mrf.mxu1 }
 0x3d3   :  { %v2210_v29 = vpop.f32.mrf.mxu2 }
 0x3d4   :  { %v2523_v18 = vadd.f32 %v2522_v4, %v2394_v7  ;;  %v2211_v34 = vadd.f32 %v2210_v29, %v4898_v39 }
 0x3d5   :  { %v2339_v14 = vpop.f32.mrf.mxu3 }
 0x3d6   :  { %v2784_v0 = vmax.f32 %v2523_v18, 0.0  ;;  %v2340_v55 = vadd.f32 %v2339_v14, %v2211_v34 }
 0x3d8   :  { %v2843_v15 = vmax.f32 %v2340_v55, 0.0  ;;  %3068 = vmatmul.bf16.gmra.mxu2 %v4955_v24  ;;  %v2872_v11 = vpack.c.bf16 %v2784_v0, %v2782_v56 }
 0x3d9   :  { %v2396_v54 = vpop.f32.mrf.mxu0 }
 0x3da   :  { %v2525_v19 = vpop.f32.mrf.mxu1  ;;  %3197 = vmatmul.bf16.gmra.mxu3 %v2872_v11  ;;  %v5144_v20 = vpack.c.bf16 %v2843_v15, %v2841_v36  ;;  %v2397_v41 = vadd.f32 %v2396_v54, %v5105_v17 }
 0x3db   :  { %v2213_v10 = vpop.f32.mrf.mxu2 }
 0x3dc   :  { %v2214_v31 = vadd.f32 %v2213_v10, %v4898_v39  ;;  %2435 = vmatmul.bf16.gmra.mxu0 %v4727_v28  ;;  %v2526_v25 = vadd.f32 %v2525_v19, %v2397_v41 }
 0x3dd   :  { %2564 = vmatmul.bf16.gmra.mxu1 %v4952_v50  ;;  %v2342_v45 = vpop.f32.mrf.mxu3 }
 0x3de   :  { %v2343_v23 = vadd.f32 %v2342_v45, %v2214_v31  ;;  %v2786_v29 = vmax.f32 %v2526_v25, 0.0 }
 0x3e0   :  { %v2845_v28 = vmax.f32 %v2343_v23, 0.0 }
 0x3e1   :  { %v2398_v32 = vpop.f32.mrf.mxu0 }
 0x3e2   :  { %v2399_v24 = vadd.f32 %v2398_v32, %v5105_v17  ;;  %v2527_v35 = vpop.f32.mrf.mxu1 }
 0x3e3   :  { %v2215_v59 = vpop.f32.mrf.mxu2 }
 0x3e4   :  { %v2528_v5 = vadd.f32 %v2527_v35, %v2399_v24  ;;  %v2216_v7 = vadd.f32 %v2215_v59, %v4898_v39 }
 0x3e5   :  { %v2344_v4 = vpop.f32.mrf.mxu3 }
 0x3e6   :  { %v2788_v18 = vmax.f32 %v2528_v5, 0.0  ;;  %v2345_v34 = vadd.f32 %v2344_v4, %v2216_v7 }
 0x3e8   :  { %v2847_v14 = vmax.f32 %v2345_v34, 0.0  ;;  %3073 = vmatmul.bf16.gmra.mxu2 %v4970_v8  ;;  %v2874_v50 = vpack.c.bf16 %v2788_v18, %v2786_v29 }
 0x3e9   :  { %v2401_v56 = vpop.f32.mrf.mxu0 }
 0x3ea   :  { %v2530_v0 = vpop.f32.mrf.mxu1  ;;  %3202 = vmatmul.bf16.gmra.mxu3 %v2874_v50  ;;  %v5153_v55 = vpack.c.bf16 %v2847_v14, %v2845_v28  ;;  %v2402_v54 = vadd.f32 %v2401_v56, %v5105_v17  ;;  %v5479_v28 = vld [vmem:[#allocation12_spill] sm:$0xff] }
 0x3eb   :  { %v2218_v36 = vpop.f32.mrf.mxu2 }
 0x3ec   :  { %v2219_v15 = vadd.f32 %v2218_v36, %v4898_v39  ;;  %2440 = vmatmul.bf16.gmra.mxu0 %v4746_v13  ;;  %v2531_v31 = vadd.f32 %v2530_v0, %v2402_v54 }
 0x3ed   :  { %2569 = vmatmul.bf16.gmra.mxu1 %v4964_v9  ;;  %v2347_v11 = vpop.f32.mrf.mxu3 }
 0x3ee   :  { %v2348_v19 = vadd.f32 %v2347_v11, %v2219_v15  ;;  %v2790_v24 = vmax.f32 %v2531_v31, 0.0 }
 0x3f0   :  { %v2849_v13 = vmax.f32 %v2348_v19, 0.0 }
 0x3f1   :  { %v2403_v10 = vpop.f32.mrf.mxu0 }
 0x3f2   :  { %v2404_v8 = vadd.f32 %v2403_v10, %v5105_v17  ;;  %v2532_v45 = vpop.f32.mrf.mxu1 }
 0x3f3   :  { %v2220_v41 = vpop.f32.mrf.mxu2 }
 0x3f4   :  { %v2533_v23 = vadd.f32 %v2532_v45, %v2404_v8  ;;  %v2221_v32 = vadd.f32 %v2220_v41, %v4898_v39 }
 0x3f5   :  { %v2349_v25 = vpop.f32.mrf.mxu3 }
 0x3f6   :  { %v2792_v35 = vmax.f32 %v2533_v23, 0.0  ;;  %v2350_v59 = vadd.f32 %v2349_v25, %v2221_v32 }
 0x3f8   :  { %v2851_v5 = vmax.f32 %v2350_v59, 0.0  ;;  %3078 = vmatmul.bf16.gmra.mxu2 %v4985_v57  ;;  %v2876_v9 = vpack.c.bf16 %v2792_v35, %v2790_v24 }
 0x3f9   :  { %v2406_v7 = vpop.f32.mrf.mxu0 }
 0x3fa   :  { %v2535_v4 = vpop.f32.mrf.mxu1  ;;  %3207 = vmatmul.bf16.gmra.mxu3 %v2876_v9  ;;  %v5162_v29 = vpack.c.bf16 %v2851_v5, %v2849_v13  ;;  %v2407_v50 = vadd.f32 %v2406_v7, %v5105_v17 }
 0x3fb   :  { %v2223_v18 = vpop.f32.mrf.mxu2 }
 0x3fc   :  { %v2224_v34 = vadd.f32 %v2223_v18, %v4898_v39  ;;  %2445 = vmatmul.bf16.gmra.mxu0 %v4767_v46  ;;  %v2536_v36 = vadd.f32 %v2535_v4, %v2407_v50 }
 0x3fd   :  { %2574 = vmatmul.bf16.gmra.mxu1 %v5479_v28  ;;  %v2352_v14 = vpop.f32.mrf.mxu3 }
 0x3fe   :  { %v2353_v56 = vadd.f32 %v2352_v14, %v2224_v34  ;;  %v2794_v31 = vmax.f32 %v2536_v36, 0.0 }
 0x400   :  { %v2853_v46 = vmax.f32 %v2353_v56, 0.0 }
 0x401   :  { %v2408_v0 = vpop.f32.mrf.mxu0 }
 0x402   :  { %v2409_v57 = vadd.f32 %v2408_v0, %v5105_v17  ;;  %v2537_v15 = vpop.f32.mrf.mxu1 }
 0x403   :  { %v2225_v11 = vpop.f32.mrf.mxu2 }
 0x404   :  { %v2538_v54 = vadd.f32 %v2537_v15, %v2409_v57  ;;  %v2226_v19 = vadd.f32 %v2225_v11, %v4898_v39 }
 0x405   :  { %v2354_v10 = vpop.f32.mrf.mxu3 }
 0x406   :  { %v2796_v8 = vmax.f32 %v2538_v54, 0.0  ;;  %v2355_v45 = vadd.f32 %v2354_v10, %v2226_v19 }
 0x408   :  { %v2855_v41 = vmax.f32 %v2355_v45, 0.0  ;;  %3083 = vmatmul.bf16.gmra.mxu2 %v4997_v21  ;;  %v2878_v23 = vpack.c.bf16 %v2796_v8, %v2794_v31 }
 0x409   :  { %v2411_v32 = vpop.f32.mrf.mxu0 }
 0x40a   :  { %v2540_v25 = vpop.f32.mrf.mxu1  ;;  %3212 = vmatmul.bf16.gmra.mxu3 %v2878_v23  ;;  %v5171_v24 = vpack.c.bf16 %v2855_v41, %v2853_v46  ;;  %v2412_v5 = vadd.f32 %v2411_v32, %v5105_v17 }
 0x40b   :  { %v2228_v35 = vpop.f32.mrf.mxu2 }
 0x40c   :  { %v2229_v59 = vadd.f32 %v2228_v35, %v4898_v39  ;;  %2450 = vmatmul.bf16.gmra.mxu0 %v4779_v49  ;;  %v2541_v4 = vadd.f32 %v2540_v25, %v2412_v5 }
 0x40d   :  { %2579 = vmatmul.bf16.gmra.mxu1 %v4994_v30  ;;  %v2357_v13 = vpop.f32.mrf.mxu3 }
 0x40e   :  { %v2358_v9 = vadd.f32 %v2357_v13, %v2229_v59  ;;  %v2798_v56 = vmax.f32 %v2541_v4, 0.0  ;;  %v5189_v4 = vld [vmem:[#allocation7] ss:$0 sm:$0xff] }
 0x410   :  { %v2857_v49 = vmax.f32 %v2358_v9, 0.0 }
 0x411   :  { %v2413_v7 = vpop.f32.mrf.mxu0 }
 0x412   :  { %v2414_v21 = vadd.f32 %v2413_v7, %v5105_v17  ;;  %v2542_v18 = vpop.f32.mrf.mxu1 }
 0x413   :  { %v2230_v34 = vpop.f32.mrf.mxu2 }
 0x414   :  { %v2543_v28 = vadd.f32 %v2542_v18, %v2414_v21  ;;  %v2231_v14 = vadd.f32 %v2230_v34, %v4898_v39 }
 0x415   :  { %v2359_v50 = vpop.f32.mrf.mxu3 }
 0x416   :  { %v2800_v0 = vmax.f32 %v2543_v28, 0.0  ;;  %v2360_v36 = vadd.f32 %v2359_v50, %v2231_v14 }
 0x418   :  { %v2859_v57 = vmax.f32 %v2360_v36, 0.0  ;;  %3088 = vmatmul.bf16.gmra.mxu2 %v5012_v22  ;;  %v2880_v30 = vpack.c.bf16 %v2800_v0, %v2798_v56 }
 0x419   :  { %v2416_v15 = vpop.f32.mrf.mxu0 }
 0x41a   :  { %v2545_v11 = vpop.f32.mrf.mxu1  ;;  %3217 = vmatmul.bf16.gmra.mxu3 %v2880_v30  ;;  %v5180_v54 = vpack.c.bf16 %v2859_v57, %v2857_v49  ;;  %v2417_v8 = vadd.f32 %v2416_v15, %v5105_v17 }
 0x41b   :  { %v2233_v19 = vpop.f32.mrf.mxu2 }
 0x41c   :  { %v2234_v10 = vadd.f32 %v2233_v19, %v4898_v39  ;;  %2455 = vmatmul.bf16.gmra.mxu0 %v4794_v63  ;;  %v2546_v41 = vadd.f32 %v2545_v11, %v2417_v8 }
 0x41d   :  { %2584 = vmatmul.bf16.gmra.mxu1 %v5006_v37  ;;  %v2362_v31 = vpop.f32.mrf.mxu3 }
 0x41e   :  { %v2363_v45 = vadd.f32 %v2362_v31, %v2234_v10  ;;  %v2802_v13 = vmax.f32 %v2546_v41, 0.0 }
 0x420   :  { %v2861_v63 = vmax.f32 %v2363_v45, 0.0 }
 0x421   :  { %v2418_v46 = vpop.f32.mrf.mxu0 }
 0x422   :  { %v2419_v22 = vadd.f32 %v2418_v46, %v5105_v17  ;;  %v2547_v23 = vpop.f32.mrf.mxu1 }
 0x423   :  { %v2235_v32 = vpop.f32.mrf.mxu2 }
 0x424   :  { %v2548_v25 = vadd.f32 %v2547_v23, %v2419_v22  ;;  %v2236_v35 = vadd.f32 %v2235_v32, %v4898_v39  ;;  %v5480_v39 = vld [vmem:[#allocation13_spill] sm:$0xff] }
 0x425   :  { %v2364_v59 = vpop.f32.mrf.mxu3 }
 0x426   :  { %v2804_v5 = vmax.f32 %v2548_v25, 0.0  ;;  %v2365_v9 = vadd.f32 %v2364_v59, %v2236_v35 }
 0x428   :  { %v2863_v7 = vmax.f32 %v2365_v9, 0.0  ;;  %3093 = vmatmul.bf16.gmra.mxu2 %v5027_v44  ;;  %v2882_v37 = vpack.c.bf16 %v2804_v5, %v2802_v13 }
 0x429   :  { %v2421_v21 = vpop.f32.mrf.mxu0 }
 0x42a   :  { %v2550_v18 = vpop.f32.mrf.mxu1  ;;  %3222 = vmatmul.bf16.gmra.mxu3 %v2882_v37  ;;  %v5191_v34 = vpack.c.bf16 %v2863_v7, %v2861_v63  ;;  %v2422_v56 = vadd.f32 %v2421_v21, %v5105_v17 }
 0x42b   :  { %v3054_v28 = vpop.f32.mrf.mxu2 }
 0x42c   :  { %v3055_v14 = vadd.f32 %v5189_v4, %v3054_v28  ;;  %2460 = vmatmul.bf16.gmra.mxu0 %v4809_v58  ;;  %v2551_v36 = vadd.f32 %v2550_v18, %v2422_v56 }
 0x42d   :  { %2589 = vmatmul.bf16.gmra.mxu1 %v5480_v39  ;;  %v3183_v50 = vpop.f32.mrf.mxu3 }
 0x42e   :  { %v3184_v0 = vadd.f32 %v3183_v50, %v3055_v14  ;;  %v2806_v19 = vmax.f32 %v2551_v36, 0.0 }
 0x430   :  { %3303 = vst [vmem:[%s5453_s9] sm:$0xff] %v3184_v0 }
 0x431   :  { %v2423_v44 = vpop.f32.mrf.mxu0 }
 0x432   :  { %v2424_v49 = vadd.f32 %v2423_v44, %v5105_v17  ;;  %v2552_v57 = vpop.f32.mrf.mxu1 }
 0x433   :  { %v3056_v30 = vpop.f32.mrf.mxu2 }
 0x434   :  { %v2553_v15 = vadd.f32 %v2552_v57, %v2424_v49  ;;  %v3057_v11 = vadd.f32 %v5189_v4, %v3056_v30 }
 0x435   :  { %v3185_v58 = vpop.f32.mrf.mxu3 }
 0x436   :  { %v2808_v10 = vmax.f32 %v2553_v15, 0.0  ;;  %v3186_v31 = vadd.f32 %v3185_v58, %v3057_v11 }
 0x438   :  { %3304 = vst [vmem:[%s5453_s9 + $0x8] sm:$0xff] %v3186_v31  ;;  %3098 = vmatmul.bf16.gmra.mxu2 %v5039_v42  ;;  %v2884_v8 = vpack.c.bf16 %v2808_v10, %v2806_v19 }
 0x439   :  { %v2426_v45 = vpop.f32.mrf.mxu0 }
 0x43a   :  { %v2555_v46 = vpop.f32.mrf.mxu1  ;;  %3227 = vmatmul.bf16.gmra.mxu3 %v2884_v8  ;;  %v2427_v32 = vadd.f32 %v2426_v45, %v5105_v17 }
 0x43b   :  { %v3059_v41 = vpop.f32.mrf.mxu2 }
 0x43c   :  { %v3060_v22 = vadd.f32 %v5189_v4, %v3059_v41  ;;  %2465 = vmatmul.bf16.gmra.mxu0 %v4821_v6  ;;  %v2556_v35 = vadd.f32 %v2555_v46, %v2427_v32 }
 0x43d   :  { %2594 = vmatmul.bf16.gmra.mxu1 %v5036_v2  ;;  %v3188_v23 = vpop.f32.mrf.mxu3 }
 0x43e   :  { %v3189_v25 = vadd.f32 %v3188_v23, %v3060_v22  ;;  %v2810_v7 = vmax.f32 %v2556_v35, 0.0 }
 0x440   :  { %3305 = vst [vmem:[%s5453_s9 + $0x10] sm:$0xff] %v3189_v25 }
 0x441   :  { %v2428_v42 = vpop.f32.mrf.mxu0 }
 0x442   :  { %v2429_v59 = vadd.f32 %v2428_v42, %v5105_v17  ;;  %v2557_v13 = vpop.f32.mrf.mxu1 }
 0x443   :  { %v3061_v5 = vpop.f32.mrf.mxu2 }
 0x444   :  { %v2558_v9 = vadd.f32 %v2557_v13, %v2429_v59  ;;  %v3062_v63 = vadd.f32 %v5189_v4, %v3061_v5 }
 0x445   :  { %v3190_v6 = vpop.f32.mrf.mxu3 }
 0x446   :  { %v2812_v2 = vmax.f32 %v2558_v9, 0.0  ;;  %v3191_v37 = vadd.f32 %v3190_v6, %v3062_v63 }
 0x448   :  { %3306 = vst [vmem:[%s5453_s9 + $0x18] sm:$0xff] %v3191_v37  ;;  %3103 = vmatmul.bf16.gmra.mxu2 %v5054_v3  ;;  %v2886_v21 = vpack.c.bf16 %v2812_v2, %v2810_v7 }
 0x449   :  { %v2431_v18 = vpop.f32.mrf.mxu0 }
 0x44a   :  { %v2560_v28 = vpop.f32.mrf.mxu1  ;;  %3232 = vmatmul.bf16.gmra.mxu3 %v2886_v21  ;;  %v2432_v56 = vadd.f32 %v2431_v18, %v5105_v17 }
 0x44b   :  { %v3064_v14 = vpop.f32.mrf.mxu2 }
 0x44c   :  { %v3065_v39 = vadd.f32 %v5189_v4, %v3064_v14  ;;  %2470 = vmatmul.bf16.gmra.mxu0 %v4836_v62  ;;  %v2561_v44 = vadd.f32 %v2560_v28, %v2432_v56 }
 0x44d   :  { %2599 = vmatmul.bf16.gmra.mxu1 %v5048_v47  ;;  %v3193_v50 = vpop.f32.mrf.mxu3 }
 0x44e   :  { %v3194_v0 = vadd.f32 %v3193_v50, %v3065_v39  ;;  %v2814_v11 = vmax.f32 %v2561_v44, 0.0 }
 0x450   :  { %3307 = vst [vmem:[%s5453_s9 + $0x20] sm:$0xff] %v3194_v0 }
 0x451   :  { %v2433_v3 = vpop.f32.mrf.mxu0 }
 0x452   :  { %v2434_v36 = vadd.f32 %v2433_v3, %v5105_v17  ;;  %v2562_v49 = vpop.f32.mrf.mxu1 }
 0x453   :  { %v3066_v57 = vpop.f32.mrf.mxu2 }
 0x454   :  { %v2563_v30 = vadd.f32 %v2562_v49, %v2434_v36  ;;  %v3067_v15 = vadd.f32 %v5189_v4, %v3066_v57 }
 0x455   :  { %v3195_v62 = vpop.f32.mrf.mxu3 }
 0x456   :  { %v2816_v47 = vmax.f32 %v2563_v30, 0.0  ;;  %v3196_v58 = vadd.f32 %v3195_v62, %v3067_v15 }
 0x458   :  { %3308 = vst [vmem:[%s5453_s9 + $0x28] sm:$0xff] %v3196_v58  ;;  %3108 = vmatmul.bf16.gmra.mxu2 %v5069_v12  ;;  %v2888_v19 = vpack.c.bf16 %v2816_v47, %v2814_v11 }
 0x459   :  { %v2436_v10 = vpop.f32.mrf.mxu0 }
 0x45a   :  { %v2565_v31 = vpop.f32.mrf.mxu1  ;;  %3237 = vmatmul.bf16.gmra.mxu3 %v2888_v19  ;;  %v2437_v41 = vadd.f32 %v2436_v10, %v5105_v17 }
 0x45b   :  { %v3069_v8 = vpop.f32.mrf.mxu2 }
 0x45c   :  { %v3070_v45 = vadd.f32 %v5189_v4, %v3069_v8  ;;  %2475 = vmatmul.bf16.gmra.mxu0 %v4851_v40  ;;  %v2566_v23 = vadd.f32 %v2565_v31, %v2437_v41 }
 0x45d   :  { %2604 = vmatmul.bf16.gmra.mxu1 %v5066_v48  ;;  %v3198_v46 = vpop.f32.mrf.mxu3 }
 0x45e   :  { %v3199_v22 = vadd.f32 %v3198_v46, %v3070_v45  ;;  %v2818_v13 = vmax.f32 %v2566_v23, 0.0 }
 0x460   :  { %3309 = vst [vmem:[%s5453_s9 + $0x30] sm:$0xff] %v3199_v22 }
 0x461   :  { %v2438_v12 = vpop.f32.mrf.mxu0 }
 0x462   :  { %v2439_v32 = vadd.f32 %v2438_v12, %v5105_v17  ;;  %v2567_v25 = vpop.f32.mrf.mxu1 }
 0x463   :  { %v3071_v42 = vpop.f32.mrf.mxu2 }
 0x464   :  { %v2568_v35 = vadd.f32 %v2567_v25, %v2439_v32  ;;  %v3072_v59 = vadd.f32 %v5189_v4, %v3071_v42 }
 0x465   :  { %v3200_v40 = vpop.f32.mrf.mxu3 }
 0x466   :  { %v2820_v48 = vmax.f32 %v2568_v35, 0.0  ;;  %v3201_v5 = vadd.f32 %v3200_v40, %v3072_v59 }
 0x468   :  { %v2890_v9 = vpack.c.bf16 %v2820_v48, %v2818_v13  ;;  %3310 = vst [vmem:[%s5453_s9 + $0x38] sm:$0xff] %v3201_v5  ;;  %3113 = vmatmul.bf16.gmra.mxu2 %v5081_v1 }
 0x469   :  { %v2441_v63 = vpop.f32.mrf.mxu0 }
 0x46a   :  { %v2570_v6 = vpop.f32.mrf.mxu1  ;;  %3242 = vmatmul.bf16.gmra.mxu3 %v2890_v9  ;;  %v2442_v21 = vadd.f32 %v2441_v63, %v5105_v17 }
 0x46b   :  { %v3074_v7 = vpop.f32.mrf.mxu2 }
 0x46c   :  { %v3075_v2 = vadd.f32 %v5189_v4, %v3074_v7  ;;  %2480 = vmatmul.bf16.gmra.mxu0 %v4863_v38  ;;  %v2571_v1 = vadd.f32 %v2570_v6, %v2442_v21 }
 0x46d   :  { %2609 = vmatmul.bf16.gmra.mxu1 %v5078_v52  ;;  %v3203_v37 = vpop.f32.mrf.mxu3 }
 0x46e   :  { %v3204_v18 = vadd.f32 %v3203_v37, %v3075_v2  ;;  %v2822_v3 = vmax.f32 %v2571_v1, 0.0 }
 0x470   :  { %3311 = vst [vmem:[%s5453_s9 + $0x40] sm:$0xff] %v3204_v18 }
 0x471   :  { %v2443_v28 = vpop.f32.mrf.mxu0 }
 0x472   :  { %v2444_v14 = vadd.f32 %v2443_v28, %v5105_v17  ;;  %v2572_v39 = vpop.f32.mrf.mxu1 }
 0x473   :  { %v3076_v50 = vpop.f32.mrf.mxu2 }
 0x474   :  { %v2573_v56 = vadd.f32 %v2572_v39, %v2444_v14  ;;  %v3077_v0 = vadd.f32 %v5189_v4, %v3076_v50 }
 0x475   :  { %v3205_v38 = vpop.f32.mrf.mxu3 }
 0x476   :  { %v2824_v52 = vmax.f32 %v2573_v56, 0.0  ;;  %v3206_v44 = vadd.f32 %v3205_v38, %v3077_v0 }
 0x478   :  { %v2892_v36 = vpack.c.bf16 %v2824_v52, %v2822_v3  ;;  %3312 = vst [vmem:[%s5453_s9 + $0x48] sm:$0xff] %v3206_v44  ;;  %3118 = vmatmul.bf16.gmra.mxu2 %v5093_v43 }
 0x479   :  { %v2446_v49 = vpop.f32.mrf.mxu0 }
 0x47a   :  { %v2575_v57 = vpop.f32.mrf.mxu1  ;;  %3247 = vmatmul.bf16.gmra.mxu3 %v2892_v36  ;;  %v2447_v11 = vadd.f32 %v2446_v49, %v5105_v17 }
 0x47b   :  { %v3079_v30 = vpop.f32.mrf.mxu2 }
 0x47c   :  { %v3080_v15 = vadd.f32 %v5189_v4, %v3079_v30  ;;  %2485 = vmatmul.bf16.gmra.mxu0 %v4878_v53  ;;  %v2576_v43 = vadd.f32 %v2575_v57, %v2447_v11 }
 0x47d   :  { %2614 = vmatmul.bf16.gmra.mxu1 %v5090_v33  ;;  %v3208_v62 = vpop.f32.mrf.mxu3 }
 0x47e   :  { %v3209_v47 = vadd.f32 %v3208_v62, %v3080_v15  ;;  %v2826_v46 = vmax.f32 %v2576_v43, 0.0 }
 0x480   :  { %3313 = vst [vmem:[%s5453_s9 + $0x50] sm:$0xff] %v3209_v47 }
 0x481   :  { %v2448_v58 = vpop.f32.mrf.mxu0 }
 0x482   :  { %v2449_v19 = vadd.f32 %v2448_v58, %v5105_v17  ;;  %v2577_v10 = vpop.f32.mrf.mxu1 }
 0x483   :  { %v3081_v31 = vpop.f32.mrf.mxu2 }
 0x484   :  { %v2578_v8 = vadd.f32 %v2577_v10, %v2449_v19  ;;  %v3082_v45 = vadd.f32 %v5189_v4, %v3081_v31 }
 0x485   :  { %v3210_v53 = vpop.f32.mrf.mxu3 }
 0x486   :  { %v2828_v33 = vmax.f32 %v2578_v8, 0.0  ;;  %v3211_v41 = vadd.f32 %v3210_v53, %v3082_v45 }
 0x488   :  { %v2894_v22 = vpack.c.bf16 %v2828_v33, %v2826_v46  ;;  %3314 = vst [vmem:[%s5453_s9 + $0x58] sm:$0xff] %v3211_v41  ;;  %3123 = vmatmul.bf16.gmra.mxu2 %v5108_v60 }
 0x489   :  { %v2451_v12 = vpop.f32.mrf.mxu0 }
 0x48a   :  { %v2580_v23 = vpop.f32.mrf.mxu1  ;;  %3252 = vmatmul.bf16.gmra.mxu3 %v2894_v22  ;;  %v2452_v35 = vadd.f32 %v2451_v12, %v5105_v17 }
 0x48b   :  { %v3084_v32 = vpop.f32.mrf.mxu2 }
 0x48c   :  { %v3085_v25 = vadd.f32 %v5189_v4, %v3084_v32  ;;  %2490 = vmatmul.bf16.gmra.mxu0 %v4901_v16  ;;  %v2581_v60 = vadd.f32 %v2580_v23, %v2452_v35 }
 0x48d   :  { %2619 = vmatmul.bf16.gmra.mxu1 %v5102_v26  ;;  %v3213_v42 = vpop.f32.mrf.mxu3 }
 0x48e   :  { %v3214_v59 = vadd.f32 %v3213_v42, %v3085_v25  ;;  %v2830_v6 = vmax.f32 %v2581_v60, 0.0 }
 0x490   :  { %3315 = vst [vmem:[%s5453_s9 + $0x60] sm:$0xff] %v3214_v59 }
 0x491   :  { %v2453_v40 = vpop.f32.mrf.mxu0 }
 0x492   :  { %v2454_v13 = vadd.f32 %v2453_v40, %v5105_v17  ;;  %v2582_v48 = vpop.f32.mrf.mxu1 }
 0x493   :  { %v3086_v5 = vpop.f32.mrf.mxu2 }
 0x494   :  { %v2583_v9 = vadd.f32 %v2582_v48, %v2454_v13  ;;  %v3087_v63 = vadd.f32 %v5189_v4, %v3086_v5 }
 0x495   :  { %v3215_v16 = vpop.f32.mrf.mxu3 }
 0x496   :  { %v2832_v26 = vmax.f32 %v2583_v9, 0.0  ;;  %v3216_v7 = vadd.f32 %v3215_v16, %v3087_v63 }
 0x498   :  { %v2896_v2 = vpack.c.bf16 %v2832_v26, %v2830_v6  ;;  %3316 = vst [vmem:[%s5453_s9 + $0x68] sm:$0xff] %v3216_v7  ;;  %3128 = vmatmul.bf16.gmra.mxu2 %v5117_v51 }
 0x499   :  { %v2456_v37 = vpop.f32.mrf.mxu0 }
 0x49a   :  { %v2585_v21 = vpop.f32.mrf.mxu1  ;;  %3257 = vmatmul.bf16.gmra.mxu3 %v2896_v2  ;;  %v2457_v14 = vadd.f32 %v2456_v37, %v5105_v17 }
 0x49b   :  { %v3089_v18 = vpop.f32.mrf.mxu2 }
 0x49c   :  { %v3090_v28 = vadd.f32 %v5189_v4, %v3089_v18  ;;  %v2586_v56 = vadd.f32 %v2585_v21, %v2457_v14 }
 0x49d   :  { %v3218_v1 = vpop.f32.mrf.mxu3 }
 0x49e   :  { %v3219_v39 = vadd.f32 %v3218_v1, %v3090_v28  ;;  %v2834_v36 = vmax.f32 %v2586_v56, 0.0 }
 0x4a0   :  { %3317 = vst [vmem:[%s5453_s9 + $0x70] sm:$0xff] %v3219_v39 }
 0x4a1   :  { %v2458_v50 = vpop.f32.mrf.mxu0 }
 0x4a2   :  { %v2459_v0 = vadd.f32 %v2458_v50, %v5105_v17  ;;  %v2587_v38 = vpop.f32.mrf.mxu1 }
 0x4a3   :  { %v3091_v51 = vpop.f32.mrf.mxu2 }
 0x4a4   :  { %v2588_v3 = vadd.f32 %v2587_v38, %v2459_v0  ;;  %v3092_v52 = vadd.f32 %v5189_v4, %v3091_v51 }
 0x4a5   :  { %v3220_v44 = vpop.f32.mrf.mxu3 }
 0x4a6   :  { %v2836_v49 = vmax.f32 %v2588_v3, 0.0  ;;  %v3221_v57 = vadd.f32 %v3220_v44, %v3092_v52 }
 0x4a8   :  { %v2898_v30 = vpack.c.bf16 %v2836_v49, %v2834_v36  ;;  %3318 = vst [vmem:[%s5453_s9 + $0x78] sm:$0xff] %v3221_v57  ;;  %3133 = vmatmul.bf16.gmra.mxu2 %v5126_v61 }
 0x4a9   :  { %v2461_v15 = vpop.f32.mrf.mxu0 }
 0x4aa   :  { %v2590_v62 = vpop.f32.mrf.mxu1  ;;  %3262 = vmatmul.bf16.gmra.mxu3 %v2898_v30  ;;  %v2462_v43 = vadd.f32 %v2461_v15, %v5105_v17 }
 0x4ab   :  { %v3094_v11 = vpop.f32.mrf.mxu2 }
 0x4ac   :  { %v3095_v47 = vadd.f32 %v5189_v4, %v3094_v11  ;;  %v2591_v31 = vadd.f32 %v2590_v62, %v2462_v43 }
 0x4ad   :  { %v3223_v58 = vpop.f32.mrf.mxu3 }
 0x4ae   :  { %v3224_v19 = vadd.f32 %v3223_v58, %v3095_v47  ;;  %v2838_v41 = vmax.f32 %v2591_v31, 0.0 }
 0x4b0   :  { %3319 = vst [vmem:[%s5453_s9 + $0x80] sm:$0xff] %v3224_v19 }
 0x4b1   :  { %v2463_v10 = vpop.f32.mrf.mxu0 }
 0x4b2   :  { %v2464_v8 = vadd.f32 %v2463_v10, %v5105_v17  ;;  %v2592_v45 = vpop.f32.mrf.mxu1 }
 0x4b3   :  { %v3096_v61 = vpop.f32.mrf.mxu2 }
 0x4b4   :  { %v2593_v53 = vadd.f32 %v2592_v45, %v2464_v8  ;;  %v3097_v46 = vadd.f32 %v5189_v4, %v3096_v61 }
 0x4b5   :  { %v3225_v33 = vpop.f32.mrf.mxu3 }
 0x4b6   :  { %v2840_v22 = vmax.f32 %v2593_v53, 0.0  ;;  %v3226_v12 = vadd.f32 %v3225_v33, %v3097_v46 }
 0x4b8   :  { %v2900_v23 = vpack.c.bf16 %v2840_v22, %v2838_v41  ;;  %3320 = vst [vmem:[%s5453_s9 + $0x88] sm:$0xff] %v3226_v12  ;;  %3138 = vmatmul.bf16.gmra.mxu2 %v5135_v27 }
 0x4b9   :  { %v2466_v32 = vpop.f32.mrf.mxu0 }
 0x4ba   :  { %v2595_v25 = vpop.f32.mrf.mxu1  ;;  %3267 = vmatmul.bf16.gmra.mxu3 %v2900_v23  ;;  %v2467_v40 = vadd.f32 %v2466_v32, %v5105_v17 }
 0x4bb   :  { %v3099_v42 = vpop.f32.mrf.mxu2 }
 0x4bc   :  { %v3100_v35 = vadd.f32 %v5189_v4, %v3099_v42  ;;  %v2596_v48 = vadd.f32 %v2595_v25, %v2467_v40 }
 0x4bd   :  { %v3228_v59 = vpop.f32.mrf.mxu3 }
 0x4be   :  { %v3229_v60 = vadd.f32 %v3228_v59, %v3100_v35  ;;  %v2842_v26 = vmax.f32 %v2596_v48, 0.0 }
 0x4c0   :  { %3321 = vst [vmem:[%s5453_s9 + $0x90] sm:$0xff] %v3229_v60 }
 0x4c1   :  { %v2468_v13 = vpop.f32.mrf.mxu0 }
 0x4c2   :  { %v2469_v5 = vadd.f32 %v2468_v13, %v5105_v17  ;;  %v2597_v9 = vpop.f32.mrf.mxu1 }
 0x4c3   :  { %v3101_v27 = vpop.f32.mrf.mxu2 }
 0x4c4   :  { %v2598_v63 = vadd.f32 %v2597_v9, %v2469_v5  ;;  %v3102_v16 = vadd.f32 %v5189_v4, %v3101_v27 }
 0x4c5   :  { %v3230_v6 = vpop.f32.mrf.mxu3 }
 0x4c6   :  { %v2844_v7 = vmax.f32 %v2598_v63, 0.0  ;;  %v3231_v2 = vadd.f32 %v3230_v6, %v3102_v16 }
 0x4c8   :  { %v2902_v37 = vpack.c.bf16 %v2844_v7, %v2842_v26  ;;  %3322 = vst [vmem:[%s5453_s9 + $0x98] sm:$0xff] %v3231_v2  ;;  %3143 = vmatmul.bf16.gmra.mxu2 %v5144_v20 }
 0x4c9   :  { %v2471_v21 = vpop.f32.mrf.mxu0 }
 0x4ca   :  { %v2600_v18 = vpop.f32.mrf.mxu1  ;;  %3272 = vmatmul.bf16.gmra.mxu3 %v2902_v37  ;;  %v2472_v39 = vadd.f32 %v2471_v21, %v5105_v17 }
 0x4cb   :  { %v3104_v28 = vpop.f32.mrf.mxu2 }
 0x4cc   :  { %v3105_v1 = vadd.f32 %v5189_v4, %v3104_v28  ;;  %v2601_v0 = vadd.f32 %v2600_v18, %v2472_v39 }
 0x4cd   :  { %v3233_v14 = vpop.f32.mrf.mxu3 }
 0x4ce   :  { %v3234_v50 = vadd.f32 %v3233_v14, %v3105_v1  ;;  %v2846_v36 = vmax.f32 %v2601_v0, 0.0 }
 0x4d0   :  { %3323 = vst [vmem:[%s5453_s9 + $0xa0] sm:$0xff] %v3234_v50 }
 0x4d1   :  { %v2473_v56 = vpop.f32.mrf.mxu0 }
 0x4d2   :  { %v2474_v38 = vadd.f32 %v2473_v56, %v5105_v17  ;;  %v2602_v51 = vpop.f32.mrf.mxu1 }
 0x4d3   :  { %v3106_v20 = vpop.f32.mrf.mxu2 }
 0x4d4   :  { %v2603_v3 = vadd.f32 %v2602_v51, %v2474_v38  ;;  %v3107_v52 = vadd.f32 %v5189_v4, %v3106_v20 }
 0x4d5   :  { %v3235_v44 = vpop.f32.mrf.mxu3 }
 0x4d6   :  { %v2848_v49 = vmax.f32 %v2603_v3, 0.0  ;;  %v3236_v57 = vadd.f32 %v3235_v44, %v3107_v52 }
 0x4d8   :  { %v2904_v30 = vpack.c.bf16 %v2848_v49, %v2846_v36  ;;  %3324 = vst [vmem:[%s5453_s9 + $0xa8] sm:$0xff] %v3236_v57  ;;  %3148 = vmatmul.bf16.gmra.mxu2 %v5153_v55 }
 0x4d9   :  { %v2476_v15 = vpop.f32.mrf.mxu0 }
 0x4da   :  { %v2605_v62 = vpop.f32.mrf.mxu1  ;;  %3277 = vmatmul.bf16.gmra.mxu3 %v2904_v30  ;;  %v2477_v43 = vadd.f32 %v2476_v15, %v5105_v17 }
 0x4db   :  { %v3109_v11 = vpop.f32.mrf.mxu2 }
 0x4dc   :  { %v3110_v47 = vadd.f32 %v5189_v4, %v3109_v11  ;;  %v2606_v31 = vadd.f32 %v2605_v62, %v2477_v43 }
 0x4dd   :  { %v3238_v58 = vpop.f32.mrf.mxu3 }
 0x4de   :  { %v3239_v19 = vadd.f32 %v3238_v58, %v3110_v47  ;;  %v2850_v33 = vmax.f32 %v2606_v31, 0.0 }
 0x4e0   :  { %3325 = vst [vmem:[%s5453_s9 + $0xb0] sm:$0xff] %v3239_v19 }
 0x4e1   :  { %v2478_v10 = vpop.f32.mrf.mxu0 }
 0x4e2   :  { %v2479_v8 = vadd.f32 %v2478_v10, %v5105_v17  ;;  %v2607_v45 = vpop.f32.mrf.mxu1 }
 0x4e3   :  { %v3111_v55 = vpop.f32.mrf.mxu2 }
 0x4e4   :  { %v2608_v61 = vadd.f32 %v2607_v45, %v2479_v8  ;;  %v3112_v53 = vadd.f32 %v5189_v4, %v3111_v55 }
 0x4e5   :  { %v3240_v46 = vpop.f32.mrf.mxu3 }
 0x4e6   :  { %v2852_v41 = vmax.f32 %v2608_v61, 0.0  ;;  %v3241_v22 = vadd.f32 %v3240_v46, %v3112_v53 }
 0x4e8   :  { %v2906_v12 = vpack.c.bf16 %v2852_v41, %v2850_v33  ;;  %3326 = vst [vmem:[%s5453_s9 + $0xb8] sm:$0xff] %v3241_v22  ;;  %3153 = vmatmul.bf16.gmra.mxu2 %v5162_v29 }
 0x4e9   :  { %v2481_v23 = vpop.f32.mrf.mxu0 }
 0x4ea   :  { %v2610_v32 = vpop.f32.mrf.mxu1  ;;  %3282 = vmatmul.bf16.gmra.mxu3 %v2906_v12  ;;  %v2482_v59 = vadd.f32 %v2481_v23, %v5105_v17 }
 0x4eb   :  { %v3114_v25 = vpop.f32.mrf.mxu2 }
 0x4ec   :  { %v3115_v42 = vadd.f32 %v5189_v4, %v3114_v25  ;;  %v2611_v13 = vadd.f32 %v2610_v32, %v2482_v59 }
 0x4ed   :  { %v3243_v35 = vpop.f32.mrf.mxu3 }
 0x4ee   :  { %v3244_v40 = vadd.f32 %v3243_v35, %v3115_v42  ;;  %v2854_v16 = vmax.f32 %v2611_v13, 0.0 }
 0x4f0   :  { %3327 = vst [vmem:[%s5453_s9 + $0xc0] sm:$0xff] %v3244_v40 }
 0x4f1   :  { %v2483_v60 = vpop.f32.mrf.mxu0 }
 0x4f2   :  { %v2484_v48 = vadd.f32 %v2483_v60, %v5105_v17  ;;  %v2612_v5 = vpop.f32.mrf.mxu1 }
 0x4f3   :  { %v3116_v29 = vpop.f32.mrf.mxu2 }
 0x4f4   :  { %v2613_v9 = vadd.f32 %v2612_v5, %v2484_v48  ;;  %v3117_v27 = vadd.f32 %v5189_v4, %v3116_v29 }
 0x4f5   :  { %v3245_v63 = vpop.f32.mrf.mxu3 }
 0x4f6   :  { %v2856_v6 = vmax.f32 %v2613_v9, 0.0  ;;  %v3246_v26 = vadd.f32 %v3245_v63, %v3117_v27 }
 0x4f8   :  { %v2908_v7 = vpack.c.bf16 %v2856_v6, %v2854_v16  ;;  %3328 = vst [vmem:[%s5453_s9 + $0xc8] sm:$0xff] %v3246_v26  ;;  %3158 = vmatmul.bf16.gmra.mxu2 %v5171_v24 }
 0x4f9   :  { %v2486_v2 = vpop.f32.mrf.mxu0 }
 0x4fa   :  { %v2615_v37 = vpop.f32.mrf.mxu1  ;;  %3287 = vmatmul.bf16.gmra.mxu3 %v2908_v7  ;;  %v2487_v1 = vadd.f32 %v2486_v2, %v5105_v17 }
 0x4fb   :  { %v3119_v21 = vpop.f32.mrf.mxu2 }
 0x4fc   :  { %v3120_v18 = vadd.f32 %v5189_v4, %v3119_v21  ;;  %v2616_v50 = vadd.f32 %v2615_v37, %v2487_v1 }
 0x4fd   :  { %v3248_v28 = vpop.f32.mrf.mxu3 }
 0x4fe   :  { %v3249_v14 = vadd.f32 %v3248_v28, %v3120_v18  ;;  %v2858_v3 = vmax.f32 %v2616_v50, 0.0 }
 0x500   :  { %3329 = vst [vmem:[%s5453_s9 + $0xd0] sm:$0xff] %v3249_v14 }
 0x501   :  { %v2488_v39 = vpop.f32.mrf.mxu0 }
 0x502   :  { %v2489_v56 = vadd.f32 %v2488_v39, %v5105_v17  ;;  %v2617_v0 = vpop.f32.mrf.mxu1 }
 0x503   :  { %v3121_v24 = vpop.f32.mrf.mxu2 }
 0x504   :  { %v2618_v38 = vadd.f32 %v2617_v0, %v2489_v56  ;;  %v3122_v51 = vadd.f32 %v5189_v4, %v3121_v24 }
 0x505   :  { %v3250_v20 = vpop.f32.mrf.mxu3 }
 0x506   :  { %v2860_v52 = vmax.f32 %v2618_v38, 0.0  ;;  %v3251_v44 = vadd.f32 %v3250_v20, %v3122_v51 }
 0x508   :  { %v2910_v36 = vpack.c.bf16 %v2860_v52, %v2858_v3  ;;  %3330 = vst [vmem:[%s5453_s9 + $0xd8] sm:$0xff] %v3251_v44  ;;  %3163 = vmatmul.bf16.gmra.mxu2 %v5180_v54 }
 0x509   :  { %v2491_v49 = vpop.f32.mrf.mxu0 }
 0x50a   :  { %v2620_v57 = vpop.f32.mrf.mxu1  ;;  %3292 = vmatmul.bf16.gmra.mxu3 %v2910_v36  ;;  %v2492_v11 = vadd.f32 %v2491_v49, %v5105_v17 }
 0x50b   :  { %v3124_v30 = vpop.f32.mrf.mxu2 }
 0x50c   :  { %v3125_v15 = vadd.f32 %v5189_v4, %v3124_v30  ;;  %v2621_v43 = vadd.f32 %v2620_v57, %v2492_v11 }
 0x50d   :  { %v3253_v62 = vpop.f32.mrf.mxu3 }
 0x50e   :  { %v3254_v47 = vadd.f32 %v3253_v62, %v3125_v15  ;;  %v2862_v55 = vmax.f32 %v2621_v43, 0.0 }
 0x510   :  { %3331 = vst [vmem:[%s5453_s9 + $0xe0] sm:$0xff] %v3254_v47 }
 0x511   :  { %v2493_v58 = vpop.f32.mrf.mxu0 }
 0x512   :  { %v2494_v19 = vadd.f32 %v2493_v58, %v5105_v17  ;;  %v2622_v10 = vpop.f32.mrf.mxu1 }
 0x513   :  { %v3126_v54 = vpop.f32.mrf.mxu2 }
 0x514   :  { %v2623_v31 = vadd.f32 %v2622_v10, %v2494_v19  ;;  %v3127_v8 = vadd.f32 %v5189_v4, %v3126_v54 }
 0x515   :  { %v3255_v45 = vpop.f32.mrf.mxu3 }
 0x516   :  { %v2864_v61 = vmax.f32 %v2623_v31, 0.0  ;;  %v3256_v53 = vadd.f32 %v3255_v45, %v3127_v8 }
 0x518   :  { %v2912_v46 = vpack.c.bf16 %v2864_v61, %v2862_v55  ;;  %3332 = vst [vmem:[%s5453_s9 + $0xe8] sm:$0xff] %v3256_v53  ;;  %3168 = vmatmul.bf16.gmra.mxu2 %v5191_v34 }
 0x51a   :  { %3297 = vmatmul.bf16.gmra.mxu3 %v2912_v46 }
 0x51b   :  { %v3129_v33 = vpop.f32.mrf.mxu2 }
 0x51c   :  { %v3130_v17 = vadd.f32 %v5189_v4, %v3129_v33 }
 0x51d   :  { %v3258_v41 = vpop.f32.mrf.mxu3 }
 0x51e   :  { %v3259_v22 = vadd.f32 %v3258_v41, %v3130_v17 }
 0x520   :  { %3333 = vst [vmem:[%s5453_s9 + $0xf0] sm:$0xff] %v3259_v22 }
 0x523   :  { %v3131_v12 = vpop.f32.mrf.mxu2 }
 0x524   :  { %v3132_v23 = vadd.f32 %v5189_v4, %v3131_v12 }
 0x525   :  { %v3260_v32 = vpop.f32.mrf.mxu3 }
 0x526   :  { %v3261_v25 = vadd.f32 %v3260_v32, %v3132_v23 }
 0x528   :  { %3334 = vst [vmem:[%s5453_s9 + $0xf8] sm:$0xff] %v3261_v25 }
 0x52b   :  { %v3134_v34 = vpop.f32.mrf.mxu2 }
 0x52c   :  { %v3135_v42 = vadd.f32 %v5189_v4, %v3134_v34 }
 0x52d   :  { %v3263_v35 = vpop.f32.mrf.mxu3 }
 0x52e   :  { %v3264_v59 = vadd.f32 %v3263_v35, %v3135_v42 }
 0x530   :  { %3335 = vst [vmem:[%s5453_s9 + $0x100] sm:$0xff] %v3264_v59 }
 0x533   :  { %v3136_v40 = vpop.f32.mrf.mxu2 }
 0x534   :  { %v3137_v60 = vadd.f32 %v5189_v4, %v3136_v40 }
 0x535   :  { %v3265_v13 = vpop.f32.mrf.mxu3 }
 0x536   :  { %v3266_v48 = vadd.f32 %v3265_v13, %v3137_v60 }
 0x538   :  { %3336 = vst [vmem:[%s5453_s9 + $0x108] sm:$0xff] %v3266_v48 }
 0x53b   :  { %v3139_v5 = vpop.f32.mrf.mxu2 }
 0x53c   :  { %v3140_v29 = vadd.f32 %v5189_v4, %v3139_v5 }
 0x53d   :  { %v3268_v9 = vpop.f32.mrf.mxu3 }
 0x53e   :  { %v3269_v27 = vadd.f32 %v3268_v9, %v3140_v29 }
 0x540   :  { %3337 = vst [vmem:[%s5453_s9 + $0x110] sm:$0xff] %v3269_v27 }
 0x543   :  { %v3141_v63 = vpop.f32.mrf.mxu2 }
 0x544   :  { %v3142_v16 = vadd.f32 %v5189_v4, %v3141_v63 }
 0x545   :  { %v3270_v6 = vpop.f32.mrf.mxu3 }
 0x546   :  { %v3271_v26 = vadd.f32 %v3270_v6, %v3142_v16 }
 0x548   :  { %3338 = vst [vmem:[%s5453_s9 + $0x118] sm:$0xff] %v3271_v26 }
 0x54b   :  { %v3144_v7 = vpop.f32.mrf.mxu2 }
 0x54c   :  { %v3145_v2 = vadd.f32 %v5189_v4, %v3144_v7 }
 0x54d   :  { %v3273_v37 = vpop.f32.mrf.mxu3 }
 0x54e   :  { %v3274_v21 = vadd.f32 %v3273_v37, %v3145_v2 }
 0x550   :  { %3339 = vst [vmem:[%s5453_s9 + $0x120] sm:$0xff] %v3274_v21 }
 0x553   :  { %v3146_v18 = vpop.f32.mrf.mxu2 }
 0x554   :  { %v3147_v28 = vadd.f32 %v5189_v4, %v3146_v18 }
 0x555   :  { %v3275_v1 = vpop.f32.mrf.mxu3 }
 0x556   :  { %v3276_v14 = vadd.f32 %v3275_v1, %v3147_v28 }
 0x558   :  { %3340 = vst [vmem:[%s5453_s9 + $0x128] sm:$0xff] %v3276_v14 }
 0x55b   :  { %v3149_v39 = vpop.f32.mrf.mxu2 }
 0x55c   :  { %v3150_v50 = vadd.f32 %v5189_v4, %v3149_v39 }
 0x55d   :  { %v3278_v56 = vpop.f32.mrf.mxu3 }
 0x55e   :  { %v3279_v0 = vadd.f32 %v3278_v56, %v3150_v50 }
 0x560   :  { %3341 = vst [vmem:[%s5453_s9 + $0x130] sm:$0xff] %v3279_v0 }
 0x563   :  { %v3151_v24 = vpop.f32.mrf.mxu2 }
 0x564   :  { %v3152_v38 = vadd.f32 %v5189_v4, %v3151_v24 }
 0x565   :  { %v3280_v51 = vpop.f32.mrf.mxu3 }
 0x566   :  { %v3281_v20 = vadd.f32 %v3280_v51, %v3152_v38 }
 0x568   :  { %3342 = vst [vmem:[%s5453_s9 + $0x138] sm:$0xff] %v3281_v20 }
 0x56b   :  { %v3154_v3 = vpop.f32.mrf.mxu2 }
 0x56c   :  { %v3155_v52 = vadd.f32 %v5189_v4, %v3154_v3 }
 0x56d   :  { %v3283_v44 = vpop.f32.mrf.mxu3 }
 0x56e   :  { %v3284_v36 = vadd.f32 %v3283_v44, %v3155_v52 }
 0x570   :  { %3343 = vst [vmem:[%s5453_s9 + $0x140] sm:$0xff] %v3284_v36 }
 0x573   :  { %v3156_v49 = vpop.f32.mrf.mxu2 }
 0x574   :  { %v3157_v57 = vadd.f32 %v5189_v4, %v3156_v49 }
 0x575   :  { %v3285_v30 = vpop.f32.mrf.mxu3 }
 0x576   :  { %v3286_v15 = vadd.f32 %v3285_v30, %v3157_v57 }
 0x578   :  { %3344 = vst [vmem:[%s5453_s9 + $0x148] sm:$0xff] %v3286_v15 }
 0x57b   :  { %v3159_v62 = vpop.f32.mrf.mxu2 }
 0x57c   :  { %v3160_v11 = vadd.f32 %v5189_v4, %v3159_v62 }
 0x57d   :  { %v3288_v47 = vpop.f32.mrf.mxu3 }
 0x57e   :  { %v3289_v58 = vadd.f32 %v3288_v47, %v3160_v11 }
 0x580   :  { %3345 = vst [vmem:[%s5453_s9 + $0x150] sm:$0xff] %v3289_v58 }
 0x583   :  { %v3161_v43 = vpop.f32.mrf.mxu2 }
 0x584   :  { %v3162_v19 = vadd.f32 %v5189_v4, %v3161_v43 }
 0x585   :  { %v3290_v10 = vpop.f32.mrf.mxu3 }
 0x586   :  { %v3291_v54 = vadd.f32 %v3290_v10, %v3162_v19 }
 0x588   :  { %3346 = vst [vmem:[%s5453_s9 + $0x158] sm:$0xff] %v3291_v54 }
 0x58b   :  { %v3164_v31 = vpop.f32.mrf.mxu2 }
 0x58c   :  { %v3165_v8 = vadd.f32 %v5189_v4, %v3164_v31 }
 0x58d   :  { %v3293_v45 = vpop.f32.mrf.mxu3 }
 0x58e   :  { %v3294_v55 = vadd.f32 %v3293_v45, %v3165_v8 }
 0x590   :  { %3347 = vst [vmem:[%s5453_s9 + $0x160] sm:$0xff] %v3294_v55 }
 0x593   :  { %v3166_v61 = vpop.f32.mrf.mxu2 }
 0x594   :  { %v3167_v53 = vadd.f32 %v5189_v4, %v3166_v61 }
 0x595   :  { %v3295_v46 = vpop.f32.mrf.mxu3 }
 0x596   :  { %v3296_v33 = vadd.f32 %v3295_v46, %v3167_v53 }
 0x598   :  { %3348 = vst [vmem:[%s5453_s9 + $0x168] sm:$0xff] %v3296_v33 }
 0x59b   :  { %v3169_v17 = vpop.f32.mrf.mxu2 }
 0x59c   :  { %v3170_v41 = vadd.f32 %v5189_v4, %v3169_v17 }
 0x59d   :  { %v3298_v22 = vpop.f32.mrf.mxu3 }
 0x59e   :  { %v3299_v12 = vadd.f32 %v3298_v22, %v3170_v41 }
 0x5a0   :  { %3349 = vst [vmem:[%s5453_s9 + $0x170] sm:$0xff] %v3299_v12 }
 0x5a3   :  { %v3171_v23 = vpop.f32.mrf.mxu2 }
 0x5a4   :  { %v3172_v32 = vadd.f32 %v5189_v4, %v3171_v23 }
 0x5a5   :  { %v3300_v25 = vpop.f32.mrf.mxu3 }
 0x5a6   :  { %v3301_v34 = vadd.f32 %v3300_v25, %v3172_v32 }
 0x5a8   :  { %3350 = vst [vmem:[%s5453_s9 + $0x178] sm:$0xff] %v3301_v34 }
 0x5a9   :  { %3355 = vsyncpa [#allocation3], 1 }
 0x5aa   :  { %3356 = vsyncpa [#allocation5], 1 }
 0x5ab   :  { %3357 = vsyncpa [#allocation8], 1 }

</bundles_post_ra>
